<compile_context>
chip_gen: v7x
topology: tpu7x:2x2x1
jax: 0.10.0
libtpu: 0.0.40
codegen_flags: <defaults>
</compile_context>

<pallas_src>
import functools

import jax
import jax.numpy as jnp
from jax.experimental import pallas as pl
from jax.experimental.pallas import tpu as pltpu

_SQRT_HALF = 0.7071067811865476


def _gelu(x):
    # exact (erf-based) GELU, matching torch GELU / activation='gelu'
    return 0.5 * x * (1.0 + jax.lax.erf(x * _SQRT_HALF))


def _softplus(x):
    # numerically stable exact softplus
    return jnp.maximum(x, 0.0) + jnp.log(1.0 + jnp.exp(-jnp.abs(x)))


# --------------------------- fused Pallas kernel ---------------------------

def _fused_kernel(x_ref, pos_ref, tw_ref, in_w_ref, in_b_ref,
                  ln1_g_ref, ln1_b_ref, sa_wi_ref, sa_bi_ref, sa_wo_ref, sa_bo_ref,
                  ln2_g_ref, ln2_b_ref, ff_w1_ref, ff_b1_ref, ff_w2_ref, ff_b2_ref,
                  ca_wi_ref, ca_bi_ref, ca_wo_ref, ca_bo_ref,
                  hw1_ref, hb1_ref, hw2_ref, hb2_ref,
                  out_ref, *, nhead, num_layers, horizon):
    """Whole ClimateTransformer forward for one batch element (grid over B)."""
    x = x_ref[0]                                   # (S, F)
    D = in_w_ref.shape[1]
    hd = D // nhead
    scale = 1.0 / (hd ** 0.5)

    # ---- input projection + positional encoding (fused epilogue add) ----
    h = (jnp.dot(x, in_w_ref[...], preferred_element_type=jnp.float32)
         + in_b_ref[...] + pos_ref[0])             # (S, D)

    def layer_norm(v, g, b):
        mu = jnp.mean(v, axis=-1, keepdims=True)
        var = jnp.mean((v - mu) ** 2, axis=-1, keepdims=True)
        return (v - mu) * jax.lax.rsqrt(var + 1e-5) * g + b

    def mha(v, wi, bi, wo, bo):
        # one fat QKV projection: (S, D) @ (D, 3D)
        qkv = jnp.dot(v, wi, preferred_element_type=jnp.float32) + bi        # (S, 3D)
        # head-separated (nhead, S, hd) tensors
        q = jnp.stack([qkv[:, i * hd:(i + 1) * hd] for i in range(nhead)], axis=0)
        k = jnp.stack([qkv[:, D + i * hd:D + (i + 1) * hd] for i in range(nhead)], axis=0)
        vv = jnp.stack([qkv[:, 2 * D + i * hd:2 * D + (i + 1) * hd]
                        for i in range(nhead)], axis=0)
        # batched scores / softmax / context over all heads at once
        s = jnp.einsum("hqd,hkd->hqk", q, k,
                       preferred_element_type=jnp.float32) * scale            # (H, S, S)
        s = s - jnp.max(s, axis=-1, keepdims=True)
        p = jnp.exp(s)
        p = p / jnp.sum(p, axis=-1, keepdims=True)
        ctx = jnp.einsum("hqk,hkd->hqd", p, vv,
                         preferred_element_type=jnp.float32)                  # (H, S, hd)
        # concat head contexts once, ONE (S,D)@(D,D) out-projection
        ctx2d = jnp.concatenate([ctx[i] for i in range(nhead)], axis=-1)      # (S, D)
        return jnp.dot(ctx2d, wo, preferred_element_type=jnp.float32) + bo

    # ---- pre-LN transformer encoder layers (static unroll) ----
    for l in range(num_layers):
        h = h + mha(layer_norm(h, ln1_g_ref[l], ln1_b_ref[l]),
                    sa_wi_ref[l], sa_bi_ref[l], sa_wo_ref[l], sa_bo_ref[l])
        ff = layer_norm(h, ln2_g_ref[l], ln2_b_ref[l])
        ff = _gelu(jnp.dot(ff, ff_w1_ref[l],
                           preferred_element_type=jnp.float32) + ff_b1_ref[l])
        ff = jnp.dot(ff, ff_w2_ref[l],
                     preferred_element_type=jnp.float32) + ff_b2_ref[l]
        h = h + ff
    # (norm=None in nn.TransformerEncoder -> no final LayerNorm)

    # ---- climate attention (attention weights are discarded by reference) ----
    ctx = mha(h, ca_wi_ref[...], ca_bi_ref[...], ca_wo_ref[...], ca_bo_ref[...])

    # ---- temporal softmax pooling as a matmul in the epilogue ----
    pooled = jnp.dot(tw_ref[...], ctx, preferred_element_type=jnp.float32)    # (1, D)

    # ---- fused prediction heads (mean | variance | trend) ----
    hh = _gelu(jnp.dot(pooled, hw1_ref[...],
                       preferred_element_type=jnp.float32) + hb1_ref[...])    # (1, HID)
    heads = jnp.dot(hh, hw2_ref[...],
                    preferred_element_type=jnp.float32) + hb2_ref[...]        # (1, 3H)
    col = jax.lax.broadcasted_iota(jnp.int32, heads.shape, 1)
    is_var = jnp.logical_and(col >= horizon, col < 2 * horizon)
    out_ref[0] = jnp.where(is_var, _softplus(heads), heads)


# ------------------------------- wrapper -------------------------------

def climate_transformer_forward(x, prep, *, nhead, num_layers, horizon):
    B, S, F = x.shape

    def rep(a):
        shape = a.shape
        return pl.BlockSpec(shape, lambda b, n=len(shape): (0,) * n)

    names = ["pos_enc", "tw", "in_w", "in_b",
             "ln1_g", "ln1_b", "sa_wi", "sa_bi", "sa_wo", "sa_bo",
             "ln2_g", "ln2_b", "ff_w1", "ff_b1", "ff_w2", "ff_b2",
             "ca_wi", "ca_bi", "ca_wo", "ca_bo",
             "head_w1", "head_b1", "head_w2", "head_b2"]
    ops = [prep[n] for n in names]
    in_specs = [pl.BlockSpec((1, S, F), lambda b: (b, 0, 0))] + [rep(a) for a in ops]

    out = pl.pallas_call(
        functools.partial(_fused_kernel, nhead=nhead,
                          num_layers=num_layers, horizon=horizon),
        out_shape=jax.ShapeDtypeStruct((B, 1, 3 * horizon), jnp.float32),
        grid=(B,),
        in_specs=in_specs,
        out_specs=pl.BlockSpec((1, 1, 3 * horizon), lambda b: (b, 0, 0)),
        compiler_params=pltpu.CompilerParams(dimension_semantics=("parallel",)),
    )(x, *ops)

    out = out.reshape(B, 3 * horizon)
    return {"mean": out[:, :horizon],
            "variance": out[:, horizon:2 * horizon],
            "trend": out[:, 2 * horizon:]}


# ------------------------- params & preparation -------------------------

def init_params(key, *, input_dim, d_model, nhead, num_layers, seq_len, horizon):
    keys = iter(jax.random.split(key, 256))

    def w(shape, scale=0.02):
        return (scale * jax.random.normal(next(keys), shape)).astype(jnp.float32)

    def zeros(*shape):
        return jnp.zeros(shape, jnp.float32)

    params = {
        "in_w": w((input_dim, d_model)), "in_b": zeros(d_model),
        "pos_enc": w((1, seq_len, d_model), scale=0.1),
        "layers": [],
        # climate_attention (q,k,v packed along output dim, (in, out) layout)
        "ca_wi": w((d_model, 3 * d_model)), "ca_bi": zeros(3 * d_model),
        "ca_wo": w((d_model, d_model)), "ca_bo": zeros(d_model),
        # prediction heads
        "mean_w1": w((d_model, d_model // 2)), "mean_b1": zeros(d_model // 2),
        "mean_w2": w((d_model // 2, horizon)), "mean_b2": zeros(horizon),
        "var_w1": w((d_model, d_model // 2)), "var_b1": zeros(d_model // 2),
        "var_w2": w((d_model // 2, horizon)), "var_b2": zeros(horizon),
        "trend_w1": w((d_model, d_model // 4)), "trend_b1": zeros(d_model // 4),
        "trend_w2": w((d_model // 4, horizon)), "trend_b2": zeros(horizon),
    }
    for _ in range(num_layers):
        params["layers"].append({
            "ln1_g": jnp.ones((d_model,), jnp.float32), "ln1_b": zeros(d_model),
            "sa_wi": w((d_model, 3 * d_model)), "sa_bi": zeros(3 * d_model),
            "sa_wo": w((d_model, d_model)), "sa_bo": zeros(d_model),
            "ln2_g": jnp.ones((d_model,), jnp.float32), "ln2_b": zeros(d_model),
            "ff_w1": w((d_model, 4 * d_model)), "ff_b1": zeros(4 * d_model),
            "ff_w2": w((4 * d_model, d_model)), "ff_b2": zeros(d_model),
        })
    return params


def prepare_params(p, *, seq_len, horizon):
    """One-time restructuring: stack per-layer weights, pre-reshape biases,
    fuse the three prediction heads (block-diagonal second stage), and
    precompute the softmax temporal-pooling weights."""
    D = p["in_w"].shape[1]
    layers = p["layers"]

    def stack_vec(name):   # per-layer (N,) -> (L, 1, N)
        return jnp.stack([lp[name].reshape(1, -1) for lp in layers], axis=0)

    def stack_mat(name):   # per-layer (K, N) -> (L, K, N)
        return jnp.stack([lp[name] for lp in layers], axis=0)

    H2, H4 = D // 2, D // 4
    head_w2 = jnp.zeros((H2 + H2 + H4, 3 * horizon), jnp.float32)
    head_w2 = head_w2.at[:H2, :horizon].set(p["mean_w2"])
    head_w2 = head_w2.at[H2:2 * H2, horizon:2 * horizon].set(p["var_w2"])
    head_w2 = head_w2.at[2 * H2:, 2 * horizon:].set(p["trend_w2"])

    tw = jax.nn.softmax(jnp.linspace(0.0, 2.0, seq_len).astype(jnp.float32))

    return {
        "pos_enc": p["pos_enc"][:, :seq_len, :],
        "tw": tw.reshape(1, seq_len),
        "in_w": p["in_w"], "in_b": p["in_b"].reshape(1, -1),
        "ln1_g": stack_vec("ln1_g"), "ln1_b": stack_vec("ln1_b"),
        "sa_wi": stack_mat("sa_wi"), "sa_bi": stack_vec("sa_bi"),
        "sa_wo": stack_mat("sa_wo"), "sa_bo": stack_vec("sa_bo"),
        "ln2_g": stack_vec("ln2_g"), "ln2_b": stack_vec("ln2_b"),
        "ff_w1": stack_mat("ff_w1"), "ff_b1": stack_vec("ff_b1"),
        "ff_w2": stack_mat("ff_w2"), "ff_b2": stack_vec("ff_b2"),
        "ca_wi": p["ca_wi"], "ca_bi": p["ca_bi"].reshape(1, -1),
        "ca_wo": p["ca_wo"], "ca_bo": p["ca_bo"].reshape(1, -1),
        "head_w1": jnp.concatenate([p["mean_w1"], p["var_w1"], p["trend_w1"]], axis=1),
        "head_b1": jnp.concatenate([p["mean_b1"], p["var_b1"], p["trend_b1"]]).reshape(1, -1),
        "head_w2": head_w2,
        "head_b2": jnp.concatenate([p["mean_b2"], p["var_b2"], p["trend_b2"]]).reshape(1, -1),
    }


if __name__ == "__main__":
    # small shapes consistent with the module's (batch, seq, input_dim) contract
    B, S, F = 2, 16, 9
    D, NHEAD, NLAYERS, HORIZON = 32, 4, 2, 8

    key = jax.random.PRNGKey(0)
    kp, kx = jax.random.split(key)
    params = init_params(kp, input_dim=F, d_model=D, nhead=NHEAD,
                         num_layers=NLAYERS, seq_len=S, horizon=HORIZON)
    prep = prepare_params(params, seq_len=S, horizon=HORIZON)
    x = jax.random.normal(kx, (B, S, F), jnp.float32)

    fwd = jax.jit(functools.partial(climate_transformer_forward,
                                    nhead=NHEAD, num_layers=NLAYERS, horizon=HORIZON))
    out = fwd(x, prep)
    jax.block_until_ready(out)

    assert out["mean"].shape == (B, HORIZON)
    assert out["variance"].shape == (B, HORIZON)
    assert out["trend"].shape == (B, HORIZON)
    assert bool(jnp.all(out["variance"] >= 0.0))   # softplus output is non-negative
    assert all(bool(jnp.all(jnp.isfinite(v))) for v in out.values())
    print("KERNEL_OK")
</pallas_src>

<mosaic_0001>
module attributes {stable_mosaic.version = 11 : i64} {
  func.func @_fused_kernel(%arg0: i32, %arg1: memref<1x16x9xf32, #tpu.memory_space<vmem>>, %arg2: memref<1x16x32xf32, #tpu.memory_space<vmem>>, %arg3: memref<1x16xf32, #tpu.memory_space<vmem>>, %arg4: memref<9x32xf32, #tpu.memory_space<vmem>>, %arg5: memref<1x32xf32, #tpu.memory_space<vmem>>, %arg6: memref<2x1x32xf32, #tpu.memory_space<vmem>>, %arg7: memref<2x1x32xf32, #tpu.memory_space<vmem>>, %arg8: memref<2x32x96xf32, #tpu.memory_space<vmem>>, %arg9: memref<2x1x96xf32, #tpu.memory_space<vmem>>, %arg10: memref<2x32x32xf32, #tpu.memory_space<vmem>>, %arg11: memref<2x1x32xf32, #tpu.memory_space<vmem>>, %arg12: memref<2x1x32xf32, #tpu.memory_space<vmem>>, %arg13: memref<2x1x32xf32, #tpu.memory_space<vmem>>, %arg14: memref<2x32x128xf32, #tpu.memory_space<vmem>>, %arg15: memref<2x1x128xf32, #tpu.memory_space<vmem>>, %arg16: memref<2x128x32xf32, #tpu.memory_space<vmem>>, %arg17: memref<2x1x32xf32, #tpu.memory_space<vmem>>, %arg18: memref<32x96xf32, #tpu.memory_space<vmem>>, %arg19: memref<1x96xf32, #tpu.memory_space<vmem>>, %arg20: memref<32x32xf32, #tpu.memory_space<vmem>>, %arg21: memref<1x32xf32, #tpu.memory_space<vmem>>, %arg22: memref<32x40xf32, #tpu.memory_space<vmem>>, %arg23: memref<1x40xf32, #tpu.memory_space<vmem>>, %arg24: memref<40x24xf32, #tpu.memory_space<vmem>>, %arg25: memref<1x24xf32, #tpu.memory_space<vmem>>, %arg26: memref<1x1x24xf32, #tpu.memory_space<vmem>>) attributes {dimension_semantics = [#tpu.dimension_semantics<parallel>], iteration_bounds = array<i64: 2>, scalar_prefetch = 0 : i64, scratch_operands = 0 : i64, tpu.core_type = #tpu.core_type<tc>, window_params = [{transform_indices = @transform_0, window_bounds = array<i64: 1, 16, 9>}, {pipeline_mode = #tpu.pipeline_mode<synchronous>, transform_indices = @transform_1, window_bounds = array<i64: 1, 16, 32>}, {pipeline_mode = #tpu.pipeline_mode<synchronous>, transform_indices = @transform_2, window_bounds = array<i64: 1, 16>}, {pipeline_mode = #tpu.pipeline_mode<synchronous>, transform_indices = @transform_3, window_bounds = array<i64: 9, 32>}, {pipeline_mode = #tpu.pipeline_mode<synchronous>, transform_indices = @transform_4, window_bounds = array<i64: 1, 32>}, {pipeline_mode = #tpu.pipeline_mode<synchronous>, transform_indices = @transform_5, window_bounds = array<i64: 2, 1, 32>}, {pipeline_mode = #tpu.pipeline_mode<synchronous>, transform_indices = @transform_6, window_bounds = array<i64: 2, 1, 32>}, {pipeline_mode = #tpu.pipeline_mode<synchronous>, transform_indices = @transform_7, window_bounds = array<i64: 2, 32, 96>}, {pipeline_mode = #tpu.pipeline_mode<synchronous>, transform_indices = @transform_8, window_bounds = array<i64: 2, 1, 96>}, {pipeline_mode = #tpu.pipeline_mode<synchronous>, transform_indices = @transform_9, window_bounds = array<i64: 2, 32, 32>}, {pipeline_mode = #tpu.pipeline_mode<synchronous>, transform_indices = @transform_10, window_bounds = array<i64: 2, 1, 32>}, {pipeline_mode = #tpu.pipeline_mode<synchronous>, transform_indices = @transform_11, window_bounds = array<i64: 2, 1, 32>}, {pipeline_mode = #tpu.pipeline_mode<synchronous>, transform_indices = @transform_12, window_bounds = array<i64: 2, 1, 32>}, {pipeline_mode = #tpu.pipeline_mode<synchronous>, transform_indices = @transform_13, window_bounds = array<i64: 2, 32, 128>}, {pipeline_mode = #tpu.pipeline_mode<synchronous>, transform_indices = @transform_14, window_bounds = array<i64: 2, 1, 128>}, {pipeline_mode = #tpu.pipeline_mode<synchronous>, transform_indices = @transform_15, window_bounds = array<i64: 2, 128, 32>}, {pipeline_mode = #tpu.pipeline_mode<synchronous>, transform_indices = @transform_16, window_bounds = array<i64: 2, 1, 32>}, {pipeline_mode = #tpu.pipeline_mode<synchronous>, transform_indices = @transform_17, window_bounds = array<i64: 32, 96>}, {pipeline_mode = #tpu.pipeline_mode<synchronous>, transform_indices = @transform_18, window_bounds = array<i64: 1, 96>}, {pipeline_mode = #tpu.pipeline_mode<synchronous>, transform_indices = @transform_19, window_bounds = array<i64: 32, 32>}, {pipeline_mode = #tpu.pipeline_mode<synchronous>, transform_indices = @transform_20, window_bounds = array<i64: 1, 32>}, {pipeline_mode = #tpu.pipeline_mode<synchronous>, transform_indices = @transform_21, window_bounds = array<i64: 32, 40>}, {pipeline_mode = #tpu.pipeline_mode<synchronous>, transform_indices = @transform_22, window_bounds = array<i64: 1, 40>}, {pipeline_mode = #tpu.pipeline_mode<synchronous>, transform_indices = @transform_23, window_bounds = array<i64: 40, 24>}, {pipeline_mode = #tpu.pipeline_mode<synchronous>, transform_indices = @transform_24, window_bounds = array<i64: 1, 24>}, {transform_indices = @transform_25, window_bounds = array<i64: 1, 1, 24>}]} {
    %c0 = arith.constant 0 : index
    %c0_0 = arith.constant 0 : index
    %c0_1 = arith.constant 0 : index
    %0 = vector.load %arg1[%c0, %c0_0, %c0_1] : memref<1x16x9xf32, #tpu.memory_space<vmem>>, vector<1x16x9xf32>
    %1 = vector.shape_cast %0 : vector<1x16x9xf32> to vector<16x9xf32>
    %c0_2 = arith.constant 0 : index
    %c0_3 = arith.constant 0 : index
    %2 = vector.load %arg4[%c0_2, %c0_3] : memref<9x32xf32, #tpu.memory_space<vmem>>, vector<9x32xf32>
    %cst = arith.constant dense<0.000000e+00> : vector<16x32xf32>
    %3 = tpu.matmul %1, %2, %cst {dimension_numbers = #tpu.dot_dimension_numbers<[1], [0], [0], [1], [0, 0, 1, 1], [], []>} : vector<16x9xf32>, vector<9x32xf32>, vector<16x32xf32> -> vector<16x32xf32>
    %c0_4 = arith.constant 0 : index
    %c0_5 = arith.constant 0 : index
    %4 = vector.load %arg5[%c0_4, %c0_5] : memref<1x32xf32, #tpu.memory_space<vmem>>, vector<1x32xf32>
    %5 = vector.broadcast %4 : vector<1x32xf32> to vector<16x32xf32>
    %6 = arith.addf %3, %5 : vector<16x32xf32>
    %c0_6 = arith.constant 0 : index
    %c0_7 = arith.constant 0 : index
    %c0_8 = arith.constant 0 : index
    %7 = vector.load %arg2[%c0_6, %c0_7, %c0_8] : memref<1x16x32xf32, #tpu.memory_space<vmem>>, vector<1x16x32xf32>
    %8 = vector.shape_cast %7 : vector<1x16x32xf32> to vector<16x32xf32>
    %9 = arith.addf %6, %8 : vector<16x32xf32>
    %c0_9 = arith.constant 0 : index
    %c0_10 = arith.constant 0 : index
    %c0_11 = arith.constant 0 : index
    %10 = vector.load %arg6[%c0_9, %c0_10, %c0_11] : memref<2x1x32xf32, #tpu.memory_space<vmem>>, vector<1x1x32xf32>
    %11 = vector.shape_cast %10 : vector<1x1x32xf32> to vector<1x32xf32>
    %c0_12 = arith.constant 0 : index
    %c0_13 = arith.constant 0 : index
    %c0_14 = arith.constant 0 : index
    %12 = vector.load %arg7[%c0_12, %c0_13, %c0_14] : memref<2x1x32xf32, #tpu.memory_space<vmem>>, vector<1x1x32xf32>
    %13 = vector.shape_cast %12 : vector<1x1x32xf32> to vector<1x32xf32>
    %cst_15 = arith.constant dense<0.000000e+00> : vector<16xf32>
    %14 = vector.multi_reduction <add>, %9, %cst_15 [1] : vector<16x32xf32> to vector<16xf32>
    %15 = vector.shape_cast %14 : vector<16xf32> to vector<16x1xf32>
    %cst_16 = arith.constant 3.200000e+01 : f32
    %16 = vector.broadcast %cst_16 : f32 to vector<16x1xf32>
    %17 = arith.divf %15, %16 : vector<16x1xf32>
    %18 = vector.broadcast %17 : vector<16x1xf32> to vector<16x32xf32>
    %19 = arith.subf %9, %18 : vector<16x32xf32>
    %20 = arith.mulf %19, %19 : vector<16x32xf32>
    %cst_17 = arith.constant dense<0.000000e+00> : vector<16xf32>
    %21 = vector.multi_reduction <add>, %20, %cst_17 [1] : vector<16x32xf32> to vector<16xf32>
    %22 = vector.shape_cast %21 : vector<16xf32> to vector<16x1xf32>
    %cst_18 = arith.constant 3.200000e+01 : f32
    %23 = vector.broadcast %cst_18 : f32 to vector<16x1xf32>
    %24 = arith.divf %22, %23 : vector<16x1xf32>
    %25 = vector.broadcast %17 : vector<16x1xf32> to vector<16x32xf32>
    %26 = arith.subf %9, %25 : vector<16x32xf32>
    %cst_19 = arith.constant 9.99999974E-6 : f32
    %27 = vector.broadcast %cst_19 : f32 to vector<16x1xf32>
    %28 = arith.addf %24, %27 : vector<16x1xf32>
    %29 = math.rsqrt %28 : vector<16x1xf32>
    %30 = vector.broadcast %29 : vector<16x1xf32> to vector<16x32xf32>
    %31 = arith.mulf %26, %30 : vector<16x32xf32>
    %32 = vector.broadcast %11 : vector<1x32xf32> to vector<16x32xf32>
    %33 = arith.mulf %31, %32 : vector<16x32xf32>
    %34 = vector.broadcast %13 : vector<1x32xf32> to vector<16x32xf32>
    %35 = arith.addf %33, %34 : vector<16x32xf32>
    %c0_20 = arith.constant 0 : index
    %c0_21 = arith.constant 0 : index
    %c0_22 = arith.constant 0 : index
    %36 = vector.load %arg8[%c0_20, %c0_21, %c0_22] : memref<2x32x96xf32, #tpu.memory_space<vmem>>, vector<1x32x96xf32>
    %37 = vector.shape_cast %36 : vector<1x32x96xf32> to vector<32x96xf32>
    %c0_23 = arith.constant 0 : index
    %c0_24 = arith.constant 0 : index
    %c0_25 = arith.constant 0 : index
    %38 = vector.load %arg9[%c0_23, %c0_24, %c0_25] : memref<2x1x96xf32, #tpu.memory_space<vmem>>, vector<1x1x96xf32>
    %39 = vector.shape_cast %38 : vector<1x1x96xf32> to vector<1x96xf32>
    %c0_26 = arith.constant 0 : index
    %c0_27 = arith.constant 0 : index
    %c0_28 = arith.constant 0 : index
    %40 = vector.load %arg10[%c0_26, %c0_27, %c0_28] : memref<2x32x32xf32, #tpu.memory_space<vmem>>, vector<1x32x32xf32>
    %41 = vector.shape_cast %40 : vector<1x32x32xf32> to vector<32x32xf32>
    %c0_29 = arith.constant 0 : index
    %c0_30 = arith.constant 0 : index
    %c0_31 = arith.constant 0 : index
    %42 = vector.load %arg11[%c0_29, %c0_30, %c0_31] : memref<2x1x32xf32, #tpu.memory_space<vmem>>, vector<1x1x32xf32>
    %43 = vector.shape_cast %42 : vector<1x1x32xf32> to vector<1x32xf32>
    %cst_32 = arith.constant dense<0.000000e+00> : vector<16x96xf32>
    %44 = tpu.matmul %35, %37, %cst_32 {dimension_numbers = #tpu.dot_dimension_numbers<[1], [0], [0], [1], [0, 0, 1, 1], [], []>} : vector<16x32xf32>, vector<32x96xf32>, vector<16x96xf32> -> vector<16x96xf32>
    %45 = vector.broadcast %39 : vector<1x96xf32> to vector<16x96xf32>
    %46 = arith.addf %44, %45 : vector<16x96xf32>
    %47 = vector.extract_strided_slice %46 {offsets = [0, 0], sizes = [16, 8], strides = [1, 1]} : vector<16x96xf32> to vector<16x8xf32>
    %48 = vector.extract_strided_slice %46 {offsets = [0, 8], sizes = [16, 8], strides = [1, 1]} : vector<16x96xf32> to vector<16x8xf32>
    %49 = vector.extract_strided_slice %46 {offsets = [0, 16], sizes = [16, 8], strides = [1, 1]} : vector<16x96xf32> to vector<16x8xf32>
    %50 = vector.extract_strided_slice %46 {offsets = [0, 24], sizes = [16, 8], strides = [1, 1]} : vector<16x96xf32> to vector<16x8xf32>
    %51 = vector.shape_cast %47 : vector<16x8xf32> to vector<1x16x8xf32>
    %52 = vector.shape_cast %48 : vector<16x8xf32> to vector<1x16x8xf32>
    %53 = vector.shape_cast %49 : vector<16x8xf32> to vector<1x16x8xf32>
    %54 = vector.shape_cast %50 : vector<16x8xf32> to vector<1x16x8xf32>
    %55 = tpu.concatenate %51, %52, %53, %54 in 0 : vector<1x16x8xf32>, vector<1x16x8xf32>, vector<1x16x8xf32>, vector<1x16x8xf32> -> vector<4x16x8xf32>
    %56 = vector.extract_strided_slice %46 {offsets = [0, 32], sizes = [16, 8], strides = [1, 1]} : vector<16x96xf32> to vector<16x8xf32>
    %57 = vector.extract_strided_slice %46 {offsets = [0, 40], sizes = [16, 8], strides = [1, 1]} : vector<16x96xf32> to vector<16x8xf32>
    %58 = vector.extract_strided_slice %46 {offsets = [0, 48], sizes = [16, 8], strides = [1, 1]} : vector<16x96xf32> to vector<16x8xf32>
    %59 = vector.extract_strided_slice %46 {offsets = [0, 56], sizes = [16, 8], strides = [1, 1]} : vector<16x96xf32> to vector<16x8xf32>
    %60 = vector.shape_cast %56 : vector<16x8xf32> to vector<1x16x8xf32>
    %61 = vector.shape_cast %57 : vector<16x8xf32> to vector<1x16x8xf32>
    %62 = vector.shape_cast %58 : vector<16x8xf32> to vector<1x16x8xf32>
    %63 = vector.shape_cast %59 : vector<16x8xf32> to vector<1x16x8xf32>
    %64 = tpu.concatenate %60, %61, %62, %63 in 0 : vector<1x16x8xf32>, vector<1x16x8xf32>, vector<1x16x8xf32>, vector<1x16x8xf32> -> vector<4x16x8xf32>
    %65 = vector.extract_strided_slice %46 {offsets = [0, 64], sizes = [16, 8], strides = [1, 1]} : vector<16x96xf32> to vector<16x8xf32>
    %66 = vector.extract_strided_slice %46 {offsets = [0, 72], sizes = [16, 8], strides = [1, 1]} : vector<16x96xf32> to vector<16x8xf32>
    %67 = vector.extract_strided_slice %46 {offsets = [0, 80], sizes = [16, 8], strides = [1, 1]} : vector<16x96xf32> to vector<16x8xf32>
    %68 = vector.extract_strided_slice %46 {offsets = [0, 88], sizes = [16, 8], strides = [1, 1]} : vector<16x96xf32> to vector<16x8xf32>
    %69 = vector.shape_cast %65 : vector<16x8xf32> to vector<1x16x8xf32>
    %70 = vector.shape_cast %66 : vector<16x8xf32> to vector<1x16x8xf32>
    %71 = vector.shape_cast %67 : vector<16x8xf32> to vector<1x16x8xf32>
    %72 = vector.shape_cast %68 : vector<16x8xf32> to vector<1x16x8xf32>
    %73 = tpu.concatenate %69, %70, %71, %72 in 0 : vector<1x16x8xf32>, vector<1x16x8xf32>, vector<1x16x8xf32>, vector<1x16x8xf32> -> vector<4x16x8xf32>
    "tpu.trace_start"() <{level = 10 : i32, message = "hqd,hkd->hqk"}> : () -> ()
    %cst_33 = arith.constant dense<0.000000e+00> : vector<4x16x16xf32>
    %74 = tpu.matmul %55, %64, %cst_33 {dimension_numbers = #tpu.dot_dimension_numbers<[2], [2], [1], [1], [0, 0, 0, 1, 1, 1], [0], [0]>} : vector<4x16x8xf32>, vector<4x16x8xf32>, vector<4x16x16xf32> -> vector<4x16x16xf32>
    "tpu.trace_stop"() : () -> ()
    %cst_34 = arith.constant 0.353553385 : f32
    %75 = vector.broadcast %cst_34 : f32 to vector<4x16x16xf32>
    %76 = arith.mulf %74, %75 : vector<4x16x16xf32>
    %cst_35 = arith.constant dense<0xFF800000> : vector<4x16xf32>
    %77 = vector.multi_reduction <maximumf>, %76, %cst_35 [2] : vector<4x16x16xf32> to vector<4x16xf32>
    %78 = vector.shape_cast %77 : vector<4x16xf32> to vector<4x16x1xf32>
    %79 = vector.broadcast %78 : vector<4x16x1xf32> to vector<4x16x16xf32>
    %80 = arith.subf %76, %79 : vector<4x16x16xf32>
    %81 = math.exp %80 : vector<4x16x16xf32>
    %cst_36 = arith.constant dense<0.000000e+00> : vector<4x16xf32>
    %82 = vector.multi_reduction <add>, %81, %cst_36 [2] : vector<4x16x16xf32> to vector<4x16xf32>
    %83 = vector.shape_cast %82 : vector<4x16xf32> to vector<4x16x1xf32>
    %84 = vector.broadcast %83 : vector<4x16x1xf32> to vector<4x16x16xf32>
    %85 = arith.divf %81, %84 : vector<4x16x16xf32>
    "tpu.trace_start"() <{level = 10 : i32, message = "hqk,hkd->hqd"}> : () -> ()
    %cst_37 = arith.constant dense<0.000000e+00> : vector<4x16x8xf32>
    %86 = tpu.matmul %85, %73, %cst_37 {dimension_numbers = #tpu.dot_dimension_numbers<[2], [1], [1], [2], [0, 0, 0, 1, 1, 2], [0], [0]>} : vector<4x16x16xf32>, vector<4x16x8xf32>, vector<4x16x8xf32> -> vector<4x16x8xf32>
    "tpu.trace_stop"() : () -> ()
    %87 = vector.extract_strided_slice %86 {offsets = [0, 0, 0], sizes = [1, 16, 8], strides = [1, 1, 1]} : vector<4x16x8xf32> to vector<1x16x8xf32>
    %88 = vector.shape_cast %87 : vector<1x16x8xf32> to vector<16x8xf32>
    %89 = vector.extract_strided_slice %86 {offsets = [1, 0, 0], sizes = [1, 16, 8], strides = [1, 1, 1]} : vector<4x16x8xf32> to vector<1x16x8xf32>
    %90 = vector.shape_cast %89 : vector<1x16x8xf32> to vector<16x8xf32>
    %91 = vector.extract_strided_slice %86 {offsets = [2, 0, 0], sizes = [1, 16, 8], strides = [1, 1, 1]} : vector<4x16x8xf32> to vector<1x16x8xf32>
    %92 = vector.shape_cast %91 : vector<1x16x8xf32> to vector<16x8xf32>
    %93 = vector.extract_strided_slice %86 {offsets = [3, 0, 0], sizes = [1, 16, 8], strides = [1, 1, 1]} : vector<4x16x8xf32> to vector<1x16x8xf32>
    %94 = vector.shape_cast %93 : vector<1x16x8xf32> to vector<16x8xf32>
    %95 = tpu.concatenate %88, %90, %92, %94 in 1 : vector<16x8xf32>, vector<16x8xf32>, vector<16x8xf32>, vector<16x8xf32> -> vector<16x32xf32>
    %cst_38 = arith.constant dense<0.000000e+00> : vector<16x32xf32>
    %96 = tpu.matmul %95, %41, %cst_38 {dimension_numbers = #tpu.dot_dimension_numbers<[1], [0], [0], [1], [0, 0, 1, 1], [], []>} : vector<16x32xf32>, vector<32x32xf32>, vector<16x32xf32> -> vector<16x32xf32>
    %97 = vector.broadcast %43 : vector<1x32xf32> to vector<16x32xf32>
    %98 = arith.addf %96, %97 : vector<16x32xf32>
    %99 = arith.addf %9, %98 : vector<16x32xf32>
    %c0_39 = arith.constant 0 : index
    %c0_40 = arith.constant 0 : index
    %c0_41 = arith.constant 0 : index
    %100 = vector.load %arg12[%c0_39, %c0_40, %c0_41] : memref<2x1x32xf32, #tpu.memory_space<vmem>>, vector<1x1x32xf32>
    %101 = vector.shape_cast %100 : vector<1x1x32xf32> to vector<1x32xf32>
    %c0_42 = arith.constant 0 : index
    %c0_43 = arith.constant 0 : index
    %c0_44 = arith.constant 0 : index
    %102 = vector.load %arg13[%c0_42, %c0_43, %c0_44] : memref<2x1x32xf32, #tpu.memory_space<vmem>>, vector<1x1x32xf32>
    %103 = vector.shape_cast %102 : vector<1x1x32xf32> to vector<1x32xf32>
    %cst_45 = arith.constant dense<0.000000e+00> : vector<16xf32>
    %104 = vector.multi_reduction <add>, %99, %cst_45 [1] : vector<16x32xf32> to vector<16xf32>
    %105 = vector.shape_cast %104 : vector<16xf32> to vector<16x1xf32>
    %cst_46 = arith.constant 3.200000e+01 : f32
    %106 = vector.broadcast %cst_46 : f32 to vector<16x1xf32>
    %107 = arith.divf %105, %106 : vector<16x1xf32>
    %108 = vector.broadcast %107 : vector<16x1xf32> to vector<16x32xf32>
    %109 = arith.subf %99, %108 : vector<16x32xf32>
    %110 = arith.mulf %109, %109 : vector<16x32xf32>
    %cst_47 = arith.constant dense<0.000000e+00> : vector<16xf32>
    %111 = vector.multi_reduction <add>, %110, %cst_47 [1] : vector<16x32xf32> to vector<16xf32>
    %112 = vector.shape_cast %111 : vector<16xf32> to vector<16x1xf32>
    %cst_48 = arith.constant 3.200000e+01 : f32
    %113 = vector.broadcast %cst_48 : f32 to vector<16x1xf32>
    %114 = arith.divf %112, %113 : vector<16x1xf32>
    %115 = vector.broadcast %107 : vector<16x1xf32> to vector<16x32xf32>
    %116 = arith.subf %99, %115 : vector<16x32xf32>
    %cst_49 = arith.constant 9.99999974E-6 : f32
    %117 = vector.broadcast %cst_49 : f32 to vector<16x1xf32>
    %118 = arith.addf %114, %117 : vector<16x1xf32>
    %119 = math.rsqrt %118 : vector<16x1xf32>
    %120 = vector.broadcast %119 : vector<16x1xf32> to vector<16x32xf32>
    %121 = arith.mulf %116, %120 : vector<16x32xf32>
    %122 = vector.broadcast %101 : vector<1x32xf32> to vector<16x32xf32>
    %123 = arith.mulf %121, %122 : vector<16x32xf32>
    %124 = vector.broadcast %103 : vector<1x32xf32> to vector<16x32xf32>
    %125 = arith.addf %123, %124 : vector<16x32xf32>
    %c0_50 = arith.constant 0 : index
    %c0_51 = arith.constant 0 : index
    %c0_52 = arith.constant 0 : index
    %126 = vector.load %arg14[%c0_50, %c0_51, %c0_52] : memref<2x32x128xf32, #tpu.memory_space<vmem>>, vector<1x32x128xf32>
    %127 = vector.shape_cast %126 : vector<1x32x128xf32> to vector<32x128xf32>
    %cst_53 = arith.constant dense<0.000000e+00> : vector<16x128xf32>
    %128 = tpu.matmul %125, %127, %cst_53 {dimension_numbers = #tpu.dot_dimension_numbers<[1], [0], [0], [1], [0, 0, 1, 1], [], []>} : vector<16x32xf32>, vector<32x128xf32>, vector<16x128xf32> -> vector<16x128xf32>
    %c0_54 = arith.constant 0 : index
    %c0_55 = arith.constant 0 : index
    %c0_56 = arith.constant 0 : index
    %129 = vector.load %arg15[%c0_54, %c0_55, %c0_56] : memref<2x1x128xf32, #tpu.memory_space<vmem>>, vector<1x1x128xf32>
    %130 = vector.shape_cast %129 : vector<1x1x128xf32> to vector<1x128xf32>
    %131 = vector.broadcast %130 : vector<1x128xf32> to vector<16x128xf32>
    %132 = arith.addf %128, %131 : vector<16x128xf32>
    %cst_57 = arith.constant 5.000000e-01 : f32
    %133 = vector.broadcast %cst_57 : f32 to vector<16x128xf32>
    %134 = arith.mulf %133, %132 : vector<16x128xf32>
    %cst_58 = arith.constant 0.707106769 : f32
    %135 = vector.broadcast %cst_58 : f32 to vector<16x128xf32>
    %136 = arith.mulf %132, %135 : vector<16x128xf32>
    %137 = math.erf %136 : vector<16x128xf32>
    %cst_59 = arith.constant 1.000000e+00 : f32
    %138 = vector.broadcast %cst_59 : f32 to vector<16x128xf32>
    %139 = arith.addf %138, %137 : vector<16x128xf32>
    %140 = arith.mulf %134, %139 : vector<16x128xf32>
    %c0_60 = arith.constant 0 : index
    %c0_61 = arith.constant 0 : index
    %c0_62 = arith.constant 0 : index
    %141 = vector.load %arg16[%c0_60, %c0_61, %c0_62] : memref<2x128x32xf32, #tpu.memory_space<vmem>>, vector<1x128x32xf32>
    %142 = vector.shape_cast %141 : vector<1x128x32xf32> to vector<128x32xf32>
    %cst_63 = arith.constant dense<0.000000e+00> : vector<16x32xf32>
    %143 = tpu.matmul %140, %142, %cst_63 {dimension_numbers = #tpu.dot_dimension_numbers<[1], [0], [0], [1], [0, 0, 1, 1], [], []>} : vector<16x128xf32>, vector<128x32xf32>, vector<16x32xf32> -> vector<16x32xf32>
    %c0_64 = arith.constant 0 : index
    %c0_65 = arith.constant 0 : index
    %c0_66 = arith.constant 0 : index
    %144 = vector.load %arg17[%c0_64, %c0_65, %c0_66] : memref<2x1x32xf32, #tpu.memory_space<vmem>>, vector<1x1x32xf32>
    %145 = vector.shape_cast %144 : vector<1x1x32xf32> to vector<1x32xf32>
    %146 = vector.broadcast %145 : vector<1x32xf32> to vector<16x32xf32>
    %147 = arith.addf %143, %146 : vector<16x32xf32>
    %148 = arith.addf %99, %147 : vector<16x32xf32>
    %c1 = arith.constant 1 : index
    %c0_67 = arith.constant 0 : index
    %c0_68 = arith.constant 0 : index
    %149 = vector.load %arg6[%c1, %c0_67, %c0_68] : memref<2x1x32xf32, #tpu.memory_space<vmem>>, vector<1x1x32xf32>
    %150 = vector.shape_cast %149 : vector<1x1x32xf32> to vector<1x32xf32>
    %c1_69 = arith.constant 1 : index
    %c0_70 = arith.constant 0 : index
    %c0_71 = arith.constant 0 : index
    %151 = vector.load %arg7[%c1_69, %c0_70, %c0_71] : memref<2x1x32xf32, #tpu.memory_space<vmem>>, vector<1x1x32xf32>
    %152 = vector.shape_cast %151 : vector<1x1x32xf32> to vector<1x32xf32>
    %cst_72 = arith.constant dense<0.000000e+00> : vector<16xf32>
    %153 = vector.multi_reduction <add>, %148, %cst_72 [1] : vector<16x32xf32> to vector<16xf32>
    %154 = vector.shape_cast %153 : vector<16xf32> to vector<16x1xf32>
    %cst_73 = arith.constant 3.200000e+01 : f32
    %155 = vector.broadcast %cst_73 : f32 to vector<16x1xf32>
    %156 = arith.divf %154, %155 : vector<16x1xf32>
    %157 = vector.broadcast %156 : vector<16x1xf32> to vector<16x32xf32>
    %158 = arith.subf %148, %157 : vector<16x32xf32>
    %159 = arith.mulf %158, %158 : vector<16x32xf32>
    %cst_74 = arith.constant dense<0.000000e+00> : vector<16xf32>
    %160 = vector.multi_reduction <add>, %159, %cst_74 [1] : vector<16x32xf32> to vector<16xf32>
    %161 = vector.shape_cast %160 : vector<16xf32> to vector<16x1xf32>
    %cst_75 = arith.constant 3.200000e+01 : f32
    %162 = vector.broadcast %cst_75 : f32 to vector<16x1xf32>
    %163 = arith.divf %161, %162 : vector<16x1xf32>
    %164 = vector.broadcast %156 : vector<16x1xf32> to vector<16x32xf32>
    %165 = arith.subf %148, %164 : vector<16x32xf32>
    %cst_76 = arith.constant 9.99999974E-6 : f32
    %166 = vector.broadcast %cst_76 : f32 to vector<16x1xf32>
    %167 = arith.addf %163, %166 : vector<16x1xf32>
    %168 = math.rsqrt %167 : vector<16x1xf32>
    %169 = vector.broadcast %168 : vector<16x1xf32> to vector<16x32xf32>
    %170 = arith.mulf %165, %169 : vector<16x32xf32>
    %171 = vector.broadcast %150 : vector<1x32xf32> to vector<16x32xf32>
    %172 = arith.mulf %170, %171 : vector<16x32xf32>
    %173 = vector.broadcast %152 : vector<1x32xf32> to vector<16x32xf32>
    %174 = arith.addf %172, %173 : vector<16x32xf32>
    %c1_77 = arith.constant 1 : index
    %c0_78 = arith.constant 0 : index
    %c0_79 = arith.constant 0 : index
    %175 = vector.load %arg8[%c1_77, %c0_78, %c0_79] : memref<2x32x96xf32, #tpu.memory_space<vmem>>, vector<1x32x96xf32>
    %176 = vector.shape_cast %175 : vector<1x32x96xf32> to vector<32x96xf32>
    %c1_80 = arith.constant 1 : index
    %c0_81 = arith.constant 0 : index
    %c0_82 = arith.constant 0 : index
    %177 = vector.load %arg9[%c1_80, %c0_81, %c0_82] : memref<2x1x96xf32, #tpu.memory_space<vmem>>, vector<1x1x96xf32>
    %178 = vector.shape_cast %177 : vector<1x1x96xf32> to vector<1x96xf32>
    %c1_83 = arith.constant 1 : index
    %c0_84 = arith.constant 0 : index
    %c0_85 = arith.constant 0 : index
    %179 = vector.load %arg10[%c1_83, %c0_84, %c0_85] : memref<2x32x32xf32, #tpu.memory_space<vmem>>, vector<1x32x32xf32>
    %180 = vector.shape_cast %179 : vector<1x32x32xf32> to vector<32x32xf32>
    %c1_86 = arith.constant 1 : index
    %c0_87 = arith.constant 0 : index
    %c0_88 = arith.constant 0 : index
    %181 = vector.load %arg11[%c1_86, %c0_87, %c0_88] : memref<2x1x32xf32, #tpu.memory_space<vmem>>, vector<1x1x32xf32>
    %182 = vector.shape_cast %181 : vector<1x1x32xf32> to vector<1x32xf32>
    %cst_89 = arith.constant dense<0.000000e+00> : vector<16x96xf32>
    %183 = tpu.matmul %174, %176, %cst_89 {dimension_numbers = #tpu.dot_dimension_numbers<[1], [0], [0], [1], [0, 0, 1, 1], [], []>} : vector<16x32xf32>, vector<32x96xf32>, vector<16x96xf32> -> vector<16x96xf32>
    %184 = vector.broadcast %178 : vector<1x96xf32> to vector<16x96xf32>
    %185 = arith.addf %183, %184 : vector<16x96xf32>
    %186 = vector.extract_strided_slice %185 {offsets = [0, 0], sizes = [16, 8], strides = [1, 1]} : vector<16x96xf32> to vector<16x8xf32>
    %187 = vector.extract_strided_slice %185 {offsets = [0, 8], sizes = [16, 8], strides = [1, 1]} : vector<16x96xf32> to vector<16x8xf32>
    %188 = vector.extract_strided_slice %185 {offsets = [0, 16], sizes = [16, 8], strides = [1, 1]} : vector<16x96xf32> to vector<16x8xf32>
    %189 = vector.extract_strided_slice %185 {offsets = [0, 24], sizes = [16, 8], strides = [1, 1]} : vector<16x96xf32> to vector<16x8xf32>
    %190 = vector.shape_cast %186 : vector<16x8xf32> to vector<1x16x8xf32>
    %191 = vector.shape_cast %187 : vector<16x8xf32> to vector<1x16x8xf32>
    %192 = vector.shape_cast %188 : vector<16x8xf32> to vector<1x16x8xf32>
    %193 = vector.shape_cast %189 : vector<16x8xf32> to vector<1x16x8xf32>
    %194 = tpu.concatenate %190, %191, %192, %193 in 0 : vector<1x16x8xf32>, vector<1x16x8xf32>, vector<1x16x8xf32>, vector<1x16x8xf32> -> vector<4x16x8xf32>
    %195 = vector.extract_strided_slice %185 {offsets = [0, 32], sizes = [16, 8], strides = [1, 1]} : vector<16x96xf32> to vector<16x8xf32>
    %196 = vector.extract_strided_slice %185 {offsets = [0, 40], sizes = [16, 8], strides = [1, 1]} : vector<16x96xf32> to vector<16x8xf32>
    %197 = vector.extract_strided_slice %185 {offsets = [0, 48], sizes = [16, 8], strides = [1, 1]} : vector<16x96xf32> to vector<16x8xf32>
    %198 = vector.extract_strided_slice %185 {offsets = [0, 56], sizes = [16, 8], strides = [1, 1]} : vector<16x96xf32> to vector<16x8xf32>
    %199 = vector.shape_cast %195 : vector<16x8xf32> to vector<1x16x8xf32>
    %200 = vector.shape_cast %196 : vector<16x8xf32> to vector<1x16x8xf32>
    %201 = vector.shape_cast %197 : vector<16x8xf32> to vector<1x16x8xf32>
    %202 = vector.shape_cast %198 : vector<16x8xf32> to vector<1x16x8xf32>
    %203 = tpu.concatenate %199, %200, %201, %202 in 0 : vector<1x16x8xf32>, vector<1x16x8xf32>, vector<1x16x8xf32>, vector<1x16x8xf32> -> vector<4x16x8xf32>
    %204 = vector.extract_strided_slice %185 {offsets = [0, 64], sizes = [16, 8], strides = [1, 1]} : vector<16x96xf32> to vector<16x8xf32>
    %205 = vector.extract_strided_slice %185 {offsets = [0, 72], sizes = [16, 8], strides = [1, 1]} : vector<16x96xf32> to vector<16x8xf32>
    %206 = vector.extract_strided_slice %185 {offsets = [0, 80], sizes = [16, 8], strides = [1, 1]} : vector<16x96xf32> to vector<16x8xf32>
    %207 = vector.extract_strided_slice %185 {offsets = [0, 88], sizes = [16, 8], strides = [1, 1]} : vector<16x96xf32> to vector<16x8xf32>
    %208 = vector.shape_cast %204 : vector<16x8xf32> to vector<1x16x8xf32>
    %209 = vector.shape_cast %205 : vector<16x8xf32> to vector<1x16x8xf32>
    %210 = vector.shape_cast %206 : vector<16x8xf32> to vector<1x16x8xf32>
    %211 = vector.shape_cast %207 : vector<16x8xf32> to vector<1x16x8xf32>
    %212 = tpu.concatenate %208, %209, %210, %211 in 0 : vector<1x16x8xf32>, vector<1x16x8xf32>, vector<1x16x8xf32>, vector<1x16x8xf32> -> vector<4x16x8xf32>
    "tpu.trace_start"() <{level = 10 : i32, message = "hqd,hkd->hqk"}> : () -> ()
    %cst_90 = arith.constant dense<0.000000e+00> : vector<4x16x16xf32>
    %213 = tpu.matmul %194, %203, %cst_90 {dimension_numbers = #tpu.dot_dimension_numbers<[2], [2], [1], [1], [0, 0, 0, 1, 1, 1], [0], [0]>} : vector<4x16x8xf32>, vector<4x16x8xf32>, vector<4x16x16xf32> -> vector<4x16x16xf32>
    "tpu.trace_stop"() : () -> ()
    %cst_91 = arith.constant 0.353553385 : f32
    %214 = vector.broadcast %cst_91 : f32 to vector<4x16x16xf32>
    %215 = arith.mulf %213, %214 : vector<4x16x16xf32>
    %cst_92 = arith.constant dense<0xFF800000> : vector<4x16xf32>
    %216 = vector.multi_reduction <maximumf>, %215, %cst_92 [2] : vector<4x16x16xf32> to vector<4x16xf32>
    %217 = vector.shape_cast %216 : vector<4x16xf32> to vector<4x16x1xf32>
    %218 = vector.broadcast %217 : vector<4x16x1xf32> to vector<4x16x16xf32>
    %219 = arith.subf %215, %218 : vector<4x16x16xf32>
    %220 = math.exp %219 : vector<4x16x16xf32>
    %cst_93 = arith.constant dense<0.000000e+00> : vector<4x16xf32>
    %221 = vector.multi_reduction <add>, %220, %cst_93 [2] : vector<4x16x16xf32> to vector<4x16xf32>
    %222 = vector.shape_cast %221 : vector<4x16xf32> to vector<4x16x1xf32>
    %223 = vector.broadcast %222 : vector<4x16x1xf32> to vector<4x16x16xf32>
    %224 = arith.divf %220, %223 : vector<4x16x16xf32>
    "tpu.trace_start"() <{level = 10 : i32, message = "hqk,hkd->hqd"}> : () -> ()
    %cst_94 = arith.constant dense<0.000000e+00> : vector<4x16x8xf32>
    %225 = tpu.matmul %224, %212, %cst_94 {dimension_numbers = #tpu.dot_dimension_numbers<[2], [1], [1], [2], [0, 0, 0, 1, 1, 2], [0], [0]>} : vector<4x16x16xf32>, vector<4x16x8xf32>, vector<4x16x8xf32> -> vector<4x16x8xf32>
    "tpu.trace_stop"() : () -> ()
    %226 = vector.extract_strided_slice %225 {offsets = [0, 0, 0], sizes = [1, 16, 8], strides = [1, 1, 1]} : vector<4x16x8xf32> to vector<1x16x8xf32>
    %227 = vector.shape_cast %226 : vector<1x16x8xf32> to vector<16x8xf32>
    %228 = vector.extract_strided_slice %225 {offsets = [1, 0, 0], sizes = [1, 16, 8], strides = [1, 1, 1]} : vector<4x16x8xf32> to vector<1x16x8xf32>
    %229 = vector.shape_cast %228 : vector<1x16x8xf32> to vector<16x8xf32>
    %230 = vector.extract_strided_slice %225 {offsets = [2, 0, 0], sizes = [1, 16, 8], strides = [1, 1, 1]} : vector<4x16x8xf32> to vector<1x16x8xf32>
    %231 = vector.shape_cast %230 : vector<1x16x8xf32> to vector<16x8xf32>
    %232 = vector.extract_strided_slice %225 {offsets = [3, 0, 0], sizes = [1, 16, 8], strides = [1, 1, 1]} : vector<4x16x8xf32> to vector<1x16x8xf32>
    %233 = vector.shape_cast %232 : vector<1x16x8xf32> to vector<16x8xf32>
    %234 = tpu.concatenate %227, %229, %231, %233 in 1 : vector<16x8xf32>, vector<16x8xf32>, vector<16x8xf32>, vector<16x8xf32> -> vector<16x32xf32>
    %cst_95 = arith.constant dense<0.000000e+00> : vector<16x32xf32>
    %235 = tpu.matmul %234, %180, %cst_95 {dimension_numbers = #tpu.dot_dimension_numbers<[1], [0], [0], [1], [0, 0, 1, 1], [], []>} : vector<16x32xf32>, vector<32x32xf32>, vector<16x32xf32> -> vector<16x32xf32>
    %236 = vector.broadcast %182 : vector<1x32xf32> to vector<16x32xf32>
    %237 = arith.addf %235, %236 : vector<16x32xf32>
    %238 = arith.addf %148, %237 : vector<16x32xf32>
    %c1_96 = arith.constant 1 : index
    %c0_97 = arith.constant 0 : index
    %c0_98 = arith.constant 0 : index
    %239 = vector.load %arg12[%c1_96, %c0_97, %c0_98] : memref<2x1x32xf32, #tpu.memory_space<vmem>>, vector<1x1x32xf32>
    %240 = vector.shape_cast %239 : vector<1x1x32xf32> to vector<1x32xf32>
    %c1_99 = arith.constant 1 : index
    %c0_100 = arith.constant 0 : index
    %c0_101 = arith.constant 0 : index
    %241 = vector.load %arg13[%c1_99, %c0_100, %c0_101] : memref<2x1x32xf32, #tpu.memory_space<vmem>>, vector<1x1x32xf32>
    %242 = vector.shape_cast %241 : vector<1x1x32xf32> to vector<1x32xf32>
    %cst_102 = arith.constant dense<0.000000e+00> : vector<16xf32>
    %243 = vector.multi_reduction <add>, %238, %cst_102 [1] : vector<16x32xf32> to vector<16xf32>
    %244 = vector.shape_cast %243 : vector<16xf32> to vector<16x1xf32>
    %cst_103 = arith.constant 3.200000e+01 : f32
    %245 = vector.broadcast %cst_103 : f32 to vector<16x1xf32>
    %246 = arith.divf %244, %245 : vector<16x1xf32>
    %247 = vector.broadcast %246 : vector<16x1xf32> to vector<16x32xf32>
    %248 = arith.subf %238, %247 : vector<16x32xf32>
    %249 = arith.mulf %248, %248 : vector<16x32xf32>
    %cst_104 = arith.constant dense<0.000000e+00> : vector<16xf32>
    %250 = vector.multi_reduction <add>, %249, %cst_104 [1] : vector<16x32xf32> to vector<16xf32>
    %251 = vector.shape_cast %250 : vector<16xf32> to vector<16x1xf32>
    %cst_105 = arith.constant 3.200000e+01 : f32
    %252 = vector.broadcast %cst_105 : f32 to vector<16x1xf32>
    %253 = arith.divf %251, %252 : vector<16x1xf32>
    %254 = vector.broadcast %246 : vector<16x1xf32> to vector<16x32xf32>
    %255 = arith.subf %238, %254 : vector<16x32xf32>
    %cst_106 = arith.constant 9.99999974E-6 : f32
    %256 = vector.broadcast %cst_106 : f32 to vector<16x1xf32>
    %257 = arith.addf %253, %256 : vector<16x1xf32>
    %258 = math.rsqrt %257 : vector<16x1xf32>
    %259 = vector.broadcast %258 : vector<16x1xf32> to vector<16x32xf32>
    %260 = arith.mulf %255, %259 : vector<16x32xf32>
    %261 = vector.broadcast %240 : vector<1x32xf32> to vector<16x32xf32>
    %262 = arith.mulf %260, %261 : vector<16x32xf32>
    %263 = vector.broadcast %242 : vector<1x32xf32> to vector<16x32xf32>
    %264 = arith.addf %262, %263 : vector<16x32xf32>
    %c1_107 = arith.constant 1 : index
    %c0_108 = arith.constant 0 : index
    %c0_109 = arith.constant 0 : index
    %265 = vector.load %arg14[%c1_107, %c0_108, %c0_109] : memref<2x32x128xf32, #tpu.memory_space<vmem>>, vector<1x32x128xf32>
    %266 = vector.shape_cast %265 : vector<1x32x128xf32> to vector<32x128xf32>
    %cst_110 = arith.constant dense<0.000000e+00> : vector<16x128xf32>
    %267 = tpu.matmul %264, %266, %cst_110 {dimension_numbers = #tpu.dot_dimension_numbers<[1], [0], [0], [1], [0, 0, 1, 1], [], []>} : vector<16x32xf32>, vector<32x128xf32>, vector<16x128xf32> -> vector<16x128xf32>
    %c1_111 = arith.constant 1 : index
    %c0_112 = arith.constant 0 : index
    %c0_113 = arith.constant 0 : index
    %268 = vector.load %arg15[%c1_111, %c0_112, %c0_113] : memref<2x1x128xf32, #tpu.memory_space<vmem>>, vector<1x1x128xf32>
    %269 = vector.shape_cast %268 : vector<1x1x128xf32> to vector<1x128xf32>
    %270 = vector.broadcast %269 : vector<1x128xf32> to vector<16x128xf32>
    %271 = arith.addf %267, %270 : vector<16x128xf32>
    %cst_114 = arith.constant 5.000000e-01 : f32
    %272 = vector.broadcast %cst_114 : f32 to vector<16x128xf32>
    %273 = arith.mulf %272, %271 : vector<16x128xf32>
    %cst_115 = arith.constant 0.707106769 : f32
    %274 = vector.broadcast %cst_115 : f32 to vector<16x128xf32>
    %275 = arith.mulf %271, %274 : vector<16x128xf32>
    %276 = math.erf %275 : vector<16x128xf32>
    %cst_116 = arith.constant 1.000000e+00 : f32
    %277 = vector.broadcast %cst_116 : f32 to vector<16x128xf32>
    %278 = arith.addf %277, %276 : vector<16x128xf32>
    %279 = arith.mulf %273, %278 : vector<16x128xf32>
    %c1_117 = arith.constant 1 : index
    %c0_118 = arith.constant 0 : index
    %c0_119 = arith.constant 0 : index
    %280 = vector.load %arg16[%c1_117, %c0_118, %c0_119] : memref<2x128x32xf32, #tpu.memory_space<vmem>>, vector<1x128x32xf32>
    %281 = vector.shape_cast %280 : vector<1x128x32xf32> to vector<128x32xf32>
    %cst_120 = arith.constant dense<0.000000e+00> : vector<16x32xf32>
    %282 = tpu.matmul %279, %281, %cst_120 {dimension_numbers = #tpu.dot_dimension_numbers<[1], [0], [0], [1], [0, 0, 1, 1], [], []>} : vector<16x128xf32>, vector<128x32xf32>, vector<16x32xf32> -> vector<16x32xf32>
    %c1_121 = arith.constant 1 : index
    %c0_122 = arith.constant 0 : index
    %c0_123 = arith.constant 0 : index
    %283 = vector.load %arg17[%c1_121, %c0_122, %c0_123] : memref<2x1x32xf32, #tpu.memory_space<vmem>>, vector<1x1x32xf32>
    %284 = vector.shape_cast %283 : vector<1x1x32xf32> to vector<1x32xf32>
    %285 = vector.broadcast %284 : vector<1x32xf32> to vector<16x32xf32>
    %286 = arith.addf %282, %285 : vector<16x32xf32>
    %287 = arith.addf %238, %286 : vector<16x32xf32>
    %c0_124 = arith.constant 0 : index
    %c0_125 = arith.constant 0 : index
    %288 = vector.load %arg18[%c0_124, %c0_125] : memref<32x96xf32, #tpu.memory_space<vmem>>, vector<32x96xf32>
    %c0_126 = arith.constant 0 : index
    %c0_127 = arith.constant 0 : index
    %289 = vector.load %arg19[%c0_126, %c0_127] : memref<1x96xf32, #tpu.memory_space<vmem>>, vector<1x96xf32>
    %c0_128 = arith.constant 0 : index
    %c0_129 = arith.constant 0 : index
    %290 = vector.load %arg20[%c0_128, %c0_129] : memref<32x32xf32, #tpu.memory_space<vmem>>, vector<32x32xf32>
    %c0_130 = arith.constant 0 : index
    %c0_131 = arith.constant 0 : index
    %291 = vector.load %arg21[%c0_130, %c0_131] : memref<1x32xf32, #tpu.memory_space<vmem>>, vector<1x32xf32>
    %cst_132 = arith.constant dense<0.000000e+00> : vector<16x96xf32>
    %292 = tpu.matmul %287, %288, %cst_132 {dimension_numbers = #tpu.dot_dimension_numbers<[1], [0], [0], [1], [0, 0, 1, 1], [], []>} : vector<16x32xf32>, vector<32x96xf32>, vector<16x96xf32> -> vector<16x96xf32>
    %293 = vector.broadcast %289 : vector<1x96xf32> to vector<16x96xf32>
    %294 = arith.addf %292, %293 : vector<16x96xf32>
    %295 = vector.extract_strided_slice %294 {offsets = [0, 0], sizes = [16, 8], strides = [1, 1]} : vector<16x96xf32> to vector<16x8xf32>
    %296 = vector.extract_strided_slice %294 {offsets = [0, 8], sizes = [16, 8], strides = [1, 1]} : vector<16x96xf32> to vector<16x8xf32>
    %297 = vector.extract_strided_slice %294 {offsets = [0, 16], sizes = [16, 8], strides = [1, 1]} : vector<16x96xf32> to vector<16x8xf32>
    %298 = vector.extract_strided_slice %294 {offsets = [0, 24], sizes = [16, 8], strides = [1, 1]} : vector<16x96xf32> to vector<16x8xf32>
    %299 = vector.shape_cast %295 : vector<16x8xf32> to vector<1x16x8xf32>
    %300 = vector.shape_cast %296 : vector<16x8xf32> to vector<1x16x8xf32>
    %301 = vector.shape_cast %297 : vector<16x8xf32> to vector<1x16x8xf32>
    %302 = vector.shape_cast %298 : vector<16x8xf32> to vector<1x16x8xf32>
    %303 = tpu.concatenate %299, %300, %301, %302 in 0 : vector<1x16x8xf32>, vector<1x16x8xf32>, vector<1x16x8xf32>, vector<1x16x8xf32> -> vector<4x16x8xf32>
    %304 = vector.extract_strided_slice %294 {offsets = [0, 32], sizes = [16, 8], strides = [1, 1]} : vector<16x96xf32> to vector<16x8xf32>
    %305 = vector.extract_strided_slice %294 {offsets = [0, 40], sizes = [16, 8], strides = [1, 1]} : vector<16x96xf32> to vector<16x8xf32>
    %306 = vector.extract_strided_slice %294 {offsets = [0, 48], sizes = [16, 8], strides = [1, 1]} : vector<16x96xf32> to vector<16x8xf32>
    %307 = vector.extract_strided_slice %294 {offsets = [0, 56], sizes = [16, 8], strides = [1, 1]} : vector<16x96xf32> to vector<16x8xf32>
    %308 = vector.shape_cast %304 : vector<16x8xf32> to vector<1x16x8xf32>
    %309 = vector.shape_cast %305 : vector<16x8xf32> to vector<1x16x8xf32>
    %310 = vector.shape_cast %306 : vector<16x8xf32> to vector<1x16x8xf32>
    %311 = vector.shape_cast %307 : vector<16x8xf32> to vector<1x16x8xf32>
    %312 = tpu.concatenate %308, %309, %310, %311 in 0 : vector<1x16x8xf32>, vector<1x16x8xf32>, vector<1x16x8xf32>, vector<1x16x8xf32> -> vector<4x16x8xf32>
    %313 = vector.extract_strided_slice %294 {offsets = [0, 64], sizes = [16, 8], strides = [1, 1]} : vector<16x96xf32> to vector<16x8xf32>
    %314 = vector.extract_strided_slice %294 {offsets = [0, 72], sizes = [16, 8], strides = [1, 1]} : vector<16x96xf32> to vector<16x8xf32>
    %315 = vector.extract_strided_slice %294 {offsets = [0, 80], sizes = [16, 8], strides = [1, 1]} : vector<16x96xf32> to vector<16x8xf32>
    %316 = vector.extract_strided_slice %294 {offsets = [0, 88], sizes = [16, 8], strides = [1, 1]} : vector<16x96xf32> to vector<16x8xf32>
    %317 = vector.shape_cast %313 : vector<16x8xf32> to vector<1x16x8xf32>
    %318 = vector.shape_cast %314 : vector<16x8xf32> to vector<1x16x8xf32>
    %319 = vector.shape_cast %315 : vector<16x8xf32> to vector<1x16x8xf32>
    %320 = vector.shape_cast %316 : vector<16x8xf32> to vector<1x16x8xf32>
    %321 = tpu.concatenate %317, %318, %319, %320 in 0 : vector<1x16x8xf32>, vector<1x16x8xf32>, vector<1x16x8xf32>, vector<1x16x8xf32> -> vector<4x16x8xf32>
    "tpu.trace_start"() <{level = 10 : i32, message = "hqd,hkd->hqk"}> : () -> ()
    %cst_133 = arith.constant dense<0.000000e+00> : vector<4x16x16xf32>
    %322 = tpu.matmul %303, %312, %cst_133 {dimension_numbers = #tpu.dot_dimension_numbers<[2], [2], [1], [1], [0, 0, 0, 1, 1, 1], [0], [0]>} : vector<4x16x8xf32>, vector<4x16x8xf32>, vector<4x16x16xf32> -> vector<4x16x16xf32>
    "tpu.trace_stop"() : () -> ()
    %cst_134 = arith.constant 0.353553385 : f32
    %323 = vector.broadcast %cst_134 : f32 to vector<4x16x16xf32>
    %324 = arith.mulf %322, %323 : vector<4x16x16xf32>
    %cst_135 = arith.constant dense<0xFF800000> : vector<4x16xf32>
    %325 = vector.multi_reduction <maximumf>, %324, %cst_135 [2] : vector<4x16x16xf32> to vector<4x16xf32>
    %326 = vector.shape_cast %325 : vector<4x16xf32> to vector<4x16x1xf32>
    %327 = vector.broadcast %326 : vector<4x16x1xf32> to vector<4x16x16xf32>
    %328 = arith.subf %324, %327 : vector<4x16x16xf32>
    %329 = math.exp %328 : vector<4x16x16xf32>
    %cst_136 = arith.constant dense<0.000000e+00> : vector<4x16xf32>
    %330 = vector.multi_reduction <add>, %329, %cst_136 [2] : vector<4x16x16xf32> to vector<4x16xf32>
    %331 = vector.shape_cast %330 : vector<4x16xf32> to vector<4x16x1xf32>
    %332 = vector.broadcast %331 : vector<4x16x1xf32> to vector<4x16x16xf32>
    %333 = arith.divf %329, %332 : vector<4x16x16xf32>
    "tpu.trace_start"() <{level = 10 : i32, message = "hqk,hkd->hqd"}> : () -> ()
    %cst_137 = arith.constant dense<0.000000e+00> : vector<4x16x8xf32>
    %334 = tpu.matmul %333, %321, %cst_137 {dimension_numbers = #tpu.dot_dimension_numbers<[2], [1], [1], [2], [0, 0, 0, 1, 1, 2], [0], [0]>} : vector<4x16x16xf32>, vector<4x16x8xf32>, vector<4x16x8xf32> -> vector<4x16x8xf32>
    "tpu.trace_stop"() : () -> ()
    %335 = vector.extract_strided_slice %334 {offsets = [0, 0, 0], sizes = [1, 16, 8], strides = [1, 1, 1]} : vector<4x16x8xf32> to vector<1x16x8xf32>
    %336 = vector.shape_cast %335 : vector<1x16x8xf32> to vector<16x8xf32>
    %337 = vector.extract_strided_slice %334 {offsets = [1, 0, 0], sizes = [1, 16, 8], strides = [1, 1, 1]} : vector<4x16x8xf32> to vector<1x16x8xf32>
    %338 = vector.shape_cast %337 : vector<1x16x8xf32> to vector<16x8xf32>
    %339 = vector.extract_strided_slice %334 {offsets = [2, 0, 0], sizes = [1, 16, 8], strides = [1, 1, 1]} : vector<4x16x8xf32> to vector<1x16x8xf32>
    %340 = vector.shape_cast %339 : vector<1x16x8xf32> to vector<16x8xf32>
    %341 = vector.extract_strided_slice %334 {offsets = [3, 0, 0], sizes = [1, 16, 8], strides = [1, 1, 1]} : vector<4x16x8xf32> to vector<1x16x8xf32>
    %342 = vector.shape_cast %341 : vector<1x16x8xf32> to vector<16x8xf32>
    %343 = tpu.concatenate %336, %338, %340, %342 in 1 : vector<16x8xf32>, vector<16x8xf32>, vector<16x8xf32>, vector<16x8xf32> -> vector<16x32xf32>
    %cst_138 = arith.constant dense<0.000000e+00> : vector<16x32xf32>
    %344 = tpu.matmul %343, %290, %cst_138 {dimension_numbers = #tpu.dot_dimension_numbers<[1], [0], [0], [1], [0, 0, 1, 1], [], []>} : vector<16x32xf32>, vector<32x32xf32>, vector<16x32xf32> -> vector<16x32xf32>
    %345 = vector.broadcast %291 : vector<1x32xf32> to vector<16x32xf32>
    %346 = arith.addf %344, %345 : vector<16x32xf32>
    %c0_139 = arith.constant 0 : index
    %c0_140 = arith.constant 0 : index
    %347 = vector.load %arg3[%c0_139, %c0_140] : memref<1x16xf32, #tpu.memory_space<vmem>>, vector<1x16xf32>
    %cst_141 = arith.constant dense<0.000000e+00> : vector<1x32xf32>
    %348 = tpu.matmul %347, %346, %cst_141 {dimension_numbers = #tpu.dot_dimension_numbers<[1], [0], [0], [1], [0, 0, 1, 1], [], []>} : vector<1x16xf32>, vector<16x32xf32>, vector<1x32xf32> -> vector<1x32xf32>
    %c0_142 = arith.constant 0 : index
    %c0_143 = arith.constant 0 : index
    %349 = vector.load %arg22[%c0_142, %c0_143] : memref<32x40xf32, #tpu.memory_space<vmem>>, vector<32x40xf32>
    %cst_144 = arith.constant dense<0.000000e+00> : vector<1x40xf32>
    %350 = tpu.matmul %348, %349, %cst_144 {dimension_numbers = #tpu.dot_dimension_numbers<[1], [0], [0], [1], [0, 0, 1, 1], [], []>} : vector<1x32xf32>, vector<32x40xf32>, vector<1x40xf32> -> vector<1x40xf32>
    %c0_145 = arith.constant 0 : index
    %c0_146 = arith.constant 0 : index
    %351 = vector.load %arg23[%c0_145, %c0_146] : memref<1x40xf32, #tpu.memory_space<vmem>>, vector<1x40xf32>
    %352 = arith.addf %350, %351 : vector<1x40xf32>
    %cst_147 = arith.constant 5.000000e-01 : f32
    %353 = vector.broadcast %cst_147 : f32 to vector<1x40xf32>
    %354 = arith.mulf %353, %352 : vector<1x40xf32>
    %cst_148 = arith.constant 0.707106769 : f32
    %355 = vector.broadcast %cst_148 : f32 to vector<1x40xf32>
    %356 = arith.mulf %352, %355 : vector<1x40xf32>
    %357 = math.erf %356 : vector<1x40xf32>
    %cst_149 = arith.constant 1.000000e+00 : f32
    %358 = vector.broadcast %cst_149 : f32 to vector<1x40xf32>
    %359 = arith.addf %358, %357 : vector<1x40xf32>
    %360 = arith.mulf %354, %359 : vector<1x40xf32>
    %c0_150 = arith.constant 0 : index
    %c0_151 = arith.constant 0 : index
    %361 = vector.load %arg24[%c0_150, %c0_151] : memref<40x24xf32, #tpu.memory_space<vmem>>, vector<40x24xf32>
    %cst_152 = arith.constant dense<0.000000e+00> : vector<1x24xf32>
    %362 = tpu.matmul %360, %361, %cst_152 {dimension_numbers = #tpu.dot_dimension_numbers<[1], [0], [0], [1], [0, 0, 1, 1], [], []>} : vector<1x40xf32>, vector<40x24xf32>, vector<1x24xf32> -> vector<1x24xf32>
    %c0_153 = arith.constant 0 : index
    %c0_154 = arith.constant 0 : index
    %363 = vector.load %arg25[%c0_153, %c0_154] : memref<1x24xf32, #tpu.memory_space<vmem>>, vector<1x24xf32>
    %364 = arith.addf %362, %363 : vector<1x24xf32>
    %365 = tpu.iota {dimensions = array<i32: 1>} : vector<1x24xi32>
    %c8_i32 = arith.constant 8 : i32
    %366 = vector.broadcast %c8_i32 : i32 to vector<1x24xi32>
    %367 = arith.cmpi sge, %365, %366 : vector<1x24xi32>
    %c16_i32 = arith.constant 16 : i32
    %368 = vector.broadcast %c16_i32 : i32 to vector<1x24xi32>
    %369 = arith.cmpi slt, %365, %368 : vector<1x24xi32>
    %370 = arith.andi %367, %369 : vector<1x24xi1>
    %cst_155 = arith.constant 0.000000e+00 : f32
    %371 = vector.broadcast %cst_155 : f32 to vector<1x24xf32>
    %372 = arith.maximumf %364, %371 : vector<1x24xf32>
    %373 = math.absf %364 : vector<1x24xf32>
    %cst_156 = arith.constant 0.000000e+00 : f32
    %374 = vector.broadcast %cst_156 : f32 to vector<1x24xf32>
    %375 = arith.subf %374, %373 : vector<1x24xf32>
    %376 = math.exp %375 : vector<1x24xf32>
    %cst_157 = arith.constant 1.000000e+00 : f32
    %377 = vector.broadcast %cst_157 : f32 to vector<1x24xf32>
    %378 = arith.addf %377, %376 : vector<1x24xf32>
    %379 = math.log %378 : vector<1x24xf32>
    %380 = arith.addf %372, %379 : vector<1x24xf32>
    %381 = arith.select %370, %380, %364 : vector<1x24xi1>, vector<1x24xf32>
    %c0_158 = arith.constant 0 : index
    %c0_159 = arith.constant 0 : index
    %c0_160 = arith.constant 0 : index
    %382 = vector.load %arg26[%c0_158, %c0_159, %c0_160] : memref<1x1x24xf32, #tpu.memory_space<vmem>>, vector<1x1x24xf32>
    %383 = vector.shape_cast %382 : vector<1x1x24xf32> to vector<1x24xf32>
    %384 = vector.shape_cast %381 : vector<1x24xf32> to vector<1x1x24xf32>
    tpu.vector_store %arg26[%c0_158, %c0_159, %c0_160], %384 {strides = array<i32>} : memref<1x1x24xf32, #tpu.memory_space<vmem>>, vector<1x1x24xf32>,
    return
  }
  func.func @transform_0(%arg0: i32) -> (i32, i32, i32) {
    %c0_i32 = arith.constant 0 : i32
    %c0_i32_0 = arith.constant 0 : i32
    %c0_i32_1 = arith.constant 0 : i32
    return %arg0, %c0_i32, %c0_i32_0 : i32, i32, i32
  }
  func.func @transform_1(%arg0: i32) -> (i32, i32, i32) {
    %c0_i32 = arith.constant 0 : i32
    %c0_i32_0 = arith.constant 0 : i32
    %c0_i32_1 = arith.constant 0 : i32
    %c0_i32_2 = arith.constant 0 : i32
    return %c0_i32, %c0_i32_0, %c0_i32_1 : i32, i32, i32
  }
  func.func @transform_2(%arg0: i32) -> (i32, i32) {
    %c0_i32 = arith.constant 0 : i32
    %c0_i32_0 = arith.constant 0 : i32
    %c0_i32_1 = arith.constant 0 : i32
    return %c0_i32, %c0_i32_0 : i32, i32
  }
  func.func @transform_3(%arg0: i32) -> (i32, i32) {
    %c0_i32 = arith.constant 0 : i32
    %c0_i32_0 = arith.constant 0 : i32
    %c0_i32_1 = arith.constant 0 : i32
    return %c0_i32, %c0_i32_0 : i32, i32
  }
  func.func @transform_4(%arg0: i32) -> (i32, i32) {
    %c0_i32 = arith.constant 0 : i32
    %c0_i32_0 = arith.constant 0 : i32
    %c0_i32_1 = arith.constant 0 : i32
    return %c0_i32, %c0_i32_0 : i32, i32
  }
  func.func @transform_5(%arg0: i32) -> (i32, i32, i32) {
    %c0_i32 = arith.constant 0 : i32
    %c0_i32_0 = arith.constant 0 : i32
    %c0_i32_1 = arith.constant 0 : i32
    %c0_i32_2 = arith.constant 0 : i32
    return %c0_i32, %c0_i32_0, %c0_i32_1 : i32, i32, i32
  }
  func.func @transform_6(%arg0: i32) -> (i32, i32, i32) {
    %c0_i32 = arith.constant 0 : i32
    %c0_i32_0 = arith.constant 0 : i32
    %c0_i32_1 = arith.constant 0 : i32
    %c0_i32_2 = arith.constant 0 : i32
    return %c0_i32, %c0_i32_0, %c0_i32_1 : i32, i32, i32
  }
  func.func @transform_7(%arg0: i32) -> (i32, i32, i32) {
    %c0_i32 = arith.constant 0 : i32
    %c0_i32_0 = arith.constant 0 : i32
    %c0_i32_1 = arith.constant 0 : i32
    %c0_i32_2 = arith.constant 0 : i32
    return %c0_i32, %c0_i32_0, %c0_i32_1 : i32, i32, i32
  }
  func.func @transform_8(%arg0: i32) -> (i32, i32, i32) {
    %c0_i32 = arith.constant 0 : i32
    %c0_i32_0 = arith.constant 0 : i32
    %c0_i32_1 = arith.constant 0 : i32
    %c0_i32_2 = arith.constant 0 : i32
    return %c0_i32, %c0_i32_0, %c0_i32_1 : i32, i32, i32
  }
  func.func @transform_9(%arg0: i32) -> (i32, i32, i32) {
    %c0_i32 = arith.constant 0 : i32
    %c0_i32_0 = arith.constant 0 : i32
    %c0_i32_1 = arith.constant 0 : i32
    %c0_i32_2 = arith.constant 0 : i32
    return %c0_i32, %c0_i32_0, %c0_i32_1 : i32, i32, i32
  }
  func.func @transform_10(%arg0: i32) -> (i32, i32, i32) {
    %c0_i32 = arith.constant 0 : i32
    %c0_i32_0 = arith.constant 0 : i32
    %c0_i32_1 = arith.constant 0 : i32
    %c0_i32_2 = arith.constant 0 : i32
    return %c0_i32, %c0_i32_0, %c0_i32_1 : i32, i32, i32
  }
  func.func @transform_11(%arg0: i32) -> (i32, i32, i32) {
    %c0_i32 = arith.constant 0 : i32
    %c0_i32_0 = arith.constant 0 : i32
    %c0_i32_1 = arith.constant 0 : i32
    %c0_i32_2 = arith.constant 0 : i32
    return %c0_i32, %c0_i32_0, %c0_i32_1 : i32, i32, i32
  }
  func.func @transform_12(%arg0: i32) -> (i32, i32, i32) {
    %c0_i32 = arith.constant 0 : i32
    %c0_i32_0 = arith.constant 0 : i32
    %c0_i32_1 = arith.constant 0 : i32
    %c0_i32_2 = arith.constant 0 : i32
    return %c0_i32, %c0_i32_0, %c0_i32_1 : i32, i32, i32
  }
  func.func @transform_13(%arg0: i32) -> (i32, i32, i32) {
    %c0_i32 = arith.constant 0 : i32
    %c0_i32_0 = arith.constant 0 : i32
    %c0_i32_1 = arith.constant 0 : i32
    %c0_i32_2 = arith.constant 0 : i32
    return %c0_i32, %c0_i32_0, %c0_i32_1 : i32, i32, i32
  }
  func.func @transform_14(%arg0: i32) -> (i32, i32, i32) {
    %c0_i32 = arith.constant 0 : i32
    %c0_i32_0 = arith.constant 0 : i32
    %c0_i32_1 = arith.constant 0 : i32
    %c0_i32_2 = arith.constant 0 : i32
    return %c0_i32, %c0_i32_0, %c0_i32_1 : i32, i32, i32
  }
  func.func @transform_15(%arg0: i32) -> (i32, i32, i32) {
    %c0_i32 = arith.constant 0 : i32
    %c0_i32_0 = arith.constant 0 : i32
    %c0_i32_1 = arith.constant 0 : i32
    %c0_i32_2 = arith.constant 0 : i32
    return %c0_i32, %c0_i32_0, %c0_i32_1 : i32, i32, i32
  }
  func.func @transform_16(%arg0: i32) -> (i32, i32, i32) {
    %c0_i32 = arith.constant 0 : i32
    %c0_i32_0 = arith.constant 0 : i32
    %c0_i32_1 = arith.constant 0 : i32
    %c0_i32_2 = arith.constant 0 : i32
    return %c0_i32, %c0_i32_0, %c0_i32_1 : i32, i32, i32
  }
  func.func @transform_17(%arg0: i32) -> (i32, i32) {
    %c0_i32 = arith.constant 0 : i32
    %c0_i32_0 = arith.constant 0 : i32
    %c0_i32_1 = arith.constant 0 : i32
    return %c0_i32, %c0_i32_0 : i32, i32
  }
  func.func @transform_18(%arg0: i32) -> (i32, i32) {
    %c0_i32 = arith.constant 0 : i32
    %c0_i32_0 = arith.constant 0 : i32
    %c0_i32_1 = arith.constant 0 : i32
    return %c0_i32, %c0_i32_0 : i32, i32
  }
  func.func @transform_19(%arg0: i32) -> (i32, i32) {
    %c0_i32 = arith.constant 0 : i32
    %c0_i32_0 = arith.constant 0 : i32
    %c0_i32_1 = arith.constant 0 : i32
    return %c0_i32, %c0_i32_0 : i32, i32
  }
  func.func @transform_20(%arg0: i32) -> (i32, i32) {
    %c0_i32 = arith.constant 0 : i32
    %c0_i32_0 = arith.constant 0 : i32
    %c0_i32_1 = arith.constant 0 : i32
    return %c0_i32, %c0_i32_0 : i32, i32
  }
  func.func @transform_21(%arg0: i32) -> (i32, i32) {
    %c0_i32 = arith.constant 0 : i32
    %c0_i32_0 = arith.constant 0 : i32
    %c0_i32_1 = arith.constant 0 : i32
    return %c0_i32, %c0_i32_0 : i32, i32
  }
  func.func @transform_22(%arg0: i32) -> (i32, i32) {
    %c0_i32 = arith.constant 0 : i32
    %c0_i32_0 = arith.constant 0 : i32
    %c0_i32_1 = arith.constant 0 : i32
    return %c0_i32, %c0_i32_0 : i32, i32
  }
  func.func @transform_23(%arg0: i32) -> (i32, i32) {
    %c0_i32 = arith.constant 0 : i32
    %c0_i32_0 = arith.constant 0 : i32
    %c0_i32_1 = arith.constant 0 : i32
    return %c0_i32, %c0_i32_0 : i32, i32
  }
  func.func @transform_24(%arg0: i32) -> (i32, i32) {
    %c0_i32 = arith.constant 0 : i32
    %c0_i32_0 = arith.constant 0 : i32
    %c0_i32_1 = arith.constant 0 : i32
    return %c0_i32, %c0_i32_0 : i32, i32
  }
  func.func @transform_25(%arg0: i32) -> (i32, i32, i32) {
    %c0_i32 = arith.constant 0 : i32
    %c0_i32_0 = arith.constant 0 : i32
    %c0_i32_1 = arith.constant 0 : i32
    return %arg0, %c0_i32, %c0_i32_0 : i32, i32, i32
  }
}

</mosaic_0001>

<bundles_post_ra>
// kernel: climate_transformer_forward.1
= control target key start
LH: loop header
LB: loop body
LE: loop exit
PB: predicated region body
PF: predicated region fallthrough
CT: control target
= control target key end

     0   :  { %s6230_s29 = smov 0   ;;  %s6965_s0 = inlined_call_operand.vmem [shape: f32[2,16,9], index: 0, kind: input, shape index: {}]   ;;  %s6966_s1 = inlined_call_operand.vmem [shape: f32[1,16,32], index: 1, kind: input, shape index: {}]   ;;  %s6967_s2 = inlined_call_operand.vmem [shape: f32[1,16], index: 2, kind: input, shape index: {}]   ;;  %s6968_s3 = inlined_call_operand.vmem [shape: f32[9,32], index: 3, kind: input, shape index: {}]   ;;  %s6969_s4 = inlined_call_operand.vmem [shape: f32[1,32], index: 4, kind: input, shape index: {}]   ;;  %s6970_s5 = inlined_call_operand.vmem [shape: f32[2,1,32], index: 5, kind: input, shape index: {}]   ;;  %s6971_s6 = inlined_call_operand.vmem [shape: f32[2,1,32], index: 6, kind: input, shape index: {}]   ;;  %s6972_s7 = inlined_call_operand.vmem [shape: f32[2,32,96], index: 7, kind: input, shape index: {}]   ;;  %s6973_s8 = inlined_call_operand.vmem [shape: f32[2,1,96], index: 8, kind: input, shape index: {}]   ;;  %s6974_s9 = inlined_call_operand.vmem [shape: f32[2,32,32], index: 9, kind: input, shape index: {}]   ;;  %s6975_s10 = inlined_call_operand.vmem [shape: f32[2,1,32], index: 10, kind: input, shape index: {}]   ;;  %s6976_s11 = inlined_call_operand.vmem [shape: f32[2,1,32], index: 11, kind: input, shape index: {}]   ;;  %s6977_s12 = inlined_call_operand.vmem [shape: f32[2,1,32], index: 12, kind: input, shape index: {}]   ;;  %s6978_s13 = inlined_call_operand.vmem [shape: f32[2,32,128], index: 13, kind: input, shape index: {}]   ;;  %s6979_s14 = inlined_call_operand.vmem [shape: f32[2,1,128], index: 14, kind: input, shape index: {}]   ;;  %s6980_s15 = inlined_call_operand.vmem [shape: f32[2,128,32], index: 15, kind: input, shape index: {}]   ;;  %s6981_s16 = inlined_call_operand.vmem [shape: f32[2,1,32], index: 16, kind: input, shape index: {}]   ;;  %s6982_s17 = inlined_call_operand.vmem [shape: f32[32,96], index: 17, kind: input, shape index: {}]   ;;  %s6983_s18 = inlined_call_operand.vmem [shape: f32[1,96], index: 18, kind: input, shape index: {}]   ;;  %s6984_s19 = inlined_call_operand.vmem [shape: f32[32,32], index: 19, kind: input, shape index: {}]   ;;  %s6985_s20 = inlined_call_operand.vmem [shape: f32[1,32], index: 20, kind: input, shape index: {}]   ;;  %s6986_s21 = inlined_call_operand.vmem [shape: f32[32,40], index: 21, kind: input, shape index: {}]   ;;  %s6987_s22 = inlined_call_operand.vmem [shape: f32[1,40], index: 22, kind: input, shape index: {}]   ;;  %s6988_s23 = inlined_call_operand.vmem [shape: f32[40,24], index: 23, kind: input, shape index: {}]   ;;  %s6989_s24 = inlined_call_operand.vmem [shape: f32[1,24], index: 24, kind: input, shape index: {}]   ;;  %s6990_s25 = inlined_call_operand.vmem [shape: f32[2,1,24], index: 25, kind: output, shape index: {}]  }
   0x1   :  { %7023 = sst [smem:[#allocation4_spill]] %s6965_s0 }
   0x2   :  { %7024 = sst [smem:[#allocation5_spill]] %s6966_s1 }
   0x3   :  { %7025 = sst [smem:[#allocation6_spill]] %s6967_s2 }
   0x4   :  { %7026 = sst [smem:[#allocation7_spill]] %s6968_s3 }
   0x5   :  { %7027 = sst [smem:[#allocation8_spill]] %s6969_s4 }
   0x6   :  { %7028 = sst [smem:[#allocation9_spill]] %s6970_s5 }
   0x7   :  { %7029 = sst [smem:[#allocation10_spill]] %s6971_s6 }
   0x8   :  { %7030 = sst [smem:[#allocation11_spill]] %s6972_s7 }
   0x9   :  { %7031 = sst [smem:[#allocation12_spill]] %s6973_s8 }
   0xa   :  { %7032 = sst [smem:[#allocation13_spill]] %s6974_s9 }
   0xb   :  { %7033 = sst [smem:[#allocation14_spill]] %s6975_s10 }
   0xc   :  { %7034 = sst [smem:[#allocation15_spill]] %s6989_s24 }
   0xd   :  { %7035 = sst [smem:[#allocation16_spill]] %s6990_s25 }
   0xe LB: > { %7036 = sst [smem:[#allocation2_spill]] %s6086_s29  ;;  %s4824_s2 = sadd.s32 4294967295, %s6086_s29   ;;  %s6086_s29 = sphi %s6230_s29, %s35_s29  }
   0xf   : > { %p4828_p0 = scmp.ge.s32.totalorder %s6086_s29, 1  ;;  %p687_p1 = scmp.lt.s32.totalorder %s6086_s29, 3 }
  0x11   : > { %p688_p2 = pnand %p4828_p0, %p687_p1 }
  0x13   : > { %691 = sbr.rel (%p688_p2) target bundleno = 7799 (0x1e77), region = 120 }
  0x1a   : > { %s7037_s7 = sld [smem:[#allocation7_spill]]  ;;  %vm779_vm0 = vcmask 1040384   ;;  %p753_p3 = scmp.lt.s32.totalorder %s4824_s2, 1  ;;  %vm6088_vm1 = vmmov 1   ;;  %vm772_vm3 = vcmask 72704   ;;  %vm864_vm4 = vcmask 261120  }
  0x1b   : > { %vm5546_vm2 = vmpackc.low %vm779_vm0, %vm6088_vm1  ;;  %s7039_s4 = sld [smem:[#allocation4_spill]]  ;;  %s7040_s0 = sld [smem:[#allocation8_spill]]  ;;  %vm1023_vm5 = vcmask 64512   ;;  %vm1376_vm7 = vcmask 130048   ;;  %vm1841_vm8 = vcmask 195584   ;;  %vm6098_vm9 = vmmov 0  }
  0x1c   : > { %s7064_s2 = smov (!%p753_p3, %s4824_s2), 1  ;;  %s7041_s3 = sld [smem:[#allocation5_spill]]  ;;  %vm6316_vm6 = vmpackc.low %vm1023_vm5, %vm1023_vm5  ;;  %vm4686_vm10 = vcmask 326656   ;;  %vm4775_vm14 = vcmask 188416  }
  0x1d   : > { %7038 = sst [smem:[#allocation3_spill]] %s7064_s2  ;;  %s4982_s1 = sshll.u32 %s7064_s2, 4 }
  0x1e   : > { %s7042_s8 = sld [smem:[#allocation11_spill]]  ;;  %s7043_s26 = sld [smem:[#allocation9_spill]] }
  0x1f   : > { %s7044_s27 = sld [smem:[#allocation10_spill]]  ;;  %s7045_s9 = sld [smem:[#allocation12_spill]] }
  0x20   : > { %v763_v0 = vld [vmem:[%s7037_s7] sm:$0xff]  ;;  %v764_v1 = vld [vmem:[%s7037_s7 + $0x8] sm:$0x1]  ;;  %s7007_s5 = smov 120   ;;  %s7003_s6 = smov 104  }
  0x21   : > { %v5545_v2 = vpack.c.bf16 %v764_v1, %v763_v0  ;;  %s757_s28 = scalar_lea.vmem %s7039_s4, %s4982_s1  ;;  %v4831_v5 = vld [vmem:[%s7040_s0] ss:$0 sm:$0xff]  ;;  %s7005_s0 = smov 112  }
  0x22   : > { %v761_v3 = vld [vmem:[%s757_s28] sm:$0xff]  ;;  %v762_v4 = vld [vmem:[%s757_s28 + $0x8] sm:$0xff]  ;;  %s7001_s30 = smov 96   ;;  %s6999_s7 = smov 64  }
  0x23   : > { %5547 = vmatprep.subr.msk.bf16.mxu0 %vm5546_vm2, %v5545_v2  ;;  %5185 = vmatprep.mubr.msk.f32.mxu0 %vm772_vm3, %v761_v3  ;;  %v858_v8 = vld [vmem:[%s7041_s3] sm:$0xff]  ;;  %v859_v11 = vld [vmem:[%s7041_s3 + $0x8] sm:$0xff]  ;;  %s7048_s28 = sld [smem:[#allocation13_spill]]  ;;  %s7010_s3 = smov 24  }
  0x24   : > { %5550 = vmatpush3.bf16.msk.msra.mxu0 %vm5546_vm2, %v5545_v2  ;;  %v908_v26 = vld [vmem:[%s7042_s8] sm:$0xff]  ;;  %v909_v27 = vld [vmem:[%s7042_s8 + $0x8] sm:$0xff]  ;;  %v910_v28 = vld [vmem:[%s7042_s8 + $0x10] sm:$0xff]  ;;  %s7049_s10 = sld [smem:[#allocation14_spill]]  ;;  %s7050_s4 = smov 120  }
  0x25   : > { %v5551_v29 = vpack.c.bf16 %v909_v27, %v908_v26  ;;  %v911_v30 = vld [vmem:[%s7042_s8 + $0x18] sm:$0xff]  ;;  %v4835_v39 = vld [vmem:[%s7043_s26] ss:$0 sm:$0xff] }
  0x26   : > { %v5555_v31 = vpack.c.bf16 %v911_v30, %v910_v28  ;;  %v4836_v41 = vld [vmem:[%s7044_s27] ss:$0 sm:$0xff] }
  0x27   : > { %5186 = vmatmul.mubr.msk.f32.vlgmr.msra.gmra.mrb[0].mxu0 %vm772_vm3, %v762_v4  ;;  %5552 = vmatprep.subr.bf16.mxu1 %v5551_v29  ;;  %v4837_v48 = vld [vmem:[%s7045_s9] ss:$0 sm:$0xff] }
  0x28   : > { %5554 = vmatpush3.bf16.msra.mxu1 %v5551_v29 }
  0x29   : > { %5556 = vmatprep.subr.bf16.mxu1 %v5555_v31 }
  0x2c   : > { %5558 = vmatpush3.bf16.msra.mxu1 %v5555_v31 }
  0xfa   : > { %v5187_v6 = vpop.f32.mrb[0].mxu0 }
  0xfb   : > { %v849_v7 = vpop.f32.mrb[1].mxu0  ;;  %v855_v9 = vadd.f32 %v5187_v6, %v4831_v5 }
  0xfc   : > { %v850_v10 = vadd.f32 %v4831_v5, %v849_v7 }
  0xfd   : > { %v6261_v13 = vadd.f32 %v859_v11, %v855_v9 }
  0xfe   : > { %v6259_v12 = vadd.f32 %v858_v8, %v850_v10 }
  0xff   : > { %v868_v15 = vsel %vm864_vm4, %v6261_v13, 0.0 }
 0x100   : > { %v865_v14 = vsel %vm864_vm4, %v6259_v12, 0.0 }
 0x101   : > { %866 = vadd.xlane.f32.xlu0 %v865_v14 }
 0x105   : > { %869 = vadd.xlane.f32.xlu0 %v868_v15 }
 0x18e   : > { %v867_v16 = vpop.xlane.xlu0 %866 }
 0x18f   : > { %v872_v17 = vmul.f32 0.03125, %v867_v16 }
 0x191   : > { %v874_v18 = vsub.f32 %v6259_v12, %v872_v17 }
 0x192   : > { %v870_v19 = vpop.xlane.xlu0 %869 }
 0x193   : > { %v873_v20 = vmul.f32 0.03125, %v870_v19  ;;  %v876_v21 = vmul.f32 %v874_v18, %v874_v18 }
 0x195   : > { %v875_v22 = vsub.f32 %v6261_v13, %v873_v20  ;;  %v878_v23 = vsel %vm864_vm4, %v876_v21, 0.0 }
 0x196   : > { %879 = vadd.xlane.f32.xlu1 %v878_v23 }
 0x197   : > { %v877_v24 = vmul.f32 %v875_v22, %v875_v22 }
 0x199   : > { %v881_v25 = vsel %vm864_vm4, %v877_v24, 0.0 }
 0x19a   : > { %882 = vadd.xlane.f32.xlu1 %v881_v25 }
 0x223   : > { %v880_v32 = vpop.xlane.xlu1 %879 }
 0x224   : > { %v884_v33 = vmul.f32 0.03125, %v880_v32 }
 0x226   : > { %v886_v34 = vadd.f32 1e-05, %v884_v33 }
 0x227   : > { %v883_v35 = vpop.xlane.xlu1 %882 }
 0x228   : > { %5954 = vrsqrt.f32 %v886_v34  ;;  %v885_v36 = vmul.f32 0.03125, %v883_v35 }
 0x22a   : > { %v887_v37 = vadd.f32 1e-05, %v885_v36 }
 0x22c   : > { %5956 = vrsqrt.f32 %v887_v37 }
 0x232   : > { %v5955_v38 = vpop.eup %5954 }
 0x233   : > { %v890_v40 = vmul.f32 %v5955_v38, %v874_v18 }
 0x235   : > { %v898_v42 = vmul.f32 %v4835_v39, %v890_v40 }
 0x236   : > { %v5957_v43 = vpop.eup %5956 }
 0x237   : > { %v891_v44 = vmul.f32 %v5957_v43, %v875_v22  ;;  %v906_v45 = vadd.f32 %v4836_v41, %v898_v42 }
 0x239   : > { %v899_v46 = vmul.f32 %v4835_v39, %v891_v44  ;;  %5196 = vmatprep.mubr.msk.f32.mxu1 %vm864_vm4, %v906_v45 }
 0x23b   : > { %v907_v47 = vadd.f32 %v4836_v41, %v899_v46 }
 0x23d   : > { %5197 = vmatmul.mubr.msk.f32.vlgmr.msra.gmra.mrb[0].mxu1 %vm864_vm4, %v907_v47 }
 0x310   : > { %v5198_v49 = vpop.f32.mrb[0].mxu1 }
 0x311   : > { %v1002_v50 = vadd.f32 %v5198_v49, %v4837_v48  ;;  %v996_v51 = vpop.f32.mrb[1].mxu1 }
 0x312   : > { %v997_v52 = vadd.f32 %v4837_v48, %v996_v51 }
 0x313   : > { %1009 = vrot.lane.b32.xlu1 %v1002_v50, %s7007_s5 }
 0x314   : > { %1007 = vrot.lane.b32.xlu0 %v997_v52, %s7007_s5  ;;  %5203 = vmatprep.mubr.msk.f32.mxu0 %vm1023_vm5, %v997_v52  ;;  %v6299_v53 = vpack.i.bf16 %v1002_v50, %v997_v52  ;;  %s7051_s5 = smov 112  }
 0x317   : > { %1013 = vrot.lane.b32.xlu1 %v1002_v50, %s7005_s0 }
 0x318   : > { %1015 = vrot.lane.b32.xlu0 %v997_v52, %s7003_s6 }
 0x31b   : > { %1011 = vrot.lane.b32.xlu1 %v997_v52, %s7005_s0  ;;  %s7012_s0 = smov 16  }
 0x31c   : > { %5835 = vrot.lane.b32.xlu0 %v6299_v53, %s7001_s30 }
 0x31f   : > { %1017 = vrot.lane.b32.xlu1 %v1002_v50, %s7003_s6  ;;  %s7053_s6 = smov 96  }
 0x385   : > { %v1010_v54 = vpop.permute.xlu1 %1009 }
 0x386   : > { %v1008_v55 = vpop.permute.xlu0 %1007 }
 0x387   : > { %5210 = vmatprep.mubr.msk.f32.mxu1 %vm1023_vm5, %v1008_v55  ;;  %v6306_v56 = vpack.i.bf16 %v1010_v54, %v1008_v55 }
 0x389   : > { %v1014_v57 = vpop.permute.xlu1 %1013  ;;  %5840 = vrot.lane.b32.xlu1 %v6306_v56, %s7001_s30 }
 0x38a   : > { %v1016_v58 = vpop.permute.xlu0 %1015 }
 0x38d   : > { %v1012_v59 = vpop.permute.xlu1 %1011 }
 0x38e   : > { %v5836_v60 = vpop.permute.xlu0 %5835  ;;  %v6310_v61 = vpack.i.bf16 %v1014_v57, %v1012_v59 }
 0x38f   : > { %v5838_v62 = vunpack.i.h.bf16 %v5836_v60  ;;  %v5837_v63 = vunpack.i.l.bf16 %v5836_v60 }
 0x390   : > { %5845 = vrot.lane.b32.xlu0 %v6310_v61, %s7001_s30 }
 0x391   : > { %v5559_v1 = vpack.c.bf16 %v5838_v62, %v5837_v63  ;;  %v1018_v2 = vpop.permute.xlu1 %1017 }
 0x392   : > { %v6320_v3 = vpack.i.bf16 %v1018_v2, %v1016_v58 }
 0x393   : > { %5561 = vmatprep.subr.msk.bf16.mxu0 %vm6316_vm6, %v5559_v1 }
 0x394   : > { %5850 = vrot.lane.b32.xlu1 %v6320_v3, %s7001_s30  ;;  %5564 = vmatpush3.bf16.xpose.msk.msra.mxu0 %vm6316_vm6, %v5559_v1  ;;  %s7014_s30 = smov 8  }
 0x39b   : > { %5204 = vmatmul.mubr.msk.f32.vlgmr.msra.gmra.mrb[2].mxu0 %vm1023_vm5, %v1002_v50 }
 0x39c   : > { %5217 = vmatprep.mubr.msk.f32.mxu0 %vm1023_vm5, %v1012_v59 }
 0x3fb   : > { %v5841_v4 = vpop.permute.xlu1 %5840 }
 0x3fc   : > { %v5843_v5 = vunpack.i.h.bf16 %v5841_v4  ;;  %v5842_v6 = vunpack.i.l.bf16 %v5841_v4 }
 0x3fe   : > { %v5565_v7 = vpack.c.bf16 %v5843_v5, %v5842_v6 }
 0x400   : > { %5567 = vmatprep.subr.msk.bf16.mxu1 %vm6316_vm6, %v5565_v7 }
 0x401   : > { %5570 = vmatpush3.bf16.xpose.msk.msra.mxu1 %vm6316_vm6, %v5565_v7 }
 0x402   : > { %v5846_v8 = vpop.permute.xlu0 %5845 }
 0x403   : > { %v5848_v9 = vunpack.i.h.bf16 %v5846_v8  ;;  %v5847_v10 = vunpack.i.l.bf16 %v5846_v8 }
 0x405   : > { %v5571_v11 = vpack.c.bf16 %v5848_v9, %v5847_v10 }
 0x406   : > { %v5851_v14 = vpop.permute.xlu1 %5850 }
 0x407   : > { %v5853_v15 = vunpack.i.h.bf16 %v5851_v14  ;;  %v5852_v16 = vunpack.i.l.bf16 %v5851_v14  ;;  %5573 = vmatprep.subr.msk.bf16.mxu0 %vm6316_vm6, %v5571_v11 }
 0x408   : > { %5211 = vmatmul.mubr.msk.f32.vlgmr.msra.gmra.mrb[2].mxu1 %vm1023_vm5, %v1010_v54  ;;  %5576 = vmatpush3.bf16.xpose.msk.msra.mxu0 %vm6316_vm6, %v5571_v11 }
 0x409   : > { %v5577_v17 = vpack.c.bf16 %v5853_v15, %v5852_v16  ;;  %5224 = vmatprep.mubr.msk.f32.mxu1 %vm1023_vm5, %v1016_v58 }
 0x40b   : > { %5579 = vmatprep.subr.msk.bf16.mxu1 %vm6316_vm6, %v5577_v17 }
 0x40c   : > { %5582 = vmatpush3.bf16.xpose.msk.msra.mxu1 %vm6316_vm6, %v5577_v17 }
 0x40f   : > { %5218 = vmatmul.mubr.msk.f32.vlgmr.msra.gmra.mrb[4].mxu0 %vm1023_vm5, %v1014_v57 }
 0x413   : > { %5225 = vmatmul.mubr.msk.f32.vlgmr.msra.gmra.mrb[4].mxu1 %vm1023_vm5, %v1018_v2 }
 0x46e   : > { %v5205_v18 = vpop.f32.mrb[2].mxu0 }
 0x46f   : > { %v1369_v19 = vmul.f32 0.35355338, %v5205_v18  ;;  %v1098_v20 = vpop.f32.mrb[3].mxu0 }
 0x470   : > { %v1368_v21 = vmul.f32 0.35355338, %v1098_v20 }
 0x471   : > { %v1380_v22 = vsel %vm1376_vm7, %v1369_v19, -inf }
 0x472   : > { %1381 = vmax.xlane.f32.xlu1 %v1380_v22  ;;  %v1377_v23 = vsel %vm1376_vm7, %v1368_v21, -inf }
 0x473   : > { %1378 = vmax.xlane.f32.xlu0 %v1377_v23 }
 0x4db   : > { %v5212_v24 = vpop.f32.mrb[2].mxu1 }
 0x4dc   : > { %v1371_v25 = vmul.f32 0.35355338, %v5212_v24  ;;  %v1185_v26 = vpop.f32.mrb[3].mxu1 }
 0x4dd   : > { %v1370_v27 = vmul.f32 0.35355338, %v1185_v26 }
 0x4de   : > { %v1386_v28 = vsel %vm1376_vm7, %v1371_v25, -inf }
 0x4df   : > { %1387 = vmax.xlane.f32.xlu0 %v1386_v28  ;;  %v1383_v30 = vsel %vm1376_vm7, %v1370_v27, -inf }
 0x4e2   : > { %v5219_v29 = vpop.f32.mrb[4].mxu0 }
 0x4e3   : > { %v1373_v31 = vmul.f32 0.35355338, %v5219_v29  ;;  %1384 = vmax.xlane.f32.xlu0 %v1383_v30  ;;  %v1272_v32 = vpop.f32.mrb[5].mxu0 }
 0x4e4   : > { %v1372_v33 = vmul.f32 0.35355338, %v1272_v32 }
 0x4e5   : > { %v1392_v34 = vsel %vm1376_vm7, %v1373_v31, -inf }
 0x4e6   : > { %v5226_v35 = vpop.f32.mrb[4].mxu1  ;;  %1393 = vmax.xlane.f32.xlu1 %v1392_v34  ;;  %v1389_v36 = vsel %vm1376_vm7, %v1372_v33, -inf }
 0x4e7   : > { %v1375_v37 = vmul.f32 0.35355338, %v5226_v35  ;;  %v1359_v38 = vpop.f32.mrb[5].mxu1  ;;  %1390 = vmax.xlane.f32.xlu0 %v1389_v36 }
 0x4e8   : > { %v1374_v39 = vmul.f32 0.35355338, %v1359_v38 }
 0x4e9   : > { %v1398_v40 = vsel %vm1376_vm7, %v1375_v37, -inf }
 0x4ea   : > { %1399 = vmax.xlane.f32.xlu1 %v1398_v40  ;;  %v1395_v41 = vsel %vm1376_vm7, %v1374_v39, -inf }
 0x4eb   : > { %1396 = vmax.xlane.f32.xlu0 %v1395_v41 }
 0x4ff   : > { %v1382_v42 = vpop.xlane.xlu1 %1381 }
 0x500   : > { %v1402_v43 = vsub.f32 %v1369_v19, %v1382_v42  ;;  %v1379_v44 = vpop.xlane.xlu0 %1378 }
 0x501   : > { %v1401_v45 = vsub.f32 %v1368_v21, %v1379_v44 }
 0x502   : > { %v1411_v46 = vmul.f32 1.442695, %v1402_v43 }
 0x503   : > { %v1409_v47 = vmul.f32 1.442695, %v1401_v45 }
 0x504   : > { %5958 = vpow2.f32 %v1411_v46 }
 0x505   : > { %5960 = vpow2.f32 %v1409_v47 }
 0x50e   : > { %v6354_v48 = vpop.eup %5958 }
 0x50f   : > { %v5961_v49 = vpop.eup %5960  ;;  %v1428_v50 = vsel %vm1376_vm7, %v6354_v48, 0.0 }
 0x510   : > { %1429 = vadd.xlane.f32.xlu1 %v1428_v50  ;;  %v1425_v51 = vsel %vm1376_vm7, %v5961_v49, 0.0 }
 0x511   : > { %1426 = vadd.xlane.f32.xlu0 %v1425_v51 }
 0x56c   : > { %v1388_v52 = vpop.xlane.xlu0 %1387 }
 0x56d   : > { %v1404_v54 = vsub.f32 %v1371_v25, %v1388_v52 }
 0x56f   : > { %v1415_v55 = vmul.f32 1.442695, %v1404_v54 }
 0x570   : > { %v1385_v57 = vpop.xlane.xlu0 %1384 }
 0x571   : > { %5962 = vpow2.f32 %v1415_v55  ;;  %v1403_v58 = vsub.f32 %v1370_v27, %v1385_v57 }
 0x573   : > { %v1413_v59 = vmul.f32 1.442695, %v1403_v58  ;;  %v1394_v60 = vpop.xlane.xlu1 %1393 }
 0x574   : > { %v1406_v62 = vsub.f32 %v1373_v31, %v1394_v60  ;;  %v1391_v63 = vpop.xlane.xlu0 %1390 }
 0x575   : > { %5964 = vpow2.f32 %v1413_v59  ;;  %v1405_v1 = vsub.f32 %v1372_v33, %v1391_v63 }
 0x576   : > { %v1419_v2 = vmul.f32 1.442695, %v1406_v62 }
 0x577   : > { %v1417_v4 = vmul.f32 1.442695, %v1405_v1  ;;  %v1400_v5 = vpop.xlane.xlu1 %1399  ;;  %v913_v1 = vld [vmem:[%s7048_s28] sm:$0xff] }
 0x578   : > { %5966 = vpow2.f32 %v1419_v2  ;;  %v1408_v6 = vsub.f32 %v1375_v37, %v1400_v5  ;;  %v1397_v7 = vpop.xlane.xlu0 %1396  ;;  %v914_v2 = vld [vmem:[%s7048_s28 + $0x8] sm:$0xff]  ;;  %v915_v5 = vld [vmem:[%s7048_s28 + $0x10] sm:$0xff] }
 0x579   : > { %5968 = vpow2.f32 %v1417_v4  ;;  %v1407_v8 = vsub.f32 %v1374_v39, %v1397_v7  ;;  %v5599_v4 = vpack.c.bf16 %v914_v2, %v913_v1 }
 0x57a   : > { %v1423_v9 = vmul.f32 1.442695, %v1408_v6  ;;  %v916_v6 = vld [vmem:[%s7048_s28 + $0x18] sm:$0xff] }
 0x57b   : > { %v6359_v10 = vpop.eup %5962  ;;  %v1421_v11 = vmul.f32 1.442695, %v1407_v8  ;;  %v5603_v7 = vpack.c.bf16 %v916_v6, %v915_v5  ;;  %v4867_v6 = vld [vmem:[%s6976_s11] ss:$0 sm:$0xff] }
 0x57c   : > { %5970 = vpow2.f32 %v1423_v9  ;;  %v1434_v14 = vsel %vm1376_vm7, %v6359_v10, 0.0 }
 0x57d   : > { %5972 = vpow2.f32 %v1421_v11  ;;  %1435 = vadd.xlane.f32.xlu1 %v1434_v14 }
 0x57f   : > { %v6363_v15 = vpop.eup %5964 }
 0x580   : > { %v1431_v16 = vsel %vm1376_vm7, %v6363_v15, 0.0 }
 0x581   : > { %1432 = vadd.xlane.f32.xlu0 %v1431_v16 }
 0x582   : > { %v6367_v17 = vpop.eup %5966 }
 0x583   : > { %v5969_v18 = vpop.eup %5968  ;;  %v1440_v19 = vsel %vm1376_vm7, %v6367_v17, 0.0 }
 0x584   : > { %1441 = vadd.xlane.f32.xlu1 %v1440_v19  ;;  %v1437_v20 = vsel %vm1376_vm7, %v5969_v18, 0.0 }
 0x585   : > { %1438 = vadd.xlane.f32.xlu0 %v1437_v20 }
 0x586   : > { %v6372_v21 = vpop.eup %5970 }
 0x587   : > { %v6374_v22 = vpop.eup %5972  ;;  %v1446_v23 = vsel %vm1376_vm7, %v6372_v21, 0.0 }
 0x588   : > { %1447 = vadd.xlane.f32.xlu1 %v1446_v23  ;;  %v1443_v24 = vsel %vm1376_vm7, %v6374_v22, 0.0 }
 0x589   : > { %1444 = vadd.xlane.f32.xlu0 %v1443_v24 }
 0x599   : > { %5860 = vrot.lane.b32.xlu1 %v6306_v56, %s6999_s7 }
 0x59d   : > { %5865 = vrot.lane.b32.xlu1 %v6310_v61, %s6999_s7  ;;  %v1430_v28 = vpop.xlane.xlu1 %1429 }
 0x59e   : > { %v1427_v25 = vpop.xlane.xlu0 %1426 }
 0x59f   : > { %5974 = vrcp.f32 %v1427_v25  ;;  %5855 = vrot.lane.b32.xlu0 %v6299_v53, %s6999_s7 }
 0x5a1   : > { %5870 = vrot.lane.b32.xlu1 %v6320_v3, %s6999_s7 }
 0x5a9   : > { %v5975_v26 = vpop.eup %5974 }
 0x5aa   : > { %v1450_v27 = vmul.f32 %v5975_v26, %v5961_v49 }
 0x5ac   : > { %5231 = vmatprep.mubr.msk.f32.mxu0 %vm1376_vm7, %v1450_v27 }
 0x60a   : > { %v1436_v29 = vpop.xlane.xlu1 %1435 }
 0x60e   : > { %v1433_v30 = vpop.xlane.xlu0 %1432 }
 0x611   : > { %v1442_v31 = vpop.xlane.xlu1 %1441 }
 0x612   : > { %v1439_v56 = vpop.xlane.xlu0 %1438 }
 0x613   : > { %5976 = vrcp.f32 %v1439_v56 }
 0x614   : > { %5978 = vrcp.f32 %v1430_v28 }
 0x615   : > { %5980 = vrcp.f32 %v1433_v30  ;;  %v1448_v61 = vpop.xlane.xlu1 %1447  ;;  %v4864_v30 = vld [vmem:[%s7049_s10] ss:$0 sm:$0xff] }
 0x616   : > { %v1445_v32 = vpop.xlane.xlu0 %1444  ;;  %5982 = vrcp.f32 %v1442_v31 }
 0x617   : > { %5984 = vrcp.f32 %v1436_v29 }
 0x618   : > { %5986 = vrcp.f32 %v1445_v32 }
 0x619   : > { %v5861_v53 = vpop.permute.xlu1 %5860  ;;  %5988 = vrcp.f32 %v1448_v61 }
 0x61a   : > { %v5856_v33 = vpop.permute.xlu0 %5855  ;;  %v5863_v3 = vunpack.i.h.bf16 %v5861_v53  ;;  %v5862_v34 = vunpack.i.l.bf16 %v5861_v53 }
 0x61b   : > { %v5858_v35 = vunpack.i.h.bf16 %v5856_v33  ;;  %v5857_v36 = vunpack.i.l.bf16 %v5856_v33 }
 0x61c   : > { %v5587_v45 = vpack.c.bf16 %v5863_v3, %v5862_v34 }
 0x61d   : > { %v5977_v37 = vpop.eup %5976  ;;  %v5583_v38 = vpack.c.bf16 %v5858_v35, %v5857_v36  ;;  %v5866_v39 = vpop.permute.xlu1 %5865 }
 0x61e   : > { %v5979_v40 = vpop.eup %5978  ;;  %v5868_v41 = vunpack.i.h.bf16 %v5866_v39  ;;  %v5867_v42 = vunpack.i.l.bf16 %v5866_v39  ;;  %v1458_v43 = vmul.f32 %v5977_v37, %v5969_v18 }
 0x61f   : > { %v5981_v44 = vpop.eup %5980  ;;  %5584 = vmatprep.subr.bf16.mxu0 %v5583_v38  ;;  %v1452_v50 = vmul.f32 %v5979_v40, %v6354_v48 }
 0x620   : > { %v5591_v46 = vpack.c.bf16 %v5868_v41, %v5867_v42  ;;  %5586 = vmatpush3.bf16.msra.mxu0 %v5583_v38  ;;  %5245 = vmatprep.mubr.msk.f32.mxu1 %vm1376_vm7, %v1458_v43  ;;  %v5983_v47 = vpop.eup %5982  ;;  %v1454_v55 = vmul.f32 %v5981_v44, %v6363_v15  ;;  %v1977_v43 = vld [vmem:[%s6978_s13] sm:$0xff]  ;;  %v1978_v44 = vld [vmem:[%s6978_s13 + $0x8] sm:$0xff] }
 0x621   : > { %v5871_v49 = vpop.permute.xlu1 %5870  ;;  %5588 = vmatprep.subr.bf16.mxu0 %v5587_v45  ;;  %v5985_v51 = vpop.eup %5984  ;;  %v1460_v59 = vmul.f32 %v5983_v47, %v6367_v17  ;;  %v1980_v47 = vld [vmem:[%s6978_s13 + $0x18] sm:$0xff] }
 0x622   : > { %v5873_v52 = vunpack.i.h.bf16 %v5871_v49  ;;  %v5872_v54 = vunpack.i.l.bf16 %v5871_v49  ;;  %5592 = vmatprep.subr.bf16.mxu1 %v5591_v46  ;;  %v5987_v57 = vpop.eup %5986  ;;  %v1456_v60 = vmul.f32 %v5985_v51, %v6359_v10  ;;  %v2080_v51 = vld [vmem:[%s6980_s15 + $0x8] sm:$0xff] }
 0x623   : > { %5232 = vmatmul.mubr.msk.f32.vlgmr.msra.gmra.mrb[6].mxu0 %vm1376_vm7, %v1452_v50  ;;  %5594 = vmatpush3.bf16.msra.mxu1 %v5591_v46  ;;  %v5989_v62 = vpop.eup %5988  ;;  %v1462_v48 = vmul.f32 %v5987_v57, %v6374_v22  ;;  %v1979_v46 = vld [vmem:[%s6978_s13 + $0x10] sm:$0xff]  ;;  %v2079_v50 = vld [vmem:[%s6980_s15] sm:$0xff] }
 0x624   : > { %v5595_v58 = vpack.c.bf16 %v5873_v52, %v5872_v54  ;;  %5590 = vmatpush3.bf16.msra.mxu0 %v5587_v45  ;;  %5238 = vmatprep.mubr.msk.f32.mxu0 %vm1376_vm7, %v1454_v55  ;;  %v1464_v63 = vmul.f32 %v5989_v62, %v6372_v21  ;;  %v5607_v45 = vpack.c.bf16 %v1978_v44, %v1977_v43  ;;  %v2081_v52 = vld [vmem:[%s6980_s15 + $0x10] sm:$0xff]  ;;  %v2082_v55 = vld [vmem:[%s6980_s15 + $0x18] sm:$0xff]  ;;  %v4872_v43 = vld [vmem:[%s6981_s16] ss:$0 sm:$0xff] }
 0x625   : > { %5600 = vmatprep.subr.bf16.mxu1 %v5599_v4  ;;  %v5611_v49 = vpack.c.bf16 %v1980_v47, %v1979_v46  ;;  %v5615_v54 = vpack.c.bf16 %v2080_v51, %v2079_v50  ;;  %v5619_v57 = vpack.c.bf16 %v2082_v55, %v2081_v52 }
 0x626   : > { %5246 = vmatmul.mubr.msk.f32.vlgmr.msra.gmra.mrb[6].mxu1 %vm1376_vm7, %v1460_v59  ;;  %5596 = vmatprep.subr.bf16.mxu0 %v5595_v58  ;;  %v2084_v59 = vld [vmem:[%s6980_s15 + $0x28] sm:$0xff] }
 0x627   : > { %5239 = vmatmul.mubr.msk.f32.vlgmr.msra.gmra.mrb[8].mxu0 %vm1376_vm7, %v1456_v60  ;;  %5602 = vmatpush3.bf16.msra.mxu1 %v5599_v4 }
 0x628   : > { %5598 = vmatpush3.bf16.msra.mxu0 %v5595_v58  ;;  %5252 = vmatprep.mubr.msk.f32.mxu0 %vm1376_vm7, %v1462_v48  ;;  %v2083_v58 = vld [vmem:[%s6980_s15 + $0x20] sm:$0xff] }
 0x629   : > { %5604 = vmatprep.subr.bf16.mxu1 %v5603_v7  ;;  %5608 = vmatprep.subr.bf16.mxu0 %v5607_v45  ;;  %v5623_v60 = vpack.c.bf16 %v2084_v59, %v2083_v58 }
 0x62b   : > { %5253 = vmatmul.mubr.msk.f32.vlgmr.msra.gmra.mrb[10].mxu0 %vm1376_vm7, %v1464_v63  ;;  %5606 = vmatpush3.bf16.msra.mxu1 %v5603_v7 }
 0x62c   : > { %5610 = vmatpush3.bf16.msra.mxu0 %v5607_v45  ;;  %5616 = vmatprep.subr.bf16.mxu1 %v5615_v54 }
 0x62d   : > { %5612 = vmatprep.subr.bf16.mxu0 %v5611_v49 }
 0x630   : > { %5614 = vmatpush3.bf16.msra.mxu0 %v5611_v49 }
 0x6f6   : > { %v5233_v8 = vpop.f32.mrb[6].mxu0 }
 0x6f7   : > { %v1543_v9 = vpop.f32.mrb[7].mxu0 }
 0x6f9   : > { %v5247_v10 = vpop.f32.mrb[6].mxu1 }
 0x6fa   : > { %v5240_v11 = vpop.f32.mrb[8].mxu0  ;;  %v1717_v14 = vpop.f32.mrb[7].mxu1 }
 0x6fb   : > { %1817 = vrot.lane.b32.xlu1 %v5240_v11, %s7014_s30  ;;  %v1630_v15 = vpop.f32.mrb[9].mxu0 }
 0x6fc   : > { %1815 = vrot.lane.b32.xlu0 %v1630_v15, %s7014_s30  ;;  %s7054_s30 = smov 64  }
 0x6fe   : > { %v5254_v16 = vpop.f32.mrb[10].mxu0 }
 0x6ff   : > { %1825 = vrot.lane.b32.xlu1 %v5247_v10, %s7012_s0  ;;  %v1804_v17 = vpop.f32.mrb[11].mxu0 }
 0x700   : > { %1823 = vrot.lane.b32.xlu0 %v1717_v14, %s7012_s0  ;;  %s7055_s0 = smov 8  }
 0x703   : > { %1833 = vrot.lane.b32.xlu1 %v5254_v16, %s7010_s3 }
 0x704   : > { %1831 = vrot.lane.b32.xlu0 %v1804_v17, %s7010_s3  ;;  %v2085_v17 = vld [vmem:[%s6980_s15 + $0x30] sm:$0xff]  ;;  %s7052_s3 = smov 104  }
 0x76d   : > { %v1818_v18 = vpop.permute.xlu1 %1817 }
 0x76e   : > { %v1816_v19 = vpop.permute.xlu0 %1815  ;;  %v1838_v24 = vsel %vm1023_vm5, %v5233_v8, %v1818_v18  ;;  %v4868_v8 = vld [vmem:[%s6977_s12] ss:$0 sm:$0xff]  ;;  %v2086_v18 = vld [vmem:[%s6980_s15 + $0x38] sm:$0xff] }
 0x76f   : > { %v1837_v22 = vsel %vm1023_vm5, %v1543_v9, %v1816_v19  ;;  %v5627_v19 = vpack.c.bf16 %v2086_v18, %v2085_v17 }
 0x771   : > { %v1826_v20 = vpop.permute.xlu1 %1825 }
 0x772   : > { %v1824_v21 = vpop.permute.xlu0 %1823  ;;  %v1840_v27 = vsel %vm1376_vm7, %v1838_v24, %v1826_v20  ;;  %v2087_v20 = vld [vmem:[%s6980_s15 + $0x40] sm:$0xff]  ;;  %v2090_v24 = vld [vmem:[%s6980_s15 + $0x58] sm:$0xff] }
 0x773   : > { %v1839_v25 = vsel %vm1376_vm7, %v1837_v22, %v1824_v21  ;;  %v2088_v21 = vld [vmem:[%s6980_s15 + $0x48] sm:$0xff] }
 0x774   : > { %v5631_v22 = vpack.c.bf16 %v2088_v21, %v2087_v20  ;;  %v4876_v20 = vld [vmem:[%s7044_s27 + $0x1] ss:$0 sm:$0xff]  ;;  %s7058_s27 = sld [smem:[#allocation6_spill]] }
 0x775   : > { %v1834_v23 = vpop.permute.xlu1 %1833 }
 0x776   : > { %v1832_v26 = vpop.permute.xlu0 %1831  ;;  %v1843_v29 = vsel %vm1841_vm8, %v1840_v27, %v1834_v23  ;;  %v2089_v23 = vld [vmem:[%s6980_s15 + $0x50] sm:$0xff]  ;;  %v2092_v27 = vld [vmem:[%s6980_s15 + $0x68] sm:$0xff] }
 0x777   : > { %v1842_v28 = vsel %vm1841_vm8, %v1839_v25, %v1832_v26  ;;  %v5635_v25 = vpack.c.bf16 %v2090_v24, %v2089_v23  ;;  %v2091_v26 = vld [vmem:[%s6980_s15 + $0x60] sm:$0xff] }
 0x778   : > { %5263 = vmatprep.mubr.msk.f32.mxu1 %vm864_vm4, %v1842_v28  ;;  %v5639_v28 = vpack.c.bf16 %v2092_v27, %v2091_v26 }
 0x779   : > { %5264 = vmatmul.mubr.msk.f32.vlgmr.msra.gmra.mrb[8].mxu1 %vm864_vm4, %v1843_v29  ;;  %v2093_v29 = vld [vmem:[%s6980_s15 + $0x70] sm:$0xff] }
 0x77a   : > { %5618 = vmatpush3.bf16.msra.mxu1 %v5615_v54 }
 0x77b   : > { %5620 = vmatprep.subr.bf16.mxu1 %v5619_v57 }
 0x77e   : > { %5622 = vmatpush3.bf16.msra.mxu1 %v5619_v57 }
 0x77f   : > { %5624 = vmatprep.subr.bf16.mxu1 %v5623_v60 }
 0x782   : > { %5626 = vmatpush3.bf16.msra.mxu1 %v5623_v60 }
 0x783   : > { %5628 = vmatprep.subr.bf16.mxu1 %v5627_v19 }
 0x786   : > { %5630 = vmatpush3.bf16.msra.mxu1 %v5627_v19 }
 0x787   : > { %5632 = vmatprep.subr.bf16.mxu1 %v5631_v22 }
 0x78a   : > { %5634 = vmatpush3.bf16.msra.mxu1 %v5631_v22 }
 0x78b   : > { %5636 = vmatprep.subr.bf16.mxu1 %v5635_v25 }
 0x78e   : > { %5638 = vmatpush3.bf16.msra.mxu1 %v5635_v25  ;;  %v4887_v25 = vld [vmem:[%s7045_s9 + $0x1] ss:$0 sm:$0xff] }
 0x78f   : > { %5640 = vmatprep.subr.bf16.mxu1 %v5639_v28 }
 0x792   : > { %5642 = vmatpush3.bf16.msra.mxu1 %v5639_v28 }
 0x84c   : > { %v5265_v31 = vpop.f32.mrb[8].mxu1 }
 0x84d   : > { %v1928_v56 = vadd.f32 %v5265_v31, %v4864_v30  ;;  %v1922_v61 = vpop.f32.mrb[9].mxu1 }
 0x84e   : > { %v1923_v32 = vadd.f32 %v4864_v30, %v1922_v61  ;;  %v2094_v30 = vld [vmem:[%s6980_s15 + $0x78] sm:$0xff] }
 0x84f   : > { %v6432_v53 = vadd.f32 %v1928_v56, %v6261_v13  ;;  %v5643_v31 = vpack.c.bf16 %v2094_v30, %v2093_v29  ;;  %v4869_v56 = vld [vmem:[%s6979_s14] ss:$0 sm:$0xff] }
 0x850   : > { %v6435_v33 = vadd.f32 %v1923_v32, %v6259_v12 }
 0x851   : > { %v1938_v3 = vsel %vm864_vm4, %v6432_v53, 0.0  ;;  %5644 = vmatprep.subr.bf16.mxu1 %v5643_v31 }
 0x852   : > { %1939 = vadd.xlane.f32.xlu1 %v1938_v3  ;;  %v1935_v34 = vsel %vm864_vm4, %v6435_v33, 0.0  ;;  %5646 = vmatpush3.bf16.msra.mxu1 %v5643_v31 }
 0x853   : > { %1936 = vadd.xlane.f32.xlu0 %v1935_v34 }
 0x8df   : > { %v1940_v35 = vpop.xlane.xlu1 %1939 }
 0x8e0   : > { %v1942_v36 = vmul.f32 0.03125, %v1940_v35  ;;  %v1937_v37 = vpop.xlane.xlu0 %1936 }
 0x8e1   : > { %v1941_v38 = vmul.f32 0.03125, %v1937_v37 }
 0x8e2   : > { %v1944_v39 = vsub.f32 %v6432_v53, %v1942_v36 }
 0x8e3   : > { %v1943_v13 = vsub.f32 %v6435_v33, %v1941_v38 }
 0x8e4   : > { %v1946_v41 = vmul.f32 %v1944_v39, %v1944_v39 }
 0x8e5   : > { %v1945_v40 = vmul.f32 %v1943_v13, %v1943_v13 }
 0x8e6   : > { %v1950_v42 = vsel %vm864_vm4, %v1946_v41, 0.0 }
 0x8e7   : > { %v1947_v12 = vsel %vm864_vm4, %v1945_v40, 0.0 }
 0x8e8   : > { %1948 = vadd.xlane.f32.xlu0 %v1947_v12 }
 0x8ec   : > { %1951 = vadd.xlane.f32.xlu0 %v1950_v42 }
 0x975   : > { %v1949_v62 = vpop.xlane.xlu0 %1948 }
 0x976   : > { %v1953_v48 = vmul.f32 0.03125, %v1949_v62 }
 0x978   : > { %v1955_v63 = vadd.f32 1e-05, %v1953_v48 }
 0x979   : > { %v1952_v1 = vpop.xlane.xlu0 %1951 }
 0x97a   : > { %5990 = vrsqrt.f32 %v1955_v63  ;;  %v1954_v2 = vmul.f32 0.03125, %v1952_v1  ;;  %v4877_v63 = vld [vmem:[%s7042_s8 + $0x20] sm:$0xff]  ;;  %v4878_v1 = vld [vmem:[%s7042_s8 + $0x28] sm:$0xff] }
 0x97c   : > { %v1956_v4 = vadd.f32 1e-05, %v1954_v2  ;;  %v5647_v2 = vpack.c.bf16 %v4878_v1, %v4877_v63 }
 0x97e   : > { %5992 = vrsqrt.f32 %v1956_v4  ;;  %5648 = vmatprep.subr.bf16.mxu0 %v5647_v2  ;;  %v4879_v4 = vld [vmem:[%s7042_s8 + $0x30] sm:$0xff] }
 0x984   : > { %v5991_v5 = vpop.eup %5990 }
 0x985   : > { %v1959_v7 = vmul.f32 %v5991_v5, %v1943_v13  ;;  %v4880_v5 = vld [vmem:[%s7042_s8 + $0x38] sm:$0xff]  ;;  %s7056_s8 = smov 16  }
 0x987   : > { %v1967_v9 = vmul.f32 %v4867_v6, %v1959_v7 }
 0x988   : > { %v5993_v10 = vpop.eup %5992 }
 0x989   : > { %v1960_v11 = vmul.f32 %v5993_v10, %v1944_v39  ;;  %v1975_v14 = vadd.f32 %v4868_v8, %v1967_v9 }
 0x98b   : > { %v1968_v15 = vmul.f32 %v4867_v6, %v1960_v11  ;;  %5274 = vmatprep.mubr.msk.f32.mxu0 %vm864_vm4, %v1975_v14  ;;  %v5651_v6 = vpack.c.bf16 %v4880_v5, %v4879_v4 }
 0x98d   : > { %v1976_v16 = vadd.f32 %v4868_v8, %v1968_v15 }
 0x98f   : > { %5275 = vmatmul.mubr.msk.f32.vlgmr.msra.gmra.mrb[12].mxu0 %vm864_vm4, %v1976_v16  ;;  %v4875_v16 = vld [vmem:[%s7043_s26 + $0x1] ss:$0 sm:$0xff]  ;;  %s7057_s26 = smov 24  }
 0x990   : > { %5650 = vmatpush3.bf16.msra.mxu0 %v5647_v2 }
 0x991   : > { %5652 = vmatprep.subr.bf16.mxu0 %v5651_v6 }
 0x994   : > { %5654 = vmatpush3.bf16.msra.mxu0 %v5651_v6 }
 0xa62   : > { %v5276_v61 = vpop.f32.mrb[12].mxu0 }
 0xa63   : > { %v2066_v32 = vadd.f32 %v5276_v61, %v4869_v56  ;;  %v2060_v3 = vpop.f32.mrb[13].mxu0 }
 0xa64   : > { %v2061_v34 = vadd.f32 %v4869_v56, %v2060_v3 }
 0xa65   : > { %v2072_v35 = vmul.f32 0.70710677, %v2066_v32  ;;  %v2070_v12 = vmul.f32 0.5, %v2066_v32 }
 0xa66   : > { %v2071_v36 = vmul.f32 0.70710677, %v2061_v34  ;;  %v2069_v13 = vmul.f32 0.5, %v2061_v34 }
 0xa67   : > { %5994 = verf.f32 %v2072_v35 }
 0xa68   : > { %5996 = verf.f32 %v2071_v36 }
 0xa71   : > { %v5995_v37 = vpop.eup %5994 }
 0xa72   : > { %v5997_v38 = vpop.eup %5996  ;;  %v2076_v39 = vadd.f32 1.0, %v5995_v37 }
 0xa73   : > { %v2075_v40 = vadd.f32 1.0, %v5997_v38 }
 0xa74   : > { %v2078_v42 = vmul.f32 %v2076_v39, %v2070_v12 }
 0xa75   : > { %v2077_v41 = vmul.f32 %v2075_v40, %v2069_v13 }
 0xa77   : > { %5309 = vmatprep.mubr.f32.mxu1 %v2077_v41 }
 0xa78   : > { %5310 = vmatmul.mubr.f32.vlgmr.msra.gmra.mrb[10].mxu1 %v2078_v42 }
 0xb4b   : > { %v5311_v44 = vpop.f32.mrb[10].mxu1 }
 0xb4c   : > { %v2174_v45 = vadd.f32 %v5311_v44, %v4872_v43  ;;  %v2168_v46 = vpop.f32.mrb[11].mxu1 }
 0xb4d   : > { %v2169_v47 = vadd.f32 %v4872_v43, %v2168_v46 }
 0xb4e   : > { %v6520_v49 = vadd.f32 %v2174_v45, %v6432_v53 }
 0xb4f   : > { %v6523_v50 = vadd.f32 %v2169_v47, %v6435_v33 }
 0xb50   : > { %v2186_v51 = vsel %vm864_vm4, %v6520_v49, 0.0 }
 0xb51   : > { %2187 = vadd.xlane.f32.xlu1 %v2186_v51  ;;  %v2183_v52 = vsel %vm864_vm4, %v6523_v50, 0.0 }
 0xb52   : > { %2184 = vadd.xlane.f32.xlu0 %v2183_v52 }
 0xbde   : > { %v2188_v54 = vpop.xlane.xlu1 %2187 }
 0xbdf   : > { %v2190_v55 = vmul.f32 0.03125, %v2188_v54  ;;  %v2185_v57 = vpop.xlane.xlu0 %2184 }
 0xbe0   : > { %v2189_v58 = vmul.f32 0.03125, %v2185_v57 }
 0xbe1   : > { %v2192_v59 = vsub.f32 %v6520_v49, %v2190_v55 }
 0xbe2   : > { %v2191_v53 = vsub.f32 %v6523_v50, %v2189_v58 }
 0xbe3   : > { %v2194_v60 = vmul.f32 %v2192_v59, %v2192_v59 }
 0xbe4   : > { %v2193_v62 = vmul.f32 %v2191_v53, %v2191_v53 }
 0xbe5   : > { %v2198_v33 = vsel %vm864_vm4, %v2194_v60, 0.0 }
 0xbe6   : > { %2199 = vadd.xlane.f32.xlu1 %v2198_v33  ;;  %v2195_v48 = vsel %vm864_vm4, %v2193_v62, 0.0 }
 0xbe7   : > { %2196 = vadd.xlane.f32.xlu0 %v2195_v48 }
 0xc73   : > { %v2200_v7 = vpop.xlane.xlu1 %2199 }
 0xc74   : > { %v2202_v8 = vmul.f32 0.03125, %v2200_v7  ;;  %v2197_v9 = vpop.xlane.xlu0 %2196 }
 0xc75   : > { %v2201_v10 = vmul.f32 0.03125, %v2197_v9 }
 0xc76   : > { %v2204_v11 = vadd.f32 1e-05, %v2202_v8 }
 0xc77   : > { %v2203_v14 = vadd.f32 1e-05, %v2201_v10 }
 0xc78   : > { %5998 = vrsqrt.f32 %v2204_v11 }
 0xc79   : > { %6000 = vrsqrt.f32 %v2203_v14 }
 0xc82   : > { %v5999_v15 = vpop.eup %5998 }
 0xc83   : > { %v6001_v17 = vpop.eup %6000  ;;  %v2208_v18 = vmul.f32 %v5999_v15, %v2192_v59 }
 0xc84   : > { %v2207_v19 = vmul.f32 %v6001_v17, %v2191_v53 }
 0xc85   : > { %v2216_v21 = vmul.f32 %v4875_v16, %v2208_v18 }
 0xc86   : > { %v2215_v22 = vmul.f32 %v4875_v16, %v2207_v19 }
 0xc87   : > { %v2224_v24 = vadd.f32 %v4876_v20, %v2216_v21 }
 0xc88   : > { %v2223_v23 = vadd.f32 %v4876_v20, %v2215_v22 }
 0xc8a   : > { %5320 = vmatprep.mubr.msk.f32.mxu0 %vm864_vm4, %v2223_v23 }
 0xc8b   : > { %5321 = vmatmul.mubr.msk.f32.vlgmr.msra.gmra.mrb[14].mxu0 %vm864_vm4, %v2224_v24 }
 0xd5e   : > { %v5322_v26 = vpop.f32.mrb[14].mxu0 }
 0xd5f   : > { %v2323_v27 = vadd.f32 %v5322_v26, %v4887_v25  ;;  %v2317_v28 = vpop.f32.mrb[15].mxu0 }
 0xd60   : > { %v2318_v29 = vadd.f32 %v4887_v25, %v2317_v28 }
 0xd61   : > { %2330 = vrot.lane.b32.xlu1 %v2323_v27, %s7050_s4 }
 0xd62   : > { %2328 = vrot.lane.b32.xlu0 %v2318_v29, %s7050_s4  ;;  %5327 = vmatprep.mubr.msk.f32.mxu0 %vm1023_vm5, %v2318_v29  ;;  %v6561_v30 = vpack.i.bf16 %v2323_v27, %v2318_v29 }
 0xd65   : > { %2334 = vrot.lane.b32.xlu1 %v2323_v27, %s7051_s5 }
 0xd66   : > { %2336 = vrot.lane.b32.xlu0 %v2318_v29, %s7052_s3 }
 0xd69   : > { %2332 = vrot.lane.b32.xlu1 %v2318_v29, %s7051_s5 }
 0xd6a   : > { %5875 = vrot.lane.b32.xlu0 %v6561_v30, %s7053_s6 }
 0xd6d   : > { %2338 = vrot.lane.b32.xlu1 %v2323_v27, %s7052_s3 }
 0xdd3   : > { %v2331_v31 = vpop.permute.xlu1 %2330 }
 0xdd4   : > { %v2329_v56 = vpop.permute.xlu0 %2328 }
 0xdd5   : > { %v6567_v61 = vpack.i.bf16 %v2331_v31, %v2329_v56 }
 0xdd7   : > { %v2335_v32 = vpop.permute.xlu1 %2334  ;;  %5880 = vrot.lane.b32.xlu1 %v6567_v61, %s7053_s6 }
 0xdd8   : > { %v2337_v3 = vpop.permute.xlu0 %2336 }
 0xdd9   : > { %5348 = vmatprep.mubr.msk.f32.mxu1 %vm1023_vm5, %v2337_v3 }
 0xddb   : > { %v2333_v34 = vpop.permute.xlu1 %2332 }
 0xddc   : > { %v6572_v35 = vpack.i.bf16 %v2335_v32, %v2333_v34  ;;  %v5876_v36 = vpop.permute.xlu0 %5875 }
 0xddd   : > { %v5878_v37 = vunpack.i.h.bf16 %v5876_v36  ;;  %v5877_v38 = vunpack.i.l.bf16 %v5876_v36 }
 0xdde   : > { %5885 = vrot.lane.b32.xlu0 %v6572_v35, %s7053_s6 }
 0xddf   : > { %v5655_v39 = vpack.c.bf16 %v5878_v37, %v5877_v38  ;;  %v2339_v13 = vpop.permute.xlu1 %2338 }
 0xde0   : > { %v6576_v40 = vpack.i.bf16 %v2339_v13, %v2337_v3 }
 0xde1   : > { %5657 = vmatprep.subr.msk.bf16.mxu0 %vm6316_vm6, %v5655_v39 }
 0xde2   : > { %5890 = vrot.lane.b32.xlu1 %v6576_v40, %s7053_s6  ;;  %5660 = vmatpush3.bf16.xpose.msk.msra.mxu0 %vm6316_vm6, %v5655_v39 }
 0xde9   : > { %5328 = vmatmul.mubr.msk.f32.vlgmr.msra.gmra.mrb[16].mxu0 %vm1023_vm5, %v2323_v27 }
 0xdea   : > { %5334 = vmatprep.mubr.msk.f32.mxu0 %vm1023_vm5, %v2329_v56 }
 0xe49   : > { %v5881_v12 = vpop.permute.xlu1 %5880 }
 0xe4a   : > { %v5883_v41 = vunpack.i.h.bf16 %v5881_v12  ;;  %v5882_v42 = vunpack.i.l.bf16 %v5881_v12 }
 0xe4c   : > { %v5661_v43 = vpack.c.bf16 %v5883_v41, %v5882_v42 }
 0xe4e   : > { %5663 = vmatprep.subr.msk.bf16.mxu0 %vm6316_vm6, %v5661_v43 }
 0xe4f   : > { %5666 = vmatpush3.bf16.xpose.msk.msra.mxu0 %vm6316_vm6, %v5661_v43 }
 0xe50   : > { %v5886_v44 = vpop.permute.xlu0 %5885 }
 0xe51   : > { %v5888_v45 = vunpack.i.h.bf16 %v5886_v44  ;;  %v5887_v46 = vunpack.i.l.bf16 %v5886_v44 }
 0xe53   : > { %v5667_v47 = vpack.c.bf16 %v5888_v45, %v5887_v46 }
 0xe54   : > { %v5891_v51 = vpop.permute.xlu1 %5890 }
 0xe55   : > { %v5893_v52 = vunpack.i.h.bf16 %v5891_v51  ;;  %v5892_v54 = vunpack.i.l.bf16 %v5891_v51  ;;  %5669 = vmatprep.subr.msk.bf16.mxu0 %vm6316_vm6, %v5667_v47 }
 0xe56   : > { %5335 = vmatmul.mubr.msk.f32.vlgmr.msra.gmra.mrb[18].mxu0 %vm1023_vm5, %v2331_v31 }
 0xe57   : > { %v5673_v55 = vpack.c.bf16 %v5893_v52, %v5892_v54  ;;  %5672 = vmatpush3.bf16.xpose.msk.msra.mxu0 %vm6316_vm6, %v5667_v47  ;;  %5341 = vmatprep.mubr.msk.f32.mxu0 %vm1023_vm5, %v2333_v34 }
 0xe59   : > { %5675 = vmatprep.subr.msk.bf16.mxu1 %vm6316_vm6, %v5673_v55 }
 0xe5a   : > { %5678 = vmatpush3.bf16.xpose.msk.msra.mxu1 %vm6316_vm6, %v5673_v55 }
 0xe5e   : > { %5342 = vmatmul.mubr.msk.f32.vlgmr.msra.gmra.mrb[20].mxu0 %vm1023_vm5, %v2335_v32 }
 0xe61   : > { %5349 = vmatmul.mubr.msk.f32.vlgmr.msra.gmra.mrb[12].mxu1 %vm1023_vm5, %v2339_v13 }
 0xebc   : > { %v5329_v57 = vpop.f32.mrb[16].mxu0 }
 0xebd   : > { %v2689_v58 = vmul.f32 0.35355338, %v5329_v57  ;;  %v2418_v59 = vpop.f32.mrb[17].mxu0 }
 0xebe   : > { %v2688_v53 = vmul.f32 0.35355338, %v2418_v59 }
 0xebf   : > { %v2699_v60 = vsel %vm1376_vm7, %v2689_v58, -inf }
 0xec0   : > { %2700 = vmax.xlane.f32.xlu1 %v2699_v60  ;;  %v2696_v62 = vsel %vm1376_vm7, %v2688_v53, -inf }
 0xec1   : > { %2697 = vmax.xlane.f32.xlu0 %v2696_v62 }
 0xf29   : > { %v5336_v33 = vpop.f32.mrb[18].mxu0 }
 0xf2a   : > { %v2691_v48 = vmul.f32 0.35355338, %v5336_v33  ;;  %v2505_v63 = vpop.f32.mrb[19].mxu0 }
 0xf2b   : > { %v2690_v1 = vmul.f32 0.35355338, %v2505_v63 }
 0xf2c   : > { %v2705_v2 = vsel %vm1376_vm7, %v2691_v48, -inf }
 0xf2d   : > { %2706 = vmax.xlane.f32.xlu0 %v2705_v2  ;;  %v2702_v4 = vsel %vm1376_vm7, %v2690_v1, -inf }
 0xf31   : > { %2703 = vmax.xlane.f32.xlu0 %v2702_v4  ;;  %v5343_v5 = vpop.f32.mrb[20].mxu0 }
 0xf32   : > { %v2693_v6 = vmul.f32 0.35355338, %v5343_v5  ;;  %v2592_v7 = vpop.f32.mrb[21].mxu0 }
 0xf33   : > { %v2692_v8 = vmul.f32 0.35355338, %v2592_v7 }
 0xf34   : > { %v5350_v9 = vpop.f32.mrb[12].mxu1  ;;  %v2711_v10 = vsel %vm1376_vm7, %v2693_v6, -inf }
 0xf35   : > { %v2695_v11 = vmul.f32 0.35355338, %v5350_v9  ;;  %v2679_v14 = vpop.f32.mrb[13].mxu1  ;;  %2712 = vmax.xlane.f32.xlu1 %v2711_v10  ;;  %v2708_v15 = vsel %vm1376_vm7, %v2692_v8, -inf }
 0xf36   : > { %v2694_v16 = vmul.f32 0.35355338, %v2679_v14  ;;  %2709 = vmax.xlane.f32.xlu0 %v2708_v15 }
 0xf37   : > { %v2717_v17 = vsel %vm1376_vm7, %v2695_v11, -inf }
 0xf38   : > { %v2714_v18 = vsel %vm1376_vm7, %v2694_v16, -inf }
 0xf39   : > { %2718 = vmax.xlane.f32.xlu1 %v2717_v17 }
 0xf3a   : > { %2715 = vmax.xlane.f32.xlu0 %v2714_v18 }
 0xf4d   : > { %v2701_v19 = vpop.xlane.xlu1 %2700 }
 0xf4e   : > { %v2721_v20 = vsub.f32 %v2689_v58, %v2701_v19  ;;  %v2698_v21 = vpop.xlane.xlu0 %2697 }
 0xf4f   : > { %v2720_v22 = vsub.f32 %v2688_v53, %v2698_v21 }
 0xf50   : > { %v2730_v23 = vmul.f32 1.442695, %v2721_v20 }
 0xf51   : > { %v2728_v24 = vmul.f32 1.442695, %v2720_v22 }
 0xf52   : > { %6002 = vpow2.f32 %v2730_v23 }
 0xf53   : > { %6004 = vpow2.f32 %v2728_v24 }
 0xf5c   : > { %v6610_v25 = vpop.eup %6002 }
 0xf5d   : > { %v6005_v26 = vpop.eup %6004  ;;  %v2747_v27 = vsel %vm1376_vm7, %v6610_v25, 0.0 }
 0xf5e   : > { %2748 = vadd.xlane.f32.xlu1 %v2747_v27  ;;  %v2744_v28 = vsel %vm1376_vm7, %v6005_v26, 0.0 }
 0xf5f   : > { %2745 = vadd.xlane.f32.xlu0 %v2744_v28 }
 0xfba   : > { %v2707_v29 = vpop.xlane.xlu0 %2706 }
 0xfbb   : > { %v2723_v31 = vsub.f32 %v2691_v48, %v2707_v29 }
 0xfbd   : > { %v2734_v56 = vmul.f32 1.442695, %v2723_v31 }
 0xfbe   : > { %v2704_v32 = vpop.xlane.xlu0 %2703 }
 0xfbf   : > { %6006 = vpow2.f32 %v2734_v56  ;;  %v2722_v3 = vsub.f32 %v2690_v1, %v2704_v32 }
 0xfc1   : > { %v2732_v34 = vmul.f32 1.442695, %v2722_v3 }
 0xfc2   : > { %v2713_v36 = vpop.xlane.xlu1 %2712 }
 0xfc3   : > { %6008 = vpow2.f32 %v2732_v34  ;;  %v2710_v37 = vpop.xlane.xlu0 %2709  ;;  %v2725_v38 = vsub.f32 %v2693_v6, %v2713_v36 }
 0xfc4   : > { %v2724_v39 = vsub.f32 %v2692_v8, %v2710_v37 }
 0xfc5   : > { %v2738_v44 = vmul.f32 1.442695, %v2725_v38 }
 0xfc6   : > { %v2719_v13 = vpop.xlane.xlu1 %2718  ;;  %v2736_v46 = vmul.f32 1.442695, %v2724_v39  ;;  %v4882_v39 = vld [vmem:[%s7048_s28 + $0x20] sm:$0xff] }
 0xfc7   : > { %v2727_v12 = vsub.f32 %v2695_v11, %v2719_v13  ;;  %v2716_v41 = vpop.xlane.xlu0 %2715  ;;  %v4883_v13 = vld [vmem:[%s7048_s28 + $0x28] sm:$0xff] }
 0xfc8   : > { %v2726_v42 = vsub.f32 %v2694_v16, %v2716_v41  ;;  %v4884_v41 = vld [vmem:[%s7048_s28 + $0x30] sm:$0xff] }
 0xfc9   : > { %v6615_v43 = vpop.eup %6006  ;;  %v2742_v45 = vmul.f32 1.442695, %v2727_v12  ;;  %v5695_v12 = vpack.c.bf16 %v4883_v13, %v4882_v39 }
 0xfca   : > { %v2740_v47 = vmul.f32 1.442695, %v2726_v42  ;;  %v2753_v51 = vsel %vm1376_vm7, %v6615_v43, 0.0  ;;  %v4885_v42 = vld [vmem:[%s7048_s28 + $0x38] sm:$0xff]  ;;  %s7059_s28 = sld [smem:[#allocation15_spill]] }
 0xfcb   : > { %6010 = vpow2.f32 %v2742_v45  ;;  %2754 = vadd.xlane.f32.xlu1 %v2753_v51 }
 0xfcc   : > { %6012 = vpow2.f32 %v2740_v47 }
 0xfcd   : > { %v6619_v52 = vpop.eup %6008  ;;  %6014 = vpow2.f32 %v2738_v44 }
 0xfce   : > { %6016 = vpow2.f32 %v2736_v46  ;;  %v2750_v54 = vsel %vm1376_vm7, %v6619_v52, 0.0 }
 0xfcf   : > { %2751 = vadd.xlane.f32.xlu0 %v2750_v54 }
 0xfd5   : > { %v6623_v55 = vpop.eup %6010 }
 0xfd6   : > { %v6625_v57 = vpop.eup %6012  ;;  %v2765_v58 = vsel %vm1376_vm7, %v6623_v55, 0.0 }
 0xfd7   : > { %v6015_v59 = vpop.eup %6014  ;;  %2766 = vadd.xlane.f32.xlu1 %v2765_v58  ;;  %v2762_v53 = vsel %vm1376_vm7, %v6625_v57, 0.0 }
 0xfd8   : > { %v6017_v60 = vpop.eup %6016  ;;  %2763 = vadd.xlane.f32.xlu0 %v2762_v53  ;;  %v2759_v62 = vsel %vm1376_vm7, %v6015_v59, 0.0 }
 0xfd9   : > { %v2756_v33 = vsel %vm1376_vm7, %v6017_v60, 0.0 }
 0xfdb   : > { %2760 = vadd.xlane.f32.xlu1 %v2759_v62 }
 0xfdc   : > { %2757 = vadd.xlane.f32.xlu0 %v2756_v33 }
 0xfeb   : > { %v2749_v2 = vpop.xlane.xlu1 %2748 }
 0xfec   : > { %5900 = vrot.lane.b32.xlu1 %v6567_v61, %s7054_s30  ;;  %v2746_v48 = vpop.xlane.xlu0 %2745 }
 0xfed   : > { %6018 = vrcp.f32 %v2746_v48 }
 0xfee   : > { %6020 = vrcp.f32 %v2749_v2 }
 0xff0   : > { %5905 = vrot.lane.b32.xlu1 %v6572_v35, %s7054_s30 }
 0xff2   : > { %5895 = vrot.lane.b32.xlu0 %v6561_v30, %s7054_s30 }
 0xff4   : > { %5910 = vrot.lane.b32.xlu1 %v6576_v40, %s7054_s30 }
 0xff7   : > { %v6019_v63 = vpop.eup %6018 }
 0xff8   : > { %v2769_v1 = vmul.f32 %v6019_v63, %v6005_v26  ;;  %v6021_v16 = vpop.eup %6020 }
 0xff9   : > { %v2771_v24 = vmul.f32 %v6021_v16, %v6610_v25 }
 0xffa   : > { %5355 = vmatprep.mubr.msk.f32.mxu0 %vm1376_vm7, %v2769_v1 }
0x1058   : > { %v2755_v4 = vpop.xlane.xlu1 %2754 }
0x105c   : > { %v2752_v5 = vpop.xlane.xlu0 %2751 }
0x105d   : > { %6022 = vrcp.f32 %v2752_v5  ;;  %v4914_v5 = vld [vmem:[%s7049_s10 + $0x1] ss:$0 sm:$0xff] }
0x1064   : > { %v2767_v6 = vpop.xlane.xlu1 %2766 }
0x1065   : > { %v2764_v61 = vpop.xlane.xlu0 %2763 }
0x1067   : > { %v6023_v19 = vpop.eup %6022 }
0x1068   : > { %v2761_v7 = vpop.xlane.xlu1 %2760  ;;  %v2773_v31 = vmul.f32 %v6023_v19, %v6619_v52 }
0x1069   : > { %6024 = vrcp.f32 %v2761_v7  ;;  %v2758_v35 = vpop.xlane.xlu0 %2757 }
0x106a   : > { %6026 = vrcp.f32 %v2758_v35 }
0x106b   : > { %6028 = vrcp.f32 %v2755_v4 }
0x106c   : > { %6030 = vrcp.f32 %v2764_v61  ;;  %v5901_v30 = vpop.permute.xlu1 %5900 }
0x106d   : > { %v5896_v8 = vpop.permute.xlu0 %5895  ;;  %v5903_v40 = vunpack.i.h.bf16 %v5901_v30  ;;  %v5902_v9 = vunpack.i.l.bf16 %v5901_v30  ;;  %6032 = vrcp.f32 %v2767_v6 }
0x106e   : > { %v5898_v10 = vunpack.i.h.bf16 %v5896_v8  ;;  %v5897_v11 = vunpack.i.l.bf16 %v5896_v8 }
0x106f   : > { %v5683_v20 = vpack.c.bf16 %v5903_v40, %v5902_v9 }
0x1070   : > { %v5679_v14 = vpack.c.bf16 %v5898_v10, %v5897_v11  ;;  %v5906_v15 = vpop.permute.xlu1 %5905 }
0x1071   : > { %v5908_v17 = vunpack.i.h.bf16 %v5906_v15  ;;  %v5907_v18 = vunpack.i.l.bf16 %v5906_v15 }
0x1072   : > { %5680 = vmatprep.subr.bf16.mxu0 %v5679_v14 }
0x1073   : > { %v6025_v21 = vpop.eup %6024  ;;  %v5687_v22 = vpack.c.bf16 %v5908_v17, %v5907_v18  ;;  %5682 = vmatpush3.bf16.msra.mxu0 %v5679_v14 }
0x1074   : > { %v6027_v23 = vpop.eup %6026  ;;  %v5911_v26 = vpop.permute.xlu1 %5910  ;;  %5684 = vmatprep.subr.bf16.mxu0 %v5683_v20  ;;  %v2779_v3 = vmul.f32 %v6025_v21, %v6015_v59  ;;  %v4922_v21 = vld [vmem:[%s6978_s13 + $0x28] sm:$0xff] }
0x1075   : > { %v6029_v27 = vpop.eup %6028  ;;  %v5913_v28 = vunpack.i.h.bf16 %v5911_v26  ;;  %v5912_v29 = vunpack.i.l.bf16 %v5911_v26  ;;  %5688 = vmatprep.subr.bf16.mxu1 %v5687_v22  ;;  %v2777_v56 = vmul.f32 %v6027_v23, %v6017_v60  ;;  %v4923_v23 = vld [vmem:[%s6978_s13 + $0x30] sm:$0xff] }
0x1076   : > { %v6031_v32 = vpop.eup %6030  ;;  %5356 = vmatmul.mubr.msk.f32.vlgmr.msra.gmra.mrb[22].mxu0 %vm1376_vm7, %v2771_v24  ;;  %5690 = vmatpush3.bf16.msra.mxu1 %v5687_v22  ;;  %v2775_v25 = vmul.f32 %v6029_v27, %v6615_v43  ;;  %v5699_v43 = vpack.c.bf16 %v4885_v42, %v4884_v41  ;;  %v4924_v24 = vld [vmem:[%s6978_s13 + $0x38] sm:$0xff]  ;;  %v4929_v27 = vld [vmem:[%s6980_s15 + $0x80] sm:$0xff] }
0x1077   : > { %v5691_v34 = vpack.c.bf16 %v5913_v28, %v5912_v29  ;;  %5686 = vmatpush3.bf16.msra.mxu0 %v5683_v20  ;;  %5362 = vmatprep.mubr.msk.f32.mxu0 %vm1376_vm7, %v2773_v31  ;;  %v6033_v36 = vpop.eup %6032  ;;  %v2781_v37 = vmul.f32 %v6031_v32, %v6625_v57  ;;  %v4921_v20 = vld [vmem:[%s6978_s13 + $0x20] sm:$0xff]  ;;  %v5707_v26 = vpack.c.bf16 %v4924_v24, %v4923_v23  ;;  %v4930_v28 = vld [vmem:[%s6980_s15 + $0x88] sm:$0xff]  ;;  %v4931_v29 = vld [vmem:[%s6980_s15 + $0x90] sm:$0xff] }
0x1078   : > { %5369 = vmatprep.mubr.msk.f32.mxu1 %vm1376_vm7, %v2777_v56  ;;  %v2783_v38 = vmul.f32 %v6033_v36, %v6623_v55  ;;  %5696 = vmatprep.subr.bf16.mxu1 %v5695_v12  ;;  %v5703_v22 = vpack.c.bf16 %v4922_v21, %v4921_v20  ;;  %v5711_v31 = vpack.c.bf16 %v4930_v28, %v4929_v27  ;;  %v4932_v56 = vld [vmem:[%s6980_s15 + $0x98] sm:$0xff]  ;;  %v4919_v42 = vld [vmem:[%s6976_s11 + $0x1] ss:$0 sm:$0xff]  ;;  %v3505_v23 = vld [vmem:[%s6982_s17 + $0x10] sm:$0xff] }
0x1079   : > { %5370 = vmatmul.mubr.msk.f32.vlgmr.msra.gmra.mrb[14].mxu1 %vm1376_vm7, %v2779_v3  ;;  %5692 = vmatprep.subr.bf16.mxu0 %v5691_v34  ;;  %v5715_v32 = vpack.c.bf16 %v4932_v56, %v4931_v29  ;;  %v4933_v3 = vld [vmem:[%s6980_s15 + $0xa0] sm:$0xff]  ;;  %v3506_v24 = vld [vmem:[%s6982_s17 + $0x18] sm:$0xff] }
0x107a   : > { %5363 = vmatmul.mubr.msk.f32.vlgmr.msra.gmra.mrb[24].mxu0 %vm1376_vm7, %v2775_v25  ;;  %5698 = vmatpush3.bf16.msra.mxu1 %v5695_v12  ;;  %v4946_v27 = vld [vmem:[%s6981_s16 + $0x1] ss:$0 sm:$0xff] }
0x107b   : > { %5694 = vmatpush3.bf16.msra.mxu0 %v5691_v34  ;;  %5376 = vmatprep.mubr.msk.f32.mxu0 %vm1376_vm7, %v2781_v37  ;;  %v4934_v34 = vld [vmem:[%s6980_s15 + $0xa8] sm:$0xff] }
0x107c   : > { %5700 = vmatprep.subr.bf16.mxu1 %v5699_v43  ;;  %5704 = vmatprep.subr.bf16.mxu0 %v5703_v22  ;;  %v5719_v25 = vpack.c.bf16 %v4934_v34, %v4933_v3  ;;  %v4947_v34 = vld [vmem:[%s6983_s18] ss:$0 sm:$0xff] }
0x107e   : > { %5377 = vmatmul.mubr.msk.f32.vlgmr.msra.gmra.mrb[26].mxu0 %vm1376_vm7, %v2783_v38  ;;  %5702 = vmatpush3.bf16.msra.mxu1 %v5699_v43 }
0x107f   : > { %5706 = vmatpush3.bf16.msra.mxu0 %v5703_v22  ;;  %5712 = vmatprep.subr.bf16.mxu1 %v5711_v31 }
0x1080   : > { %5708 = vmatprep.subr.bf16.mxu0 %v5707_v26 }
0x1083   : > { %5710 = vmatpush3.bf16.msra.mxu0 %v5707_v26  ;;  %v5747_v26 = vpack.c.bf16 %v3506_v24, %v3505_v23 }
0x1149   : > { %v5357_v44 = vpop.f32.mrb[22].mxu0 }
0x114a   : > { %v2862_v45 = vpop.f32.mrb[23].mxu0 }
0x114c   : > { %v5371_v46 = vpop.f32.mrb[14].mxu1 }
0x114d   : > { %v5364_v47 = vpop.f32.mrb[24].mxu0  ;;  %v3036_v51 = vpop.f32.mrb[15].mxu1 }
0x114e   : > { %3136 = vrot.lane.b32.xlu1 %v5364_v47, %s7055_s0  ;;  %v2949_v52 = vpop.f32.mrb[25].mxu0 }
0x114f   : > { %3134 = vrot.lane.b32.xlu0 %v2949_v52, %s7055_s0 }
0x1151   : > { %v5378_v54 = vpop.f32.mrb[26].mxu0 }
0x1152   : > { %3144 = vrot.lane.b32.xlu1 %v5371_v46, %s7056_s8  ;;  %v3123_v55 = vpop.f32.mrb[27].mxu0 }
0x1153   : > { %3142 = vrot.lane.b32.xlu0 %v3036_v51, %s7056_s8 }
0x1156   : > { %3152 = vrot.lane.b32.xlu1 %v5378_v54, %s7057_s26 }
0x1157   : > { %3150 = vrot.lane.b32.xlu0 %v3123_v55, %s7057_s26  ;;  %v4935_v55 = vld [vmem:[%s6980_s15 + $0xb0] sm:$0xff] }
0x11c0   : > { %v3137_v57 = vpop.permute.xlu1 %3136 }
0x11c1   : > { %v3135_v58 = vpop.permute.xlu0 %3134  ;;  %v3157_v33 = vsel %vm1023_vm5, %v5357_v44, %v3137_v57  ;;  %v4920_v44 = vld [vmem:[%s6977_s12 + $0x1] ss:$0 sm:$0xff]  ;;  %v4936_v57 = vld [vmem:[%s6980_s15 + $0xb8] sm:$0xff] }
0x11c2   : > { %v3156_v60 = vsel %vm1023_vm5, %v2862_v45, %v3135_v58  ;;  %v5723_v58 = vpack.c.bf16 %v4936_v57, %v4935_v55 }
0x11c4   : > { %v3145_v59 = vpop.permute.xlu1 %3144 }
0x11c5   : > { %v3143_v53 = vpop.permute.xlu0 %3142  ;;  %v3159_v1 = vsel %vm1376_vm7, %v3157_v33, %v3145_v59  ;;  %v4937_v59 = vld [vmem:[%s6980_s15 + $0xc0] sm:$0xff]  ;;  %v4940_v33 = vld [vmem:[%s6980_s15 + $0xd8] sm:$0xff] }
0x11c6   : > { %v3158_v48 = vsel %vm1376_vm7, %v3156_v60, %v3143_v53  ;;  %v4938_v53 = vld [vmem:[%s6980_s15 + $0xc8] sm:$0xff] }
0x11c7   : > { %v5727_v60 = vpack.c.bf16 %v4938_v53, %v4937_v59 }
0x11c8   : > { %v3153_v62 = vpop.permute.xlu1 %3152 }
0x11c9   : > { %v3151_v63 = vpop.permute.xlu0 %3150  ;;  %v3161_v4 = vsel %vm1841_vm8, %v3159_v1, %v3153_v62  ;;  %v4939_v62 = vld [vmem:[%s6980_s15 + $0xd0] sm:$0xff]  ;;  %v4942_v1 = vld [vmem:[%s6980_s15 + $0xe8] sm:$0xff] }
0x11ca   : > { %v3160_v2 = vsel %vm1841_vm8, %v3158_v48, %v3151_v63  ;;  %v5731_v48 = vpack.c.bf16 %v4940_v33, %v4939_v62  ;;  %v4941_v63 = vld [vmem:[%s6980_s15 + $0xe0] sm:$0xff] }
0x11cb   : > { %5387 = vmatprep.mubr.msk.f32.mxu1 %vm864_vm4, %v3160_v2  ;;  %v5735_v2 = vpack.c.bf16 %v4942_v1, %v4941_v63 }
0x11cc   : > { %5388 = vmatmul.mubr.msk.f32.vlgmr.msra.gmra.mrb[16].mxu1 %vm864_vm4, %v3161_v4  ;;  %v4943_v4 = vld [vmem:[%s6980_s15 + $0xf0] sm:$0xff] }
0x11cd   : > { %5714 = vmatpush3.bf16.msra.mxu1 %v5711_v31 }
0x11ce   : > { %5716 = vmatprep.subr.bf16.mxu1 %v5715_v32 }
0x11d1   : > { %5718 = vmatpush3.bf16.msra.mxu1 %v5715_v32 }
0x11d2   : > { %5720 = vmatprep.subr.bf16.mxu1 %v5719_v25 }
0x11d5   : > { %5722 = vmatpush3.bf16.msra.mxu1 %v5719_v25 }
0x11d6   : > { %5724 = vmatprep.subr.bf16.mxu1 %v5723_v58 }
0x11d9   : > { %5726 = vmatpush3.bf16.msra.mxu1 %v5723_v58 }
0x11da   : > { %5728 = vmatprep.subr.bf16.mxu1 %v5727_v60 }
0x11dd   : > { %5730 = vmatpush3.bf16.msra.mxu1 %v5727_v60 }
0x11de   : > { %5732 = vmatprep.subr.bf16.mxu1 %v5731_v48 }
0x11e1   : > { %5734 = vmatpush3.bf16.msra.mxu1 %v5731_v48 }
0x11e2   : > { %5736 = vmatprep.subr.bf16.mxu1 %v5735_v2 }
0x11e5   : > { %5738 = vmatpush3.bf16.msra.mxu1 %v5735_v2 }
0x129f   : > { %v5389_v6 = vpop.f32.mrb[16].mxu1 }
0x12a0   : > { %v3246_v61 = vadd.f32 %v5389_v6, %v4914_v5  ;;  %v3240_v7 = vpop.f32.mrb[17].mxu1 }
0x12a1   : > { %v3241_v35 = vadd.f32 %v4914_v5, %v3240_v7  ;;  %v4944_v5 = vld [vmem:[%s6980_s15 + $0xf8] sm:$0xff]  ;;  %v3504_v7 = vld [vmem:[%s6982_s17 + $0x8] sm:$0xff] }
0x12a2   : > { %v6684_v30 = vadd.f32 %v3246_v61, %v6520_v49  ;;  %v5739_v6 = vpack.c.bf16 %v4944_v5, %v4943_v4  ;;  %v3503_v61 = vld [vmem:[%s6982_s17] sm:$0xff] }
0x12a3   : > { %v6687_v8 = vadd.f32 %v3241_v35, %v6523_v50  ;;  %v5743_v35 = vpack.c.bf16 %v3504_v7, %v3503_v61 }
0x12a4   : > { %v3258_v40 = vsel %vm864_vm4, %v6684_v30, 0.0  ;;  %5740 = vmatprep.subr.bf16.mxu1 %v5739_v6 }
0x12a5   : > { %3259 = vadd.xlane.f32.xlu1 %v3258_v40  ;;  %v3255_v9 = vsel %vm864_vm4, %v6687_v8, 0.0  ;;  %5742 = vmatpush3.bf16.msra.mxu1 %v5739_v6  ;;  %v4926_v40 = vld [vmem:[%s6979_s14 + $0x1] ss:$0 sm:$0xff] }
0x12a6   : > { %3256 = vadd.xlane.f32.xlu0 %v3255_v9  ;;  %5744 = vmatprep.subr.bf16.mxu0 %v5743_v35 }
0x1332   : > { %v3260_v10 = vpop.xlane.xlu1 %3259 }
0x1333   : > { %v3262_v11 = vmul.f32 0.03125, %v3260_v10  ;;  %v3257_v14 = vpop.xlane.xlu0 %3256 }
0x1334   : > { %v3261_v15 = vmul.f32 0.03125, %v3257_v14 }
0x1335   : > { %v3264_v16 = vsub.f32 %v6684_v30, %v3262_v11 }
0x1336   : > { %v3263_v49 = vsub.f32 %v6687_v8, %v3261_v15 }
0x1337   : > { %v3266_v18 = vmul.f32 %v3264_v16, %v3264_v16 }
0x1338   : > { %v3265_v17 = vmul.f32 %v3263_v49, %v3263_v49 }
0x1339   : > { %v3270_v19 = vsel %vm864_vm4, %v3266_v18, 0.0 }
0x133a   : > { %v3267_v50 = vsel %vm864_vm4, %v3265_v17, 0.0 }
0x133b   : > { %3268 = vadd.xlane.f32.xlu0 %v3267_v50 }
0x133f   : > { %3271 = vadd.xlane.f32.xlu0 %v3270_v19 }
0x13c8   : > { %v3269_v36 = vpop.xlane.xlu0 %3268 }
0x13c9   : > { %v3273_v37 = vmul.f32 0.03125, %v3269_v36 }
0x13cb   : > { %v3275_v38 = vadd.f32 1e-05, %v3273_v37 }
0x13cc   : > { %v3272_v39 = vpop.xlane.xlu0 %3271 }
0x13cd   : > { %6034 = vrsqrt.f32 %v3275_v38  ;;  %v3274_v13 = vmul.f32 0.03125, %v3272_v39 }
0x13cf   : > { %v3276_v12 = vadd.f32 1e-05, %v3274_v13 }
0x13d1   : > { %6036 = vrsqrt.f32 %v3276_v12 }
0x13d7   : > { %v6035_v41 = vpop.eup %6034 }
0x13d8   : > { %v3279_v43 = vmul.f32 %v6035_v41, %v3263_v49 }
0x13da   : > { %v3287_v45 = vmul.f32 %v4919_v42, %v3279_v43 }
0x13db   : > { %v6037_v46 = vpop.eup %6036 }
0x13dc   : > { %v3280_v47 = vmul.f32 %v6037_v46, %v3264_v16  ;;  %v3295_v51 = vadd.f32 %v4920_v44, %v3287_v45 }
0x13de   : > { %v3288_v52 = vmul.f32 %v4919_v42, %v3280_v47  ;;  %5398 = vmatprep.mubr.msk.f32.mxu0 %vm864_vm4, %v3295_v51 }
0x13e0   : > { %v3296_v54 = vadd.f32 %v4920_v44, %v3288_v52 }
0x13e2   : > { %5399 = vmatmul.mubr.msk.f32.vlgmr.msra.gmra.mrb[28].mxu0 %vm864_vm4, %v3296_v54 }
0x13e3   : > { %5746 = vmatpush3.bf16.msra.mxu0 %v5743_v35 }
0x13e4   : > { %5748 = vmatprep.subr.bf16.mxu0 %v5747_v26 }
0x13e7   : > { %5750 = vmatpush3.bf16.msra.mxu0 %v5747_v26 }
0x14b5   : > { %v5400_v9 = vpop.f32.mrb[28].mxu0 }
0x14b6   : > { %v3388_v10 = vadd.f32 %v5400_v9, %v4926_v40  ;;  %v3382_v11 = vpop.f32.mrb[29].mxu0 }
0x14b7   : > { %v3383_v14 = vadd.f32 %v4926_v40, %v3382_v11 }
0x14b8   : > { %v3394_v15 = vmul.f32 0.70710677, %v3388_v10  ;;  %v3392_v20 = vmul.f32 0.5, %v3388_v10 }
0x14b9   : > { %v3393_v16 = vmul.f32 0.70710677, %v3383_v14  ;;  %v3391_v18 = vmul.f32 0.5, %v3383_v14 }
0x14ba   : > { %6038 = verf.f32 %v3394_v15 }
0x14bb   : > { %6040 = verf.f32 %v3393_v16 }
0x14c4   : > { %v6039_v49 = vpop.eup %6038 }
0x14c5   : > { %v6041_v17 = vpop.eup %6040  ;;  %v3398_v50 = vadd.f32 1.0, %v6039_v49 }
0x14c6   : > { %v3397_v19 = vadd.f32 1.0, %v6041_v17 }
0x14c7   : > { %v3400_v22 = vmul.f32 %v3398_v50, %v3392_v20 }
0x14c8   : > { %v3399_v21 = vmul.f32 %v3397_v19, %v3391_v18 }
0x14ca   : > { %5433 = vmatprep.mubr.f32.mxu1 %v3399_v21 }
0x14cb   : > { %5434 = vmatmul.mubr.f32.vlgmr.msra.gmra.mrb[18].mxu1 %v3400_v22 }
0x159e   : > { %v5435_v28 = vpop.f32.mrb[18].mxu1 }
0x159f   : > { %v3498_v29 = vadd.f32 %v5435_v28, %v4946_v27  ;;  %v3492_v31 = vpop.f32.mrb[19].mxu1 }
0x15a0   : > { %v3493_v56 = vadd.f32 %v4946_v27, %v3492_v31 }
0x15a1   : > { %v3502_v3 = vadd.f32 %v3498_v29, %v6684_v30 }
0x15a2   : > { %v3501_v32 = vadd.f32 %v3493_v56, %v6687_v8 }
0x15a4   : > { %5444 = vmatprep.mubr.msk.f32.mxu0 %vm864_vm4, %v3501_v32 }
0x15a5   : > { %5445 = vmatmul.mubr.msk.f32.vlgmr.msra.gmra.mrb[30].mxu0 %vm864_vm4, %v3502_v3 }
0x1678   : > { %v5446_v25 = vpop.f32.mrb[30].mxu0 }
0x1679   : > { %v3597_v36 = vadd.f32 %v5446_v25, %v4947_v34  ;;  %v3591_v37 = vpop.f32.mrb[31].mxu0 }
0x167a   : > { %v3592_v38 = vadd.f32 %v4947_v34, %v3591_v37 }
0x167b   : > { %3604 = vrot.lane.b32.xlu1 %v3597_v36, %s7050_s4 }
0x167c   : > { %3602 = vrot.lane.b32.xlu0 %v3592_v38, %s7050_s4  ;;  %5451 = vmatprep.mubr.msk.f32.mxu0 %vm1023_vm5, %v3592_v38  ;;  %v6795_v30 = vpack.i.bf16 %v3597_v36, %v3592_v38  ;;  %s7060_s4 = sld [smem:[#allocation3_spill]] }
0x167f   : > { %3608 = vrot.lane.b32.xlu1 %v3597_v36, %s7051_s5 }
0x1680   : > { %3610 = vrot.lane.b32.xlu0 %v3592_v38, %s7052_s3 }
0x1683   : > { %3606 = vrot.lane.b32.xlu1 %v3592_v38, %s7051_s5 }
0x1684   : > { %5915 = vrot.lane.b32.xlu0 %v6795_v30, %s7053_s6 }
0x1687   : > { %3612 = vrot.lane.b32.xlu1 %v3597_v36, %s7052_s3 }
0x16ed   : > { %v3605_v8 = vpop.permute.xlu1 %3604 }
0x16ee   : > { %v3603_v39 = vpop.permute.xlu0 %3602 }
0x16ef   : > { %v6801_v13 = vpack.i.bf16 %v3605_v8, %v3603_v39 }
0x16f1   : > { %v3609_v12 = vpop.permute.xlu1 %3608  ;;  %5920 = vrot.lane.b32.xlu1 %v6801_v13, %s7053_s6 }
0x16f2   : > { %v3611_v41 = vpop.permute.xlu0 %3610 }
0x16f3   : > { %5472 = vmatprep.mubr.msk.f32.mxu1 %vm1023_vm5, %v3611_v41 }
0x16f5   : > { %v3607_v42 = vpop.permute.xlu1 %3606 }
0x16f6   : > { %v6806_v43 = vpack.i.bf16 %v3609_v12, %v3607_v42  ;;  %v5916_v44 = vpop.permute.xlu0 %5915 }
0x16f7   : > { %v5918_v45 = vunpack.i.h.bf16 %v5916_v44  ;;  %v5917_v46 = vunpack.i.l.bf16 %v5916_v44 }
0x16f8   : > { %5925 = vrot.lane.b32.xlu0 %v6806_v43, %s7053_s6 }
0x16f9   : > { %v5751_v47 = vpack.c.bf16 %v5918_v45, %v5917_v46  ;;  %v3613_v51 = vpop.permute.xlu1 %3612 }
0x16fa   : > { %v6810_v52 = vpack.i.bf16 %v3613_v51, %v3611_v41 }
0x16fb   : > { %5753 = vmatprep.subr.msk.bf16.mxu0 %vm6316_vm6, %v5751_v47 }
0x16fc   : > { %5930 = vrot.lane.b32.xlu1 %v6810_v52, %s7053_s6  ;;  %5756 = vmatpush3.bf16.xpose.msk.msra.mxu0 %vm6316_vm6, %v5751_v47  ;;  %s7061_s6 = sld [smem:[#allocation16_spill]] }
0x1703   : > { %5452 = vmatmul.mubr.msk.f32.vlgmr.msra.gmra.mrb[32].mxu0 %vm1023_vm5, %v3597_v36 }
0x1704   : > { %5458 = vmatprep.mubr.msk.f32.mxu0 %vm1023_vm5, %v3603_v39 }
0x1763   : > { %v5921_v54 = vpop.permute.xlu1 %5920 }
0x1764   : > { %v5923_v55 = vunpack.i.h.bf16 %v5921_v54  ;;  %v5922_v57 = vunpack.i.l.bf16 %v5921_v54 }
0x1766   : > { %v5757_v58 = vpack.c.bf16 %v5923_v55, %v5922_v57 }
0x1768   : > { %5759 = vmatprep.subr.msk.bf16.mxu0 %vm6316_vm6, %v5757_v58 }
0x1769   : > { %5762 = vmatpush3.bf16.xpose.msk.msra.mxu0 %vm6316_vm6, %v5757_v58 }
0x176a   : > { %v5926_v59 = vpop.permute.xlu0 %5925 }
0x176b   : > { %v5928_v53 = vunpack.i.h.bf16 %v5926_v59  ;;  %v5927_v60 = vunpack.i.l.bf16 %v5926_v59 }
0x176d   : > { %v5763_v62 = vpack.c.bf16 %v5928_v53, %v5927_v60 }
0x176e   : > { %v5931_v33 = vpop.permute.xlu1 %5930 }
0x176f   : > { %v5933_v48 = vunpack.i.h.bf16 %v5931_v33  ;;  %v5932_v63 = vunpack.i.l.bf16 %v5931_v33  ;;  %5765 = vmatprep.subr.msk.bf16.mxu0 %vm6316_vm6, %v5763_v62 }
0x1770   : > { %5459 = vmatmul.mubr.msk.f32.vlgmr.msra.gmra.mrb[34].mxu0 %vm1023_vm5, %v3605_v8 }
0x1771   : > { %v5769_v1 = vpack.c.bf16 %v5933_v48, %v5932_v63  ;;  %5768 = vmatpush3.bf16.xpose.msk.msra.mxu0 %vm6316_vm6, %v5763_v62  ;;  %5465 = vmatprep.mubr.msk.f32.mxu0 %vm1023_vm5, %v3607_v42 }
0x1773   : > { %5771 = vmatprep.subr.msk.bf16.mxu1 %vm6316_vm6, %v5769_v1 }
0x1774   : > { %5774 = vmatpush3.bf16.xpose.msk.msra.mxu1 %vm6316_vm6, %v5769_v1 }
0x1778   : > { %5466 = vmatmul.mubr.msk.f32.vlgmr.msra.gmra.mrb[36].mxu0 %vm1023_vm5, %v3609_v12 }
0x177b   : > { %5473 = vmatmul.mubr.msk.f32.vlgmr.msra.gmra.mrb[20].mxu1 %vm1023_vm5, %v3613_v51 }
0x17d6   : > { %v5453_v2 = vpop.f32.mrb[32].mxu0 }
0x17d7   : > { %v3963_v4 = vmul.f32 0.35355338, %v5453_v2  ;;  %v3692_v5 = vpop.f32.mrb[33].mxu0 }
0x17d8   : > { %v3962_v6 = vmul.f32 0.35355338, %v3692_v5 }
0x17d9   : > { %v3973_v61 = vsel %vm1376_vm7, %v3963_v4, -inf }
0x17da   : > { %3974 = vmax.xlane.f32.xlu1 %v3973_v61  ;;  %v3970_v7 = vsel %vm1376_vm7, %v3962_v6, -inf }
0x17db   : > { %3971 = vmax.xlane.f32.xlu0 %v3970_v7 }
0x1843   : > { %v5460_v35 = vpop.f32.mrb[34].mxu0 }
0x1844   : > { %v3965_v40 = vmul.f32 0.35355338, %v5460_v35  ;;  %v3779_v9 = vpop.f32.mrb[35].mxu0 }
0x1845   : > { %v3964_v10 = vmul.f32 0.35355338, %v3779_v9 }
0x1846   : > { %v3979_v0 = vsel %vm1376_vm7, %v3965_v40, -inf }
0x1847   : > { %3980 = vmax.xlane.f32.xlu0 %v3979_v0  ;;  %v3976_v11 = vsel %vm1376_vm7, %v3964_v10, -inf }
0x184b   : > { %3977 = vmax.xlane.f32.xlu0 %v3976_v11  ;;  %v5467_v14 = vpop.f32.mrb[36].mxu0 }
0x184c   : > { %v3967_v15 = vmul.f32 0.35355338, %v5467_v14  ;;  %v3866_v16 = vpop.f32.mrb[37].mxu0 }
0x184d   : > { %v3966_v49 = vmul.f32 0.35355338, %v3866_v16 }
0x184e   : > { %v5474_v17 = vpop.f32.mrb[20].mxu1  ;;  %v3985_v50 = vsel %vm1376_vm7, %v3967_v15, -inf }
0x184f   : > { %v3969_v18 = vmul.f32 0.35355338, %v5474_v17  ;;  %v3953_v19 = vpop.f32.mrb[21].mxu1  ;;  %3986 = vmax.xlane.f32.xlu1 %v3985_v50  ;;  %v3982_v20 = vsel %vm1376_vm7, %v3966_v49, -inf }
0x1850   : > { %v3968_v21 = vmul.f32 0.35355338, %v3953_v19  ;;  %3983 = vmax.xlane.f32.xlu0 %v3982_v20 }
0x1851   : > { %v3991_v22 = vsel %vm1376_vm7, %v3969_v18, -inf }
0x1852   : > { %v3988_v23 = vsel %vm1376_vm7, %v3968_v21, -inf }
0x1853   : > { %3992 = vmax.xlane.f32.xlu1 %v3991_v22 }
0x1854   : > { %3989 = vmax.xlane.f32.xlu0 %v3988_v23 }
0x1867   : > { %v3975_v24 = vpop.xlane.xlu1 %3974 }
0x1868   : > { %v3995_v26 = vsub.f32 %v3963_v4, %v3975_v24  ;;  %v3972_v27 = vpop.xlane.xlu0 %3971 }
0x1869   : > { %v3994_v28 = vsub.f32 %v3962_v6, %v3972_v27 }
0x186a   : > { %v4004_v29 = vmul.f32 1.442695, %v3995_v26 }
0x186b   : > { %v4002_v31 = vmul.f32 1.442695, %v3994_v28 }
0x186c   : > { %6042 = vpow2.f32 %v4004_v29 }
0x186d   : > { %6044 = vpow2.f32 %v4002_v31 }
0x1876   : > { %v6844_v56 = vpop.eup %6042 }
0x1877   : > { %v6045_v32 = vpop.eup %6044  ;;  %v4021_v3 = vsel %vm1376_vm7, %v6844_v56, 0.0 }
0x1878   : > { %4022 = vadd.xlane.f32.xlu1 %v4021_v3  ;;  %v4018_v34 = vsel %vm1376_vm7, %v6045_v32, 0.0 }
0x1879   : > { %4019 = vadd.xlane.f32.xlu0 %v4018_v34 }
0x18d4   : > { %v3981_v25 = vpop.xlane.xlu0 %3980 }
0x18d5   : > { %v3997_v36 = vsub.f32 %v3965_v40, %v3981_v25 }
0x18d7   : > { %v4008_v37 = vmul.f32 1.442695, %v3997_v36 }
0x18d8   : > { %v3978_v38 = vpop.xlane.xlu0 %3977 }
0x18d9   : > { %6046 = vpow2.f32 %v4008_v37  ;;  %v3996_v8 = vsub.f32 %v3964_v10, %v3978_v38 }
0x18db   : > { %v4006_v39 = vmul.f32 1.442695, %v3996_v8 }
0x18dc   : > { %v3987_v12 = vpop.xlane.xlu1 %3986 }
0x18dd   : > { %6048 = vpow2.f32 %v4006_v39  ;;  %v3984_v41 = vpop.xlane.xlu0 %3983  ;;  %v3999_v42 = vsub.f32 %v3967_v15, %v3987_v12  ;;  %v3508_v12 = vld [vmem:[%s6984_s19] sm:$0xff] }
0x18de   : > { %v3998_v44 = vsub.f32 %v3966_v49, %v3984_v41  ;;  %v3509_v41 = vld [vmem:[%s6984_s19 + $0x8] sm:$0xff] }
0x18df   : > { %v4012_v55 = vmul.f32 1.442695, %v3999_v42  ;;  %v5791_v42 = vpack.c.bf16 %v3509_v41, %v3508_v12 }
0x18e0   : > { %v3993_v45 = vpop.xlane.xlu1 %3992  ;;  %v4010_v58 = vmul.f32 1.442695, %v3998_v44  ;;  %v3510_v44 = vld [vmem:[%s6984_s19 + $0x10] sm:$0xff] }
0x18e1   : > { %v4001_v46 = vsub.f32 %v3969_v18, %v3993_v45  ;;  %v3990_v47 = vpop.xlane.xlu0 %3989  ;;  %v3511_v45 = vld [vmem:[%s6984_s19 + $0x18] sm:$0xff] }
0x18e2   : > { %v4000_v51 = vsub.f32 %v3968_v21, %v3990_v47 }
0x18e3   : > { %v6849_v54 = vpop.eup %6046  ;;  %v4016_v57 = vmul.f32 1.442695, %v4001_v46  ;;  %v5795_v46 = vpack.c.bf16 %v3511_v45, %v3510_v44  ;;  %v4760_v45 = vlaneseq }
0x18e4   : > { %v4014_v59 = vmul.f32 1.442695, %v4000_v51  ;;  %v4027_v53 = vsel %vm1376_vm7, %v6849_v54, 0.0 }
0x18e5   : > { %6050 = vpow2.f32 %v4016_v57  ;;  %4028 = vadd.xlane.f32.xlu1 %v4027_v53 }
0x18e6   : > { %6052 = vpow2.f32 %v4014_v59 }
0x18e7   : > { %v6853_v60 = vpop.eup %6048  ;;  %6054 = vpow2.f32 %v4012_v55 }
0x18e8   : > { %6056 = vpow2.f32 %v4010_v58  ;;  %v4024_v62 = vsel %vm1376_vm7, %v6853_v60, 0.0 }
0x18e9   : > { %4025 = vadd.xlane.f32.xlu0 %v4024_v62 }
0x18ef   : > { %v6857_v33 = vpop.eup %6050 }
0x18f0   : > { %v6859_v48 = vpop.eup %6052  ;;  %v4039_v63 = vsel %vm1376_vm7, %v6857_v33, 0.0 }
0x18f1   : > { %v6055_v1 = vpop.eup %6054  ;;  %4040 = vadd.xlane.f32.xlu1 %v4039_v63  ;;  %v4036_v2 = vsel %vm1376_vm7, %v6859_v48, 0.0 }
0x18f2   : > { %v6057_v4 = vpop.eup %6056  ;;  %4037 = vadd.xlane.f32.xlu0 %v4036_v2  ;;  %v4033_v5 = vsel %vm1376_vm7, %v6055_v1, 0.0 }
0x18f3   : > { %v4030_v6 = vsel %vm1376_vm7, %v6057_v4, 0.0 }
0x18f5   : > { %4034 = vadd.xlane.f32.xlu1 %v4033_v5 }
0x18f6   : > { %4031 = vadd.xlane.f32.xlu0 %v4030_v6 }
0x1905   : > { %v4023_v40 = vpop.xlane.xlu1 %4022 }
0x1906   : > { %5940 = vrot.lane.b32.xlu1 %v6801_v13, %s7054_s30  ;;  %v4020_v61 = vpop.xlane.xlu0 %4019 }
0x1907   : > { %6058 = vrcp.f32 %v4020_v61 }
0x1908   : > { %6060 = vrcp.f32 %v4023_v40  ;;  %v6099_v40 = vmov 0.0  }
0x190a   : > { %5945 = vrot.lane.b32.xlu1 %v6806_v43, %s7054_s30 }
0x190c   : > { %5935 = vrot.lane.b32.xlu0 %v6795_v30, %s7054_s30 }
0x190e   : > { %5950 = vrot.lane.b32.xlu1 %v6810_v52, %s7054_s30  ;;  %s760_s30 = scalar_lea.vmem %s7061_s6, %s7060_s4 }
0x1911   : > { %v6059_v7 = vpop.eup %6058 }
0x1912   : > { %v4043_v35 = vmul.f32 %v6059_v7, %v6045_v32  ;;  %v6061_v18 = vpop.eup %6060 }
0x1913   : > { %v4045_v27 = vmul.f32 %v6061_v18, %v6844_v56 }
0x1914   : > { %5479 = vmatprep.mubr.msk.f32.mxu0 %vm1376_vm7, %v4043_v35  ;;  %v6097_v35 = vmov 0.0|0.0  }
0x1972   : > { %v4029_v9 = vpop.xlane.xlu1 %4028 }
0x1976   : > { %v4026_v10 = vpop.xlane.xlu0 %4025 }
0x1977   : > { %6062 = vrcp.f32 %v4026_v10 }
0x197e   : > { %v4041_v0 = vpop.xlane.xlu1 %4040 }
0x197f   : > { %v4038_v13 = vpop.xlane.xlu0 %4037 }
0x1981   : > { %v6063_v21 = vpop.eup %6062 }
0x1982   : > { %v4035_v11 = vpop.xlane.xlu1 %4034  ;;  %v4047_v3 = vmul.f32 %v6063_v21, %v6853_v60 }
0x1983   : > { %6064 = vrcp.f32 %v4035_v11  ;;  %v4032_v43 = vpop.xlane.xlu0 %4031 }
0x1984   : > { %6066 = vrcp.f32 %v4032_v43  ;;  %v4597_v43 = vld [vmem:[%s6986_s21] sm:$0xff] }
0x1985   : > { %6068 = vrcp.f32 %v4029_v9  ;;  %v4974_v9 = vld [vmem:[%s6985_s20] ss:$0 sm:$0xff] }
0x1986   : > { %6070 = vrcp.f32 %v4038_v13  ;;  %v5941_v30 = vpop.permute.xlu1 %5940 }
0x1987   : > { %v5936_v14 = vpop.permute.xlu0 %5935  ;;  %v5943_v52 = vunpack.i.h.bf16 %v5941_v30  ;;  %v5942_v15 = vunpack.i.l.bf16 %v5941_v30  ;;  %6072 = vrcp.f32 %v4041_v0  ;;  %v4598_v30 = vld [vmem:[%s6986_s21 + $0x8] sm:$0xff] }
0x1988   : > { %v5938_v16 = vunpack.i.h.bf16 %v5936_v14  ;;  %v5937_v49 = vunpack.i.l.bf16 %v5936_v14 }
0x1989   : > { %v5779_v22 = vpack.c.bf16 %v5943_v52, %v5942_v15  ;;  %v4523_v52 = vld [vmem:[%s7058_s27] sm:$0x1]  ;;  %v5803_v15 = vpack.c.bf16 %v4598_v30, %v4597_v43 }
0x198a   : > { %v5775_v17 = vpack.c.bf16 %v5938_v16, %v5937_v49  ;;  %v5946_v50 = vpop.permute.xlu1 %5945  ;;  %v4599_v16 = vld [vmem:[%s6986_s21 + $0x10] sm:$0xff]  ;;  %v4600_v49 = vld [vmem:[%s6986_s21 + $0x18] sm:$0xff] }
0x198b   : > { %v5948_v19 = vunpack.i.h.bf16 %v5946_v50  ;;  %v5947_v20 = vunpack.i.l.bf16 %v5946_v50 }
0x198c   : > { %5776 = vmatprep.subr.bf16.mxu0 %v5775_v17 }
0x198d   : > { %v6065_v23 = vpop.eup %6064  ;;  %v5783_v24 = vpack.c.bf16 %v5948_v19, %v5947_v20  ;;  %5778 = vmatpush3.bf16.msra.mxu0 %v5775_v17  ;;  %v5806_v17 = vpack.c.bf16 %v4600_v49, %v4599_v16  ;;  %v4680_v19 = vld [vmem:[%s6988_s23] sm:$0xff]  ;;  %v4681_v20 = vld [vmem:[%s6988_s23 + $0x8] sm:$0xff] }
0x198e   : > { %v6067_v26 = vpop.eup %6066  ;;  %v5951_v28 = vpop.permute.xlu1 %5950  ;;  %5780 = vmatprep.subr.bf16.mxu0 %v5779_v22  ;;  %v4053_v36 = vmul.f32 %v6065_v23, %v6055_v1  ;;  %v5809_v21 = vpack.c.bf16 %v4681_v20, %v4680_v19  ;;  %v4683_v23 = vld [vmem:[%s6988_s23 + $0x18] sm:$0xff] }
0x198f   : > { %v6069_v29 = vpop.eup %6068  ;;  %v5953_v31 = vunpack.i.h.bf16 %v5951_v28  ;;  %v5952_v32 = vunpack.i.l.bf16 %v5951_v28  ;;  %5784 = vmatprep.subr.bf16.mxu1 %v5783_v24  ;;  %v4051_v34 = vmul.f32 %v6067_v26, %v6057_v4  ;;  %v4684_v26 = vld [vmem:[%s6988_s23 + $0x20] sm:$0xff] }
0x1990   : > { %v6071_v25 = vpop.eup %6070  ;;  %5480 = vmatmul.mubr.msk.f32.vlgmr.msra.gmra.mrb[38].mxu0 %vm1376_vm7, %v4045_v27  ;;  %5786 = vmatpush3.bf16.msra.mxu1 %v5783_v24  ;;  %v4049_v56 = vmul.f32 %v6069_v29, %v6849_v54  ;;  %v4601_v27 = vld [vmem:[%s6987_s22] sm:$0x1] }
0x1991   : > { %v5787_v37 = vpack.c.bf16 %v5953_v31, %v5952_v32  ;;  %5782 = vmatpush3.bf16.msra.mxu0 %v5779_v22  ;;  %5486 = vmatprep.mubr.msk.f32.mxu0 %vm1376_vm7, %v4047_v3  ;;  %v6073_v38 = vpop.eup %6072  ;;  %v4055_v8 = vmul.f32 %v6071_v25, %v6859_v48  ;;  %v4682_v22 = vld [vmem:[%s6988_s23 + $0x10] sm:$0xff] }
0x1992   : > { %5493 = vmatprep.mubr.msk.f32.mxu1 %vm1376_vm7, %v4051_v34  ;;  %v4057_v39 = vmul.f32 %v6073_v38, %v6857_v33  ;;  %5792 = vmatprep.subr.bf16.mxu1 %v5791_v42  ;;  %v5812_v24 = vpack.c.bf16 %v4683_v23, %v4682_v22 }
0x1993   : > { %5494 = vmatmul.mubr.msk.f32.vlgmr.msra.gmra.mrb[22].mxu1 %vm1376_vm7, %v4053_v36  ;;  %5788 = vmatprep.subr.bf16.mxu0 %v5787_v37 }
0x1994   : > { %5487 = vmatmul.mubr.msk.f32.vlgmr.msra.gmra.mrb[40].mxu0 %vm1376_vm7, %v4049_v56  ;;  %5794 = vmatpush3.bf16.msra.mxu1 %v5791_v42 }
0x1995   : > { %5790 = vmatpush3.bf16.msra.mxu0 %v5787_v37  ;;  %5500 = vmatprep.mubr.msk.f32.mxu0 %vm1376_vm7, %v4055_v8  ;;  %v4685_v37 = vld [vmem:[%s7059_s28] sm:$0x1] }
0x1996   : > { %5796 = vmatprep.subr.bf16.mxu1 %v5795_v46  ;;  %5799 = vmatprep.subr.bf16.mxu0 %v6097_v35 }
0x1998   : > { %5501 = vmatmul.mubr.msk.f32.vlgmr.msra.gmra.mrb[42].mxu0 %vm1376_vm7, %v4057_v39  ;;  %5798 = vmatpush3.bf16.msra.mxu1 %v5795_v46  ;;  %v4761_v46 = vand.u32 127, %v4760_v45 }
0x1999   : > { %5808 = vmatprep.subr.bf16.mxu1 %v6097_v35  ;;  %5518 = vmatprep.mubr.msk.f32.mxu0 %vm6098_vm9, %v6099_v40 }
0x199a   : > { %vm4762_vm11 = vcmp.ge.s32.totalorder %v4761_v46, 8  ;;  %vm4763_vm12 = vcmp.lt.s32.totalorder %v4761_v46, 16 }
0x199b   : > { %vm4764_vm13 = vmand %vm4762_vm11, %vm4763_vm12 }
0x1a63   : > { %v5481_v47 = vpop.f32.mrb[38].mxu0 }
0x1a64   : > { %v4136_v51 = vpop.f32.mrb[39].mxu0 }
0x1a66   : > { %v5495_v54 = vpop.f32.mrb[22].mxu1 }
0x1a67   : > { %v5488_v55 = vpop.f32.mrb[40].mxu0  ;;  %v4310_v57 = vpop.f32.mrb[23].mxu1 }
0x1a68   : > { %4410 = vrot.lane.b32.xlu1 %v5488_v55, %s7055_s0  ;;  %v4223_v58 = vpop.f32.mrb[41].mxu0 }
0x1a69   : > { %4408 = vrot.lane.b32.xlu0 %v4223_v58, %s7055_s0 }
0x1a6b   : > { %v5502_v59 = vpop.f32.mrb[42].mxu0 }
0x1a6c   : > { %4418 = vrot.lane.b32.xlu1 %v5495_v54, %s7056_s8  ;;  %v4397_v53 = vpop.f32.mrb[43].mxu0 }
0x1a6d   : > { %4416 = vrot.lane.b32.xlu0 %v4310_v57, %s7056_s8 }
0x1a70   : > { %4426 = vrot.lane.b32.xlu1 %v5502_v59, %s7057_s26 }
0x1a71   : > { %4424 = vrot.lane.b32.xlu0 %v4397_v53, %s7057_s26 }
0x1ada   : > { %v4411_v60 = vpop.permute.xlu1 %4410 }
0x1adb   : > { %v4409_v62 = vpop.permute.xlu0 %4408  ;;  %v4431_v2 = vsel %vm1023_vm5, %v5481_v47, %v4411_v60 }
0x1adc   : > { %v4430_v63 = vsel %vm1023_vm5, %v4136_v51, %v4409_v62 }
0x1ade   : > { %v4419_v33 = vpop.permute.xlu1 %4418 }
0x1adf   : > { %v4417_v48 = vpop.permute.xlu0 %4416  ;;  %v4433_v6 = vsel %vm1376_vm7, %v4431_v2, %v4419_v33 }
0x1ae0   : > { %v4432_v4 = vsel %vm1376_vm7, %v4430_v63, %v4417_v48 }
0x1ae2   : > { %v4427_v1 = vpop.permute.xlu1 %4426 }
0x1ae3   : > { %v4425_v5 = vpop.permute.xlu0 %4424  ;;  %v4435_v7 = vsel %vm1841_vm8, %v4433_v6, %v4427_v1 }
0x1ae4   : > { %v4434_v61 = vsel %vm1841_vm8, %v4432_v4, %v4425_v5 }
0x1ae5   : > { %5511 = vmatprep.mubr.msk.f32.mxu1 %vm864_vm4, %v4434_v61 }
0x1ae6   : > { %5512 = vmatmul.mubr.msk.f32.vlgmr.msra.gmra.mrb[24].mxu1 %vm864_vm4, %v4435_v7 }
0x1ae7   : > { %5542 = vmatprep.mubr.msk.f32.mxu1 %vm6098_vm9, %v6099_v40  ;;  %5810 = vmatpush3.bf16.msra.mxu1 %v5809_v21 }
0x1ae8   : > { %5811 = vmatprep.subr.bf16.mxu1 %v6097_v35 }
0x1aeb   : > { %5813 = vmatpush3.bf16.msra.mxu1 %v5812_v24 }
0x1aec   : > { %5540 = vmatprep.subr.mxu1 %v6099_v40 }
0x1aef   : > { %5541 = vmatpush3.msra.mxu1 %v4684_v26 }
0x1bb9   : > { %v5513_v10 = vpop.f32.mrb[24].mxu1 }
0x1bba   : > { %v4520_v0 = vadd.f32 %v5513_v10, %v4974_v9  ;;  %v4514_v13 = vpop.f32.mrb[25].mxu1 }
0x1bbb   : > { %v4515_v11 = vadd.f32 %v4974_v9, %v4514_v13 }
0x1bbd   : > { %v5800_v14 = vpack.c.bf16 %v4520_v0, %v4515_v11 }
0x1bbf   : > { %5801 = vmatpush3.bf16.msra.mxu0 %v5800_v14 }
0x1bc0   : > { %5802 = vmatprep.subr.bf16.mxu0 %v6097_v35 }
0x1bc2   : > { %5519 = vmatmul.mubr.msk.f32.vlgmr.msra.gmra.mrb[44].mxu0 %vm1376_vm7, %v4523_v52 }
0x1bc3   : > { %5804 = vmatpush3.bf16.msra.mxu0 %v5803_v15  ;;  %5529 = vmatprep.mubr.msk.f32.mxu0 %vm6098_vm9, %v6099_v40 }
0x1bc4   : > { %5805 = vmatprep.subr.bf16.mxu0 %v6097_v35 }
0x1bc7   : > { %5807 = vmatpush3.bf16.msra.mxu0 %v5806_v17 }
0x1c95   : > { %v4593_v50 = vpop.f32.mrb[44].mxu0 }
0x1c96   : > { %v5520_v18 = vpop.f32.mrb[45].mxu0  ;;  %5530 = vmatmul.mubr.msk.f32.vlgmr.msra.gmra.mrb[46].mxu0 %vm864_vm4, %v4593_v50 }
0x1d69   : > { %v4671_v28 = vpop.f32.mrb[46].mxu0 }
0x1d6a   : > { %v4672_v29 = vadd.f32 %v4671_v28, %v4601_v27  ;;  %v5531_v31 = vpop.f32.mrb[47].mxu0 }
0x1d6c   : > { %v4676_v32 = vmul.f32 0.70710677, %v4672_v29  ;;  %v4675_v34 = vmul.f32 0.5, %v4672_v29 }
0x1d6e   : > { %6074 = verf.f32 %v4676_v32 }
0x1d78   : > { %v6075_v3 = vpop.eup %6074 }
0x1d79   : > { %v4678_v25 = vadd.f32 1.0, %v6075_v3 }
0x1d7b   : > { %v4679_v36 = vmul.f32 %v4678_v25, %v4675_v34 }
0x1d7d   : > { %5543 = vmatmul.mubr.msk.f32.vlgmr.msra.gmra.mrb[26].mxu1 %vm4686_vm10, %v4679_v36 }
0x1e50   : > { %v4756_v56 = vpop.f32.mrb[26].mxu1 }
0x1e51   : > { %v4757_v38 = vadd.f32 %v4756_v56, %v4685_v37  ;;  %v5544_v8 = vpop.f32.mrb[27].mxu1 }
0x1e53   : > { %v4766_v39 = vand.u32 2147483647, %v4757_v38  ;;  %v4765_v51 = vmax.f32 %v4757_v38, 0.0 }
0x1e55   : > { %v4767_v12 = vsub.f32 0.0, %v4766_v39 }
0x1e57   : > { %v4768_v41 = vmul.f32 1.442695, %v4767_v12 }
0x1e59   : > { %6076 = vpow2.f32 %v4768_v41 }
0x1e63   : > { %v6077_v42 = vpop.eup %6076 }
0x1e64   : > { %v4770_v44 = vadd.f32 1.0, %v6077_v42 }
0x1e66   : > { %6078 = vlog2.f32 %v4770_v44 }
0x1e70   : > { %v6079_v47 = vpop.eup %6078 }
0x1e71   : > { %v4772_v54 = vmul.f32 0.6931472, %v6079_v47 }
0x1e73   : > { %v4773_v55 = vadd.f32 %v4772_v54, %v4765_v51 }
0x1e75   : > { %v4774_v57 = vsel %vm4764_vm13, %v4773_v55, %v4757_v38 }
0x1e76   : > { %4776 = vst.msk [vmem:[%s760_s30] sm:$0x1] %vm4775_vm14, %v4774_v57 }
0x1e77 PF: > { %s7062_s1 = sld [smem:[#allocation2_spill]] }
0x1e7d   : > { %s35_s29 = sadd.s32 1, %s7062_s1  }
0x1e7e   : > { %p32_p4 = scmp.ge.s32.totalorder %s35_s29, 4  }
0x1e80   :  { %34 = sbr.rel (!%p32_p4) target bundleno = 14 (0xe), region = 162 }

</bundles_post_ra>
